<compile_context>
chip_gen: v7x
topology: tpu7x:2x2x1
jax: 0.10.0
libtpu: 0.0.40
codegen_flags: <defaults>
</compile_context>

<pallas_src>
import math

import jax
import jax.numpy as jnp
from jax.experimental import pallas as pl
from jax.experimental.pallas import tpu as pltpu

# ----------------------------- small BERT config -----------------------------
VOCAB = 64
HIDDEN = 128
NUM_LAYERS = 2
NUM_HEADS = 2
HEAD_DIM = HIDDEN // NUM_HEADS
INTERMEDIATE = 256
MAX_POS = 64
TYPE_VOCAB = 2
NUM_LABELS = 2
NUM_SOFT_TOKENS = 8
SEQ_LEN = 8
BATCH = 2
TOTAL_SEQ = NUM_SOFT_TOKENS + SEQ_LEN
LANE = 128
LN_EPS = 1e-12


# ------------------------------- fused kernel --------------------------------
def _fused_forward_kernel(
    emb1_ref, soft_ref, add2_ref, mask_ref, embg_ref, embb_ref,
    wqkv_ref, bqkv_ref, wo_ref, bo_ref, ln1g_ref, ln1b_ref,
    wi_ref, bi_ref, wo2_ref, bo2_ref, ln2g_ref, ln2b_ref,
    poolw_ref, poolb_ref, clsw_ref, clsb_ref,
    out_ref,
):
    f32 = jnp.float32
    B, S, P, T, H = BATCH, SEQ_LEN, NUM_SOFT_TOKENS, TOTAL_SEQ, HIDDEN

    def ln(x, g, b):
        mean = jnp.mean(x, axis=-1, keepdims=True)
        var = jnp.mean(jnp.square(x - mean), axis=-1, keepdims=True)
        return (x - mean) * jax.lax.rsqrt(var + LN_EPS) * g + b

    emb_g = embg_ref[...]
    emb_b = embb_ref[...]

    # ---- stage 1: first BertEmbeddings LayerNorm on the original sequence ----
    emb1 = ln(emb1_ref[...].astype(f32), emb_g, emb_b)          # (B*S, H)

    # ---- stage 2: soft-prompt prepend + second BertEmbeddings (pos/type + LN)
    add2 = add2_ref[...].astype(f32)                            # (T, H)
    sp_rows = soft_ref[...].astype(f32) + add2[:P, :]           # (P, H), shared
    sp_block = jnp.broadcast_to(sp_rows[None, :, :], (B, P, H))  # (B, P, H)
    tail = emb1.reshape(B, S, H) + add2[P:, :][None, :, :]       # (B, S, H)
    h = ln(jnp.concatenate([sp_block, tail], axis=1).reshape(B * T, H),
           emb_g, emb_b)                                         # (B*T, H)

    # additive attention-mask bias, hoisted out of the layer loop
    bias = (1.0 - mask_ref[...].astype(f32)) * (-1e9)            # (B, 1, T)
    scale = 1.0 / math.sqrt(HEAD_DIM)

    # ---- encoder layers (statically unrolled) ----
    for l in range(NUM_LAYERS):
        # fused QKV projection: one lane-dense 3H-wide matmul
        qkv = jnp.dot(h, wqkv_ref[l], preferred_element_type=f32) + bqkv_ref[l]
        q = qkv[:, 0 * H:1 * H].reshape(B, T, H)
        k = qkv[:, 1 * H:2 * H].reshape(B, T, H)
        v = qkv[:, 2 * H:3 * H].reshape(B, T, H)

        ctx_heads = []
        for hh in range(NUM_HEADS):
            sl = slice(hh * HEAD_DIM, (hh + 1) * HEAD_DIM)
            qs, ks, vs = q[..., sl], k[..., sl], v[..., sl]
            s = jnp.einsum("bqd,bkd->bqk", qs, ks,
                           preferred_element_type=f32) * scale + bias
            s = s - jnp.max(s, axis=-1, keepdims=True)
            p = jnp.exp(s)
            p = p / jnp.sum(p, axis=-1, keepdims=True)
            ctx_heads.append(jnp.einsum("bqk,bkd->bqd", p, vs,
                                        preferred_element_type=f32))
        # one lane-dense (B*T, H) context, no per-head masked stores
        ctx = jnp.concatenate(ctx_heads, axis=-1).reshape(B * T, H)

        attn_out = jnp.dot(ctx, wo_ref[l], preferred_element_type=f32) + bo_ref[l]
        h1 = ln(attn_out + h, ln1g_ref[l], ln1b_ref[l])

        inter = jnp.dot(h1, wi_ref[l], preferred_element_type=f32) + bi_ref[l]
        # TODO(synk): HF BERT uses erf GELU; tanh approximation is numerically close.
        inter = jax.nn.gelu(inter, approximate=True)
        ffn = jnp.dot(inter, wo2_ref[l], preferred_element_type=f32) + bo2_ref[l]
        h = ln(ffn + h1, ln2g_ref[l], ln2b_ref[l])

    # ---- pooler on position 0 (first soft-prompt token) + classifier ----
    cls_rows = h.reshape(B, T, H)[:, 0, :]                       # (B, H)
    pooled = jnp.tanh(
        jnp.dot(cls_rows, poolw_ref[...], preferred_element_type=f32)
        + poolb_ref[...])
    # classifier padded to 128 lanes -> single unmasked lane-dense store
    logits = jnp.dot(pooled, clsw_ref[...], preferred_element_type=f32) + clsb_ref[...]
    out_ref[...] = logits.astype(out_ref.dtype)


def _full_vmem_spec(shape):
    n = len(shape)
    return pl.BlockSpec(shape, lambda i, _n=n: (0,) * _n)


# ------------------------------ model (JAX glue) ------------------------------
@jax.jit
def forward(params, input_ids, attention_mask, token_type_ids):
    B, S = input_ids.shape
    P, T, H = NUM_SOFT_TOKENS, TOTAL_SEQ, HIDDEN

    # Embedding-table gathers are data-dependent -> XLA glue (tiny).
    # NOTE: the reference concatenates token_type_ids but never forwards it to
    # the inner BertModel, so both embedding passes use token type 0.
    del token_type_ids
    word = params["word_emb"][input_ids]                                   # (B,S,H)
    emb_in1 = (word
               + params["pos_emb"][:S][None, :, :]
               + params["type_emb"][0][None, None, :]).reshape(B * S, H)
    add2 = params["pos_emb"][:T] + params["type_emb"][0][None, :]          # (T,H)

    mask_ext = jnp.concatenate(
        [jnp.ones((B, P), attention_mask.dtype), attention_mask], axis=1
    ).astype(jnp.float32).reshape(B, 1, T)

    args = (emb_in1, params["soft_prompts"], add2, mask_ext,
            params["emb_ln_g"], params["emb_ln_b"],
            params["wqkv"], params["bqkv"], params["wo"], params["bo"],
            params["ln1_g"], params["ln1_b"],
            params["wi"], params["bi"], params["wo2"], params["bo2"],
            params["ln2_g"], params["ln2_b"],
            params["pool_w"], params["pool_b"],
            params["cls_w_pad"], params["cls_b_pad"])

    out = pl.pallas_call(
        _fused_forward_kernel,
        out_shape=jax.ShapeDtypeStruct((B, LANE), jnp.float32),
        grid=(1,),
        in_specs=[_full_vmem_spec(a.shape) for a in args],
        out_specs=_full_vmem_spec((B, LANE)),
        compiler_params=pltpu.CompilerParams(
            dimension_semantics=("arbitrary",),
            vmem_limit_bytes=64 * 1024 * 1024),
    )(*args)
    return out[:, :NUM_LABELS]


# ------------------------------ deterministic init ----------------------------
def init_params(key):
    keys = iter(jax.random.split(key, 64))

    def nrm(shape, scale=0.02):
        return (scale * jax.random.normal(next(keys), shape)).astype(jnp.float32)

    L, H, I = NUM_LAYERS, HIDDEN, INTERMEDIATE
    params = dict(
        word_emb=nrm((VOCAB, H)),
        pos_emb=nrm((MAX_POS, H)),
        type_emb=nrm((TYPE_VOCAB, H)),
        emb_ln_g=jnp.ones((1, H), jnp.float32),
        emb_ln_b=jnp.zeros((1, H), jnp.float32),
        # SoftPrompt: nn.Parameter(torch.randn(num_tokens, embedding_size))
        soft_prompts=jax.random.normal(
            next(keys), (NUM_SOFT_TOKENS, H)).astype(jnp.float32),
        # per-layer weights stacked on a leading layer axis; QKV fused to 3H.
        wqkv=nrm((L, H, 3 * H)),
        bqkv=jnp.zeros((L, 1, 3 * H), jnp.float32),
        wo=nrm((L, H, H)),
        bo=jnp.zeros((L, 1, H), jnp.float32),
        ln1_g=jnp.ones((L, 1, H), jnp.float32),
        ln1_b=jnp.zeros((L, 1, H), jnp.float32),
        wi=nrm((L, H, I)),
        bi=jnp.zeros((L, 1, I), jnp.float32),
        wo2=nrm((L, I, H)),
        bo2=jnp.zeros((L, 1, H), jnp.float32),
        ln2_g=jnp.ones((L, 1, H), jnp.float32),
        ln2_b=jnp.zeros((L, 1, H), jnp.float32),
        pool_w=nrm((H, H)),
        pool_b=jnp.zeros((1, H), jnp.float32),
    )
    cls_w = nrm((H, NUM_LABELS))
    # lane-dense classifier head: zero-pad to 128 lanes, slice logits outside.
    params["cls_w_pad"] = jnp.zeros((H, LANE), jnp.float32).at[:, :NUM_LABELS].set(cls_w)
    params["cls_b_pad"] = jnp.zeros((1, LANE), jnp.float32)
    return params


if __name__ == "__main__":
    key = jax.random.PRNGKey(0)
    pkey, ikey = jax.random.split(key)
    params = init_params(pkey)

    input_ids = jax.random.randint(ikey, (BATCH, SEQ_LEN), 0, VOCAB, dtype=jnp.int32)
    attention_mask = jnp.ones((BATCH, SEQ_LEN), jnp.float32).at[1, SEQ_LEN - 2:].set(0.0)
    token_type_ids = jnp.zeros((BATCH, SEQ_LEN), jnp.int32).at[:, SEQ_LEN // 2:].set(1)

    logits = forward(params, input_ids, attention_mask, token_type_ids)
    jax.block_until_ready(logits)
    assert logits.shape == (BATCH, NUM_LABELS)
    print("KERNEL_OK")
</pallas_src>

<mosaic_0001>
module attributes {stable_mosaic.version = 11 : i64} {
  func.func @_fused_forward_kernel(%arg0: i32, %arg1: memref<16x128xf32, #tpu.memory_space<vmem>>, %arg2: memref<8x128xf32, #tpu.memory_space<vmem>>, %arg3: memref<16x128xf32, #tpu.memory_space<vmem>>, %arg4: memref<2x1x16xf32, #tpu.memory_space<vmem>>, %arg5: memref<1x128xf32, #tpu.memory_space<vmem>>, %arg6: memref<1x128xf32, #tpu.memory_space<vmem>>, %arg7: memref<2x128x384xf32, #tpu.memory_space<vmem>>, %arg8: memref<2x1x384xf32, #tpu.memory_space<vmem>>, %arg9: memref<2x128x128xf32, #tpu.memory_space<vmem>>, %arg10: memref<2x1x128xf32, #tpu.memory_space<vmem>>, %arg11: memref<2x1x128xf32, #tpu.memory_space<vmem>>, %arg12: memref<2x1x128xf32, #tpu.memory_space<vmem>>, %arg13: memref<2x128x256xf32, #tpu.memory_space<vmem>>, %arg14: memref<2x1x256xf32, #tpu.memory_space<vmem>>, %arg15: memref<2x256x128xf32, #tpu.memory_space<vmem>>, %arg16: memref<2x1x128xf32, #tpu.memory_space<vmem>>, %arg17: memref<2x1x128xf32, #tpu.memory_space<vmem>>, %arg18: memref<2x1x128xf32, #tpu.memory_space<vmem>>, %arg19: memref<128x128xf32, #tpu.memory_space<vmem>>, %arg20: memref<1x128xf32, #tpu.memory_space<vmem>>, %arg21: memref<128x128xf32, #tpu.memory_space<vmem>>, %arg22: memref<1x128xf32, #tpu.memory_space<vmem>>, %arg23: memref<2x128xf32, #tpu.memory_space<vmem>>) attributes {dimension_semantics = [#tpu.dimension_semantics<arbitrary>], iteration_bounds = array<i64: 1>, scalar_prefetch = 0 : i64, scratch_operands = 0 : i64, tpu.core_type = #tpu.core_type<tc>, window_params = [{pipeline_mode = #tpu.pipeline_mode<synchronous>, transform_indices = @transform_0, window_bounds = array<i64: 16, 128>}, {pipeline_mode = #tpu.pipeline_mode<synchronous>, transform_indices = @transform_1, window_bounds = array<i64: 8, 128>}, {pipeline_mode = #tpu.pipeline_mode<synchronous>, transform_indices = @transform_2, window_bounds = array<i64: 16, 128>}, {pipeline_mode = #tpu.pipeline_mode<synchronous>, transform_indices = @transform_3, window_bounds = array<i64: 2, 1, 16>}, {pipeline_mode = #tpu.pipeline_mode<synchronous>, transform_indices = @transform_4, window_bounds = array<i64: 1, 128>}, {pipeline_mode = #tpu.pipeline_mode<synchronous>, transform_indices = @transform_5, window_bounds = array<i64: 1, 128>}, {pipeline_mode = #tpu.pipeline_mode<synchronous>, transform_indices = @transform_6, window_bounds = array<i64: 2, 128, 384>}, {pipeline_mode = #tpu.pipeline_mode<synchronous>, transform_indices = @transform_7, window_bounds = array<i64: 2, 1, 384>}, {pipeline_mode = #tpu.pipeline_mode<synchronous>, transform_indices = @transform_8, window_bounds = array<i64: 2, 128, 128>}, {pipeline_mode = #tpu.pipeline_mode<synchronous>, transform_indices = @transform_9, window_bounds = array<i64: 2, 1, 128>}, {pipeline_mode = #tpu.pipeline_mode<synchronous>, transform_indices = @transform_10, window_bounds = array<i64: 2, 1, 128>}, {pipeline_mode = #tpu.pipeline_mode<synchronous>, transform_indices = @transform_11, window_bounds = array<i64: 2, 1, 128>}, {pipeline_mode = #tpu.pipeline_mode<synchronous>, transform_indices = @transform_12, window_bounds = array<i64: 2, 128, 256>}, {pipeline_mode = #tpu.pipeline_mode<synchronous>, transform_indices = @transform_13, window_bounds = array<i64: 2, 1, 256>}, {pipeline_mode = #tpu.pipeline_mode<synchronous>, transform_indices = @transform_14, window_bounds = array<i64: 2, 256, 128>}, {pipeline_mode = #tpu.pipeline_mode<synchronous>, transform_indices = @transform_15, window_bounds = array<i64: 2, 1, 128>}, {pipeline_mode = #tpu.pipeline_mode<synchronous>, transform_indices = @transform_16, window_bounds = array<i64: 2, 1, 128>}, {pipeline_mode = #tpu.pipeline_mode<synchronous>, transform_indices = @transform_17, window_bounds = array<i64: 2, 1, 128>}, {pipeline_mode = #tpu.pipeline_mode<synchronous>, transform_indices = @transform_18, window_bounds = array<i64: 128, 128>}, {pipeline_mode = #tpu.pipeline_mode<synchronous>, transform_indices = @transform_19, window_bounds = array<i64: 1, 128>}, {pipeline_mode = #tpu.pipeline_mode<synchronous>, transform_indices = @transform_20, window_bounds = array<i64: 128, 128>}, {pipeline_mode = #tpu.pipeline_mode<synchronous>, transform_indices = @transform_21, window_bounds = array<i64: 1, 128>}, {pipeline_mode = #tpu.pipeline_mode<synchronous>, transform_indices = @transform_22, window_bounds = array<i64: 2, 128>}]} {
    %c0 = arith.constant 0 : index
    %c0_0 = arith.constant 0 : index
    %0 = vector.load %arg5[%c0, %c0_0] : memref<1x128xf32, #tpu.memory_space<vmem>>, vector<1x128xf32>
    %c0_1 = arith.constant 0 : index
    %c0_2 = arith.constant 0 : index
    %1 = vector.load %arg6[%c0_1, %c0_2] : memref<1x128xf32, #tpu.memory_space<vmem>>, vector<1x128xf32>
    %c0_3 = arith.constant 0 : index
    %c0_4 = arith.constant 0 : index
    %2 = vector.load %arg1[%c0_3, %c0_4] : memref<16x128xf32, #tpu.memory_space<vmem>>, vector<16x128xf32>
    %cst = arith.constant dense<0.000000e+00> : vector<16xf32>
    %3 = vector.multi_reduction <add>, %2, %cst [1] : vector<16x128xf32> to vector<16xf32>
    %4 = vector.shape_cast %3 : vector<16xf32> to vector<16x1xf32>
    %cst_5 = arith.constant 1.280000e+02 : f32
    %5 = vector.broadcast %cst_5 : f32 to vector<16x1xf32>
    %6 = arith.divf %4, %5 : vector<16x1xf32>
    %7 = vector.broadcast %6 : vector<16x1xf32> to vector<16x128xf32>
    %8 = arith.subf %2, %7 : vector<16x128xf32>
    %9 = arith.mulf %8, %8 : vector<16x128xf32>
    %cst_6 = arith.constant dense<0.000000e+00> : vector<16xf32>
    %10 = vector.multi_reduction <add>, %9, %cst_6 [1] : vector<16x128xf32> to vector<16xf32>
    %11 = vector.shape_cast %10 : vector<16xf32> to vector<16x1xf32>
    %cst_7 = arith.constant 1.280000e+02 : f32
    %12 = vector.broadcast %cst_7 : f32 to vector<16x1xf32>
    %13 = arith.divf %11, %12 : vector<16x1xf32>
    %14 = vector.broadcast %6 : vector<16x1xf32> to vector<16x128xf32>
    %15 = arith.subf %2, %14 : vector<16x128xf32>
    %cst_8 = arith.constant 9.99999996E-13 : f32
    %16 = vector.broadcast %cst_8 : f32 to vector<16x1xf32>
    %17 = arith.addf %13, %16 : vector<16x1xf32>
    %18 = math.rsqrt %17 : vector<16x1xf32>
    %19 = vector.broadcast %18 : vector<16x1xf32> to vector<16x128xf32>
    %20 = arith.mulf %15, %19 : vector<16x128xf32>
    %21 = vector.broadcast %0 : vector<1x128xf32> to vector<16x128xf32>
    %22 = arith.mulf %20, %21 : vector<16x128xf32>
    %23 = vector.broadcast %1 : vector<1x128xf32> to vector<16x128xf32>
    %24 = arith.addf %22, %23 : vector<16x128xf32>
    %c0_9 = arith.constant 0 : index
    %c0_10 = arith.constant 0 : index
    %25 = vector.load %arg3[%c0_9, %c0_10] : memref<16x128xf32, #tpu.memory_space<vmem>>, vector<16x128xf32>
    %c0_11 = arith.constant 0 : index
    %c0_12 = arith.constant 0 : index
    %26 = vector.load %arg2[%c0_11, %c0_12] : memref<8x128xf32, #tpu.memory_space<vmem>>, vector<8x128xf32>
    %27 = vector.extract_strided_slice %25 {offsets = [0, 0], sizes = [8, 128], strides = [1, 1]} : vector<16x128xf32> to vector<8x128xf32>
    %28 = arith.addf %26, %27 : vector<8x128xf32>
    %29 = vector.shape_cast %28 : vector<8x128xf32> to vector<1x8x128xf32>
    %30 = vector.shape_cast %29 : vector<1x8x128xf32> to vector<1x8x128xf32>
    %31 = vector.broadcast %30 : vector<1x8x128xf32> to vector<2x8x128xf32>
    %32 = vector.shape_cast %24 : vector<16x128xf32> to vector<2x8x128xf32>
    %33 = vector.extract_strided_slice %25 {offsets = [8, 0], sizes = [8, 128], strides = [1, 1]} : vector<16x128xf32> to vector<8x128xf32>
    %34 = vector.shape_cast %33 : vector<8x128xf32> to vector<1x8x128xf32>
    %35 = vector.broadcast %34 : vector<1x8x128xf32> to vector<2x8x128xf32>
    %36 = arith.addf %32, %35 : vector<2x8x128xf32>
    %37 = tpu.concatenate %31, %36 in 1 : vector<2x8x128xf32>, vector<2x8x128xf32> -> vector<2x16x128xf32>
    %38 = vector.shape_cast %37 : vector<2x16x128xf32> to vector<32x128xf32>
    %cst_13 = arith.constant dense<0.000000e+00> : vector<32xf32>
    %39 = vector.multi_reduction <add>, %38, %cst_13 [1] : vector<32x128xf32> to vector<32xf32>
    %40 = vector.shape_cast %39 : vector<32xf32> to vector<32x1xf32>
    %cst_14 = arith.constant 1.280000e+02 : f32
    %41 = vector.broadcast %cst_14 : f32 to vector<32x1xf32>
    %42 = arith.divf %40, %41 : vector<32x1xf32>
    %43 = vector.broadcast %42 : vector<32x1xf32> to vector<32x128xf32>
    %44 = arith.subf %38, %43 : vector<32x128xf32>
    %45 = arith.mulf %44, %44 : vector<32x128xf32>
    %cst_15 = arith.constant dense<0.000000e+00> : vector<32xf32>
    %46 = vector.multi_reduction <add>, %45, %cst_15 [1] : vector<32x128xf32> to vector<32xf32>
    %47 = vector.shape_cast %46 : vector<32xf32> to vector<32x1xf32>
    %cst_16 = arith.constant 1.280000e+02 : f32
    %48 = vector.broadcast %cst_16 : f32 to vector<32x1xf32>
    %49 = arith.divf %47, %48 : vector<32x1xf32>
    %50 = vector.broadcast %42 : vector<32x1xf32> to vector<32x128xf32>
    %51 = arith.subf %38, %50 : vector<32x128xf32>
    %cst_17 = arith.constant 9.99999996E-13 : f32
    %52 = vector.broadcast %cst_17 : f32 to vector<32x1xf32>
    %53 = arith.addf %49, %52 : vector<32x1xf32>
    %54 = math.rsqrt %53 : vector<32x1xf32>
    %55 = vector.broadcast %54 : vector<32x1xf32> to vector<32x128xf32>
    %56 = arith.mulf %51, %55 : vector<32x128xf32>
    %57 = vector.broadcast %0 : vector<1x128xf32> to vector<32x128xf32>
    %58 = arith.mulf %56, %57 : vector<32x128xf32>
    %59 = vector.broadcast %1 : vector<1x128xf32> to vector<32x128xf32>
    %60 = arith.addf %58, %59 : vector<32x128xf32>
    %c0_18 = arith.constant 0 : index
    %c0_19 = arith.constant 0 : index
    %c0_20 = arith.constant 0 : index
    %61 = vector.load %arg4[%c0_18, %c0_19, %c0_20] : memref<2x1x16xf32, #tpu.memory_space<vmem>>, vector<2x1x16xf32>
    %cst_21 = arith.constant 1.000000e+00 : f32
    %62 = vector.broadcast %cst_21 : f32 to vector<2x1x16xf32>
    %63 = arith.subf %62, %61 : vector<2x1x16xf32>
    %cst_22 = arith.constant -1.000000e+09 : f32
    %64 = vector.broadcast %cst_22 : f32 to vector<2x1x16xf32>
    %65 = arith.mulf %63, %64 : vector<2x1x16xf32>
    %c0_23 = arith.constant 0 : index
    %c0_24 = arith.constant 0 : index
    %c0_25 = arith.constant 0 : index
    %66 = vector.load %arg7[%c0_23, %c0_24, %c0_25] : memref<2x128x384xf32, #tpu.memory_space<vmem>>, vector<1x128x384xf32>
    %67 = vector.shape_cast %66 : vector<1x128x384xf32> to vector<128x384xf32>
    %cst_26 = arith.constant dense<0.000000e+00> : vector<32x384xf32>
    %68 = tpu.matmul %60, %67, %cst_26 {dimension_numbers = #tpu.dot_dimension_numbers<[1], [0], [0], [1], [0, 0, 1, 1], [], []>} : vector<32x128xf32>, vector<128x384xf32>, vector<32x384xf32> -> vector<32x384xf32>
    %c0_27 = arith.constant 0 : index
    %c0_28 = arith.constant 0 : index
    %c0_29 = arith.constant 0 : index
    %69 = vector.load %arg8[%c0_27, %c0_28, %c0_29] : memref<2x1x384xf32, #tpu.memory_space<vmem>>, vector<1x1x384xf32>
    %70 = vector.shape_cast %69 : vector<1x1x384xf32> to vector<1x384xf32>
    %71 = vector.broadcast %70 : vector<1x384xf32> to vector<32x384xf32>
    %72 = arith.addf %68, %71 : vector<32x384xf32>
    %73 = vector.extract_strided_slice %72 {offsets = [0, 0], sizes = [32, 128], strides = [1, 1]} : vector<32x384xf32> to vector<32x128xf32>
    %74 = vector.shape_cast %73 : vector<32x128xf32> to vector<2x16x128xf32>
    %75 = vector.extract_strided_slice %72 {offsets = [0, 128], sizes = [32, 128], strides = [1, 1]} : vector<32x384xf32> to vector<32x128xf32>
    %76 = vector.shape_cast %75 : vector<32x128xf32> to vector<2x16x128xf32>
    %77 = vector.extract_strided_slice %72 {offsets = [0, 256], sizes = [32, 128], strides = [1, 1]} : vector<32x384xf32> to vector<32x128xf32>
    %78 = vector.shape_cast %77 : vector<32x128xf32> to vector<2x16x128xf32>
    %79 = vector.extract_strided_slice %74 {offsets = [0, 0, 0], sizes = [2, 16, 64], strides = [1, 1, 1]} : vector<2x16x128xf32> to vector<2x16x64xf32>
    %80 = vector.extract_strided_slice %76 {offsets = [0, 0, 0], sizes = [2, 16, 64], strides = [1, 1, 1]} : vector<2x16x128xf32> to vector<2x16x64xf32>
    %81 = vector.extract_strided_slice %78 {offsets = [0, 0, 0], sizes = [2, 16, 64], strides = [1, 1, 1]} : vector<2x16x128xf32> to vector<2x16x64xf32>
    "tpu.trace_start"() <{level = 10 : i32, message = "bqd,bkd->bqk"}> : () -> ()
    %cst_30 = arith.constant dense<0.000000e+00> : vector<2x16x16xf32>
    %82 = tpu.matmul %79, %80, %cst_30 {dimension_numbers = #tpu.dot_dimension_numbers<[2], [2], [1], [1], [0, 0, 0, 1, 1, 1], [0], [0]>} : vector<2x16x64xf32>, vector<2x16x64xf32>, vector<2x16x16xf32> -> vector<2x16x16xf32>
    "tpu.trace_stop"() : () -> ()
    %cst_31 = arith.constant 1.250000e-01 : f32
    %83 = vector.broadcast %cst_31 : f32 to vector<2x16x16xf32>
    %84 = arith.mulf %82, %83 : vector<2x16x16xf32>
    %85 = vector.broadcast %65 : vector<2x1x16xf32> to vector<2x16x16xf32>
    %86 = arith.addf %84, %85 : vector<2x16x16xf32>
    %cst_32 = arith.constant dense<0xFF800000> : vector<2x16xf32>
    %87 = vector.multi_reduction <maximumf>, %86, %cst_32 [2] : vector<2x16x16xf32> to vector<2x16xf32>
    %88 = vector.shape_cast %87 : vector<2x16xf32> to vector<2x16x1xf32>
    %89 = vector.broadcast %88 : vector<2x16x1xf32> to vector<2x16x16xf32>
    %90 = arith.subf %86, %89 : vector<2x16x16xf32>
    %91 = math.exp %90 : vector<2x16x16xf32>
    %cst_33 = arith.constant dense<0.000000e+00> : vector<2x16xf32>
    %92 = vector.multi_reduction <add>, %91, %cst_33 [2] : vector<2x16x16xf32> to vector<2x16xf32>
    %93 = vector.shape_cast %92 : vector<2x16xf32> to vector<2x16x1xf32>
    %94 = vector.broadcast %93 : vector<2x16x1xf32> to vector<2x16x16xf32>
    %95 = arith.divf %91, %94 : vector<2x16x16xf32>
    "tpu.trace_start"() <{level = 10 : i32, message = "bqk,bkd->bqd"}> : () -> ()
    %cst_34 = arith.constant dense<0.000000e+00> : vector<2x16x64xf32>
    %96 = tpu.matmul %95, %81, %cst_34 {dimension_numbers = #tpu.dot_dimension_numbers<[2], [1], [1], [2], [0, 0, 0, 1, 1, 2], [0], [0]>} : vector<2x16x16xf32>, vector<2x16x64xf32>, vector<2x16x64xf32> -> vector<2x16x64xf32>
    "tpu.trace_stop"() : () -> ()
    %97 = vector.extract_strided_slice %74 {offsets = [0, 0, 64], sizes = [2, 16, 64], strides = [1, 1, 1]} : vector<2x16x128xf32> to vector<2x16x64xf32>
    %98 = vector.extract_strided_slice %76 {offsets = [0, 0, 64], sizes = [2, 16, 64], strides = [1, 1, 1]} : vector<2x16x128xf32> to vector<2x16x64xf32>
    %99 = vector.extract_strided_slice %78 {offsets = [0, 0, 64], sizes = [2, 16, 64], strides = [1, 1, 1]} : vector<2x16x128xf32> to vector<2x16x64xf32>
    "tpu.trace_start"() <{level = 10 : i32, message = "bqd,bkd->bqk"}> : () -> ()
    %cst_35 = arith.constant dense<0.000000e+00> : vector<2x16x16xf32>
    %100 = tpu.matmul %97, %98, %cst_35 {dimension_numbers = #tpu.dot_dimension_numbers<[2], [2], [1], [1], [0, 0, 0, 1, 1, 1], [0], [0]>} : vector<2x16x64xf32>, vector<2x16x64xf32>, vector<2x16x16xf32> -> vector<2x16x16xf32>
    "tpu.trace_stop"() : () -> ()
    %cst_36 = arith.constant 1.250000e-01 : f32
    %101 = vector.broadcast %cst_36 : f32 to vector<2x16x16xf32>
    %102 = arith.mulf %100, %101 : vector<2x16x16xf32>
    %103 = vector.broadcast %65 : vector<2x1x16xf32> to vector<2x16x16xf32>
    %104 = arith.addf %102, %103 : vector<2x16x16xf32>
    %cst_37 = arith.constant dense<0xFF800000> : vector<2x16xf32>
    %105 = vector.multi_reduction <maximumf>, %104, %cst_37 [2] : vector<2x16x16xf32> to vector<2x16xf32>
    %106 = vector.shape_cast %105 : vector<2x16xf32> to vector<2x16x1xf32>
    %107 = vector.broadcast %106 : vector<2x16x1xf32> to vector<2x16x16xf32>
    %108 = arith.subf %104, %107 : vector<2x16x16xf32>
    %109 = math.exp %108 : vector<2x16x16xf32>
    %cst_38 = arith.constant dense<0.000000e+00> : vector<2x16xf32>
    %110 = vector.multi_reduction <add>, %109, %cst_38 [2] : vector<2x16x16xf32> to vector<2x16xf32>
    %111 = vector.shape_cast %110 : vector<2x16xf32> to vector<2x16x1xf32>
    %112 = vector.broadcast %111 : vector<2x16x1xf32> to vector<2x16x16xf32>
    %113 = arith.divf %109, %112 : vector<2x16x16xf32>
    "tpu.trace_start"() <{level = 10 : i32, message = "bqk,bkd->bqd"}> : () -> ()
    %cst_39 = arith.constant dense<0.000000e+00> : vector<2x16x64xf32>
    %114 = tpu.matmul %113, %99, %cst_39 {dimension_numbers = #tpu.dot_dimension_numbers<[2], [1], [1], [2], [0, 0, 0, 1, 1, 2], [0], [0]>} : vector<2x16x16xf32>, vector<2x16x64xf32>, vector<2x16x64xf32> -> vector<2x16x64xf32>
    "tpu.trace_stop"() : () -> ()
    %115 = tpu.concatenate %96, %114 in 2 : vector<2x16x64xf32>, vector<2x16x64xf32> -> vector<2x16x128xf32>
    %116 = vector.shape_cast %115 : vector<2x16x128xf32> to vector<32x128xf32>
    %c0_40 = arith.constant 0 : index
    %c0_41 = arith.constant 0 : index
    %c0_42 = arith.constant 0 : index
    %117 = vector.load %arg9[%c0_40, %c0_41, %c0_42] : memref<2x128x128xf32, #tpu.memory_space<vmem>>, vector<1x128x128xf32>
    %118 = vector.shape_cast %117 : vector<1x128x128xf32> to vector<128x128xf32>
    %cst_43 = arith.constant dense<0.000000e+00> : vector<32x128xf32>
    %119 = tpu.matmul %116, %118, %cst_43 {dimension_numbers = #tpu.dot_dimension_numbers<[1], [0], [0], [1], [0, 0, 1, 1], [], []>} : vector<32x128xf32>, vector<128x128xf32>, vector<32x128xf32> -> vector<32x128xf32>
    %c0_44 = arith.constant 0 : index
    %c0_45 = arith.constant 0 : index
    %c0_46 = arith.constant 0 : index
    %120 = vector.load %arg10[%c0_44, %c0_45, %c0_46] : memref<2x1x128xf32, #tpu.memory_space<vmem>>, vector<1x1x128xf32>
    %121 = vector.shape_cast %120 : vector<1x1x128xf32> to vector<1x128xf32>
    %122 = vector.broadcast %121 : vector<1x128xf32> to vector<32x128xf32>
    %123 = arith.addf %119, %122 : vector<32x128xf32>
    %124 = arith.addf %123, %60 : vector<32x128xf32>
    %c0_47 = arith.constant 0 : index
    %c0_48 = arith.constant 0 : index
    %c0_49 = arith.constant 0 : index
    %125 = vector.load %arg11[%c0_47, %c0_48, %c0_49] : memref<2x1x128xf32, #tpu.memory_space<vmem>>, vector<1x1x128xf32>
    %126 = vector.shape_cast %125 : vector<1x1x128xf32> to vector<1x128xf32>
    %c0_50 = arith.constant 0 : index
    %c0_51 = arith.constant 0 : index
    %c0_52 = arith.constant 0 : index
    %127 = vector.load %arg12[%c0_50, %c0_51, %c0_52] : memref<2x1x128xf32, #tpu.memory_space<vmem>>, vector<1x1x128xf32>
    %128 = vector.shape_cast %127 : vector<1x1x128xf32> to vector<1x128xf32>
    %cst_53 = arith.constant dense<0.000000e+00> : vector<32xf32>
    %129 = vector.multi_reduction <add>, %124, %cst_53 [1] : vector<32x128xf32> to vector<32xf32>
    %130 = vector.shape_cast %129 : vector<32xf32> to vector<32x1xf32>
    %cst_54 = arith.constant 1.280000e+02 : f32
    %131 = vector.broadcast %cst_54 : f32 to vector<32x1xf32>
    %132 = arith.divf %130, %131 : vector<32x1xf32>
    %133 = vector.broadcast %132 : vector<32x1xf32> to vector<32x128xf32>
    %134 = arith.subf %124, %133 : vector<32x128xf32>
    %135 = arith.mulf %134, %134 : vector<32x128xf32>
    %cst_55 = arith.constant dense<0.000000e+00> : vector<32xf32>
    %136 = vector.multi_reduction <add>, %135, %cst_55 [1] : vector<32x128xf32> to vector<32xf32>
    %137 = vector.shape_cast %136 : vector<32xf32> to vector<32x1xf32>
    %cst_56 = arith.constant 1.280000e+02 : f32
    %138 = vector.broadcast %cst_56 : f32 to vector<32x1xf32>
    %139 = arith.divf %137, %138 : vector<32x1xf32>
    %140 = vector.broadcast %132 : vector<32x1xf32> to vector<32x128xf32>
    %141 = arith.subf %124, %140 : vector<32x128xf32>
    %cst_57 = arith.constant 9.99999996E-13 : f32
    %142 = vector.broadcast %cst_57 : f32 to vector<32x1xf32>
    %143 = arith.addf %139, %142 : vector<32x1xf32>
    %144 = math.rsqrt %143 : vector<32x1xf32>
    %145 = vector.broadcast %144 : vector<32x1xf32> to vector<32x128xf32>
    %146 = arith.mulf %141, %145 : vector<32x128xf32>
    %147 = vector.broadcast %126 : vector<1x128xf32> to vector<32x128xf32>
    %148 = arith.mulf %146, %147 : vector<32x128xf32>
    %149 = vector.broadcast %128 : vector<1x128xf32> to vector<32x128xf32>
    %150 = arith.addf %148, %149 : vector<32x128xf32>
    %c0_58 = arith.constant 0 : index
    %c0_59 = arith.constant 0 : index
    %c0_60 = arith.constant 0 : index
    %151 = vector.load %arg13[%c0_58, %c0_59, %c0_60] : memref<2x128x256xf32, #tpu.memory_space<vmem>>, vector<1x128x256xf32>
    %152 = vector.shape_cast %151 : vector<1x128x256xf32> to vector<128x256xf32>
    %cst_61 = arith.constant dense<0.000000e+00> : vector<32x256xf32>
    %153 = tpu.matmul %150, %152, %cst_61 {dimension_numbers = #tpu.dot_dimension_numbers<[1], [0], [0], [1], [0, 0, 1, 1], [], []>} : vector<32x128xf32>, vector<128x256xf32>, vector<32x256xf32> -> vector<32x256xf32>
    %c0_62 = arith.constant 0 : index
    %c0_63 = arith.constant 0 : index
    %c0_64 = arith.constant 0 : index
    %154 = vector.load %arg14[%c0_62, %c0_63, %c0_64] : memref<2x1x256xf32, #tpu.memory_space<vmem>>, vector<1x1x256xf32>
    %155 = vector.shape_cast %154 : vector<1x1x256xf32> to vector<1x256xf32>
    %156 = vector.broadcast %155 : vector<1x256xf32> to vector<32x256xf32>
    %157 = arith.addf %153, %156 : vector<32x256xf32>
    %158 = arith.mulf %157, %157 : vector<32x256xf32>
    %159 = arith.mulf %157, %158 : vector<32x256xf32>
    %cst_65 = arith.constant 4.471500e-02 : f32
    %160 = vector.broadcast %cst_65 : f32 to vector<32x256xf32>
    %161 = arith.mulf %160, %159 : vector<32x256xf32>
    %162 = arith.addf %157, %161 : vector<32x256xf32>
    %cst_66 = arith.constant 0.797884583 : f32
    %163 = vector.broadcast %cst_66 : f32 to vector<32x256xf32>
    %164 = arith.mulf %163, %162 : vector<32x256xf32>
    %165 = math.tanh %164 : vector<32x256xf32>
    %cst_67 = arith.constant 1.000000e+00 : f32
    %166 = vector.broadcast %cst_67 : f32 to vector<32x256xf32>
    %167 = arith.addf %166, %165 : vector<32x256xf32>
    %cst_68 = arith.constant 5.000000e-01 : f32
    %168 = vector.broadcast %cst_68 : f32 to vector<32x256xf32>
    %169 = arith.mulf %168, %167 : vector<32x256xf32>
    %170 = arith.mulf %157, %169 : vector<32x256xf32>
    %c0_69 = arith.constant 0 : index
    %c0_70 = arith.constant 0 : index
    %c0_71 = arith.constant 0 : index
    %171 = vector.load %arg15[%c0_69, %c0_70, %c0_71] : memref<2x256x128xf32, #tpu.memory_space<vmem>>, vector<1x256x128xf32>
    %172 = vector.shape_cast %171 : vector<1x256x128xf32> to vector<256x128xf32>
    %cst_72 = arith.constant dense<0.000000e+00> : vector<32x128xf32>
    %173 = tpu.matmul %170, %172, %cst_72 {dimension_numbers = #tpu.dot_dimension_numbers<[1], [0], [0], [1], [0, 0, 1, 1], [], []>} : vector<32x256xf32>, vector<256x128xf32>, vector<32x128xf32> -> vector<32x128xf32>
    %c0_73 = arith.constant 0 : index
    %c0_74 = arith.constant 0 : index
    %c0_75 = arith.constant 0 : index
    %174 = vector.load %arg16[%c0_73, %c0_74, %c0_75] : memref<2x1x128xf32, #tpu.memory_space<vmem>>, vector<1x1x128xf32>
    %175 = vector.shape_cast %174 : vector<1x1x128xf32> to vector<1x128xf32>
    %176 = vector.broadcast %175 : vector<1x128xf32> to vector<32x128xf32>
    %177 = arith.addf %173, %176 : vector<32x128xf32>
    %178 = arith.addf %177, %150 : vector<32x128xf32>
    %c0_76 = arith.constant 0 : index
    %c0_77 = arith.constant 0 : index
    %c0_78 = arith.constant 0 : index
    %179 = vector.load %arg17[%c0_76, %c0_77, %c0_78] : memref<2x1x128xf32, #tpu.memory_space<vmem>>, vector<1x1x128xf32>
    %180 = vector.shape_cast %179 : vector<1x1x128xf32> to vector<1x128xf32>
    %c0_79 = arith.constant 0 : index
    %c0_80 = arith.constant 0 : index
    %c0_81 = arith.constant 0 : index
    %181 = vector.load %arg18[%c0_79, %c0_80, %c0_81] : memref<2x1x128xf32, #tpu.memory_space<vmem>>, vector<1x1x128xf32>
    %182 = vector.shape_cast %181 : vector<1x1x128xf32> to vector<1x128xf32>
    %cst_82 = arith.constant dense<0.000000e+00> : vector<32xf32>
    %183 = vector.multi_reduction <add>, %178, %cst_82 [1] : vector<32x128xf32> to vector<32xf32>
    %184 = vector.shape_cast %183 : vector<32xf32> to vector<32x1xf32>
    %cst_83 = arith.constant 1.280000e+02 : f32
    %185 = vector.broadcast %cst_83 : f32 to vector<32x1xf32>
    %186 = arith.divf %184, %185 : vector<32x1xf32>
    %187 = vector.broadcast %186 : vector<32x1xf32> to vector<32x128xf32>
    %188 = arith.subf %178, %187 : vector<32x128xf32>
    %189 = arith.mulf %188, %188 : vector<32x128xf32>
    %cst_84 = arith.constant dense<0.000000e+00> : vector<32xf32>
    %190 = vector.multi_reduction <add>, %189, %cst_84 [1] : vector<32x128xf32> to vector<32xf32>
    %191 = vector.shape_cast %190 : vector<32xf32> to vector<32x1xf32>
    %cst_85 = arith.constant 1.280000e+02 : f32
    %192 = vector.broadcast %cst_85 : f32 to vector<32x1xf32>
    %193 = arith.divf %191, %192 : vector<32x1xf32>
    %194 = vector.broadcast %186 : vector<32x1xf32> to vector<32x128xf32>
    %195 = arith.subf %178, %194 : vector<32x128xf32>
    %cst_86 = arith.constant 9.99999996E-13 : f32
    %196 = vector.broadcast %cst_86 : f32 to vector<32x1xf32>
    %197 = arith.addf %193, %196 : vector<32x1xf32>
    %198 = math.rsqrt %197 : vector<32x1xf32>
    %199 = vector.broadcast %198 : vector<32x1xf32> to vector<32x128xf32>
    %200 = arith.mulf %195, %199 : vector<32x128xf32>
    %201 = vector.broadcast %180 : vector<1x128xf32> to vector<32x128xf32>
    %202 = arith.mulf %200, %201 : vector<32x128xf32>
    %203 = vector.broadcast %182 : vector<1x128xf32> to vector<32x128xf32>
    %204 = arith.addf %202, %203 : vector<32x128xf32>
    %c1 = arith.constant 1 : index
    %c0_87 = arith.constant 0 : index
    %c0_88 = arith.constant 0 : index
    %205 = vector.load %arg7[%c1, %c0_87, %c0_88] : memref<2x128x384xf32, #tpu.memory_space<vmem>>, vector<1x128x384xf32>
    %206 = vector.shape_cast %205 : vector<1x128x384xf32> to vector<128x384xf32>
    %cst_89 = arith.constant dense<0.000000e+00> : vector<32x384xf32>
    %207 = tpu.matmul %204, %206, %cst_89 {dimension_numbers = #tpu.dot_dimension_numbers<[1], [0], [0], [1], [0, 0, 1, 1], [], []>} : vector<32x128xf32>, vector<128x384xf32>, vector<32x384xf32> -> vector<32x384xf32>
    %c1_90 = arith.constant 1 : index
    %c0_91 = arith.constant 0 : index
    %c0_92 = arith.constant 0 : index
    %208 = vector.load %arg8[%c1_90, %c0_91, %c0_92] : memref<2x1x384xf32, #tpu.memory_space<vmem>>, vector<1x1x384xf32>
    %209 = vector.shape_cast %208 : vector<1x1x384xf32> to vector<1x384xf32>
    %210 = vector.broadcast %209 : vector<1x384xf32> to vector<32x384xf32>
    %211 = arith.addf %207, %210 : vector<32x384xf32>
    %212 = vector.extract_strided_slice %211 {offsets = [0, 0], sizes = [32, 128], strides = [1, 1]} : vector<32x384xf32> to vector<32x128xf32>
    %213 = vector.shape_cast %212 : vector<32x128xf32> to vector<2x16x128xf32>
    %214 = vector.extract_strided_slice %211 {offsets = [0, 128], sizes = [32, 128], strides = [1, 1]} : vector<32x384xf32> to vector<32x128xf32>
    %215 = vector.shape_cast %214 : vector<32x128xf32> to vector<2x16x128xf32>
    %216 = vector.extract_strided_slice %211 {offsets = [0, 256], sizes = [32, 128], strides = [1, 1]} : vector<32x384xf32> to vector<32x128xf32>
    %217 = vector.shape_cast %216 : vector<32x128xf32> to vector<2x16x128xf32>
    %218 = vector.extract_strided_slice %213 {offsets = [0, 0, 0], sizes = [2, 16, 64], strides = [1, 1, 1]} : vector<2x16x128xf32> to vector<2x16x64xf32>
    %219 = vector.extract_strided_slice %215 {offsets = [0, 0, 0], sizes = [2, 16, 64], strides = [1, 1, 1]} : vector<2x16x128xf32> to vector<2x16x64xf32>
    %220 = vector.extract_strided_slice %217 {offsets = [0, 0, 0], sizes = [2, 16, 64], strides = [1, 1, 1]} : vector<2x16x128xf32> to vector<2x16x64xf32>
    "tpu.trace_start"() <{level = 10 : i32, message = "bqd,bkd->bqk"}> : () -> ()
    %cst_93 = arith.constant dense<0.000000e+00> : vector<2x16x16xf32>
    %221 = tpu.matmul %218, %219, %cst_93 {dimension_numbers = #tpu.dot_dimension_numbers<[2], [2], [1], [1], [0, 0, 0, 1, 1, 1], [0], [0]>} : vector<2x16x64xf32>, vector<2x16x64xf32>, vector<2x16x16xf32> -> vector<2x16x16xf32>
    "tpu.trace_stop"() : () -> ()
    %cst_94 = arith.constant 1.250000e-01 : f32
    %222 = vector.broadcast %cst_94 : f32 to vector<2x16x16xf32>
    %223 = arith.mulf %221, %222 : vector<2x16x16xf32>
    %224 = vector.broadcast %65 : vector<2x1x16xf32> to vector<2x16x16xf32>
    %225 = arith.addf %223, %224 : vector<2x16x16xf32>
    %cst_95 = arith.constant dense<0xFF800000> : vector<2x16xf32>
    %226 = vector.multi_reduction <maximumf>, %225, %cst_95 [2] : vector<2x16x16xf32> to vector<2x16xf32>
    %227 = vector.shape_cast %226 : vector<2x16xf32> to vector<2x16x1xf32>
    %228 = vector.broadcast %227 : vector<2x16x1xf32> to vector<2x16x16xf32>
    %229 = arith.subf %225, %228 : vector<2x16x16xf32>
    %230 = math.exp %229 : vector<2x16x16xf32>
    %cst_96 = arith.constant dense<0.000000e+00> : vector<2x16xf32>
    %231 = vector.multi_reduction <add>, %230, %cst_96 [2] : vector<2x16x16xf32> to vector<2x16xf32>
    %232 = vector.shape_cast %231 : vector<2x16xf32> to vector<2x16x1xf32>
    %233 = vector.broadcast %232 : vector<2x16x1xf32> to vector<2x16x16xf32>
    %234 = arith.divf %230, %233 : vector<2x16x16xf32>
    "tpu.trace_start"() <{level = 10 : i32, message = "bqk,bkd->bqd"}> : () -> ()
    %cst_97 = arith.constant dense<0.000000e+00> : vector<2x16x64xf32>
    %235 = tpu.matmul %234, %220, %cst_97 {dimension_numbers = #tpu.dot_dimension_numbers<[2], [1], [1], [2], [0, 0, 0, 1, 1, 2], [0], [0]>} : vector<2x16x16xf32>, vector<2x16x64xf32>, vector<2x16x64xf32> -> vector<2x16x64xf32>
    "tpu.trace_stop"() : () -> ()
    %236 = vector.extract_strided_slice %213 {offsets = [0, 0, 64], sizes = [2, 16, 64], strides = [1, 1, 1]} : vector<2x16x128xf32> to vector<2x16x64xf32>
    %237 = vector.extract_strided_slice %215 {offsets = [0, 0, 64], sizes = [2, 16, 64], strides = [1, 1, 1]} : vector<2x16x128xf32> to vector<2x16x64xf32>
    %238 = vector.extract_strided_slice %217 {offsets = [0, 0, 64], sizes = [2, 16, 64], strides = [1, 1, 1]} : vector<2x16x128xf32> to vector<2x16x64xf32>
    "tpu.trace_start"() <{level = 10 : i32, message = "bqd,bkd->bqk"}> : () -> ()
    %cst_98 = arith.constant dense<0.000000e+00> : vector<2x16x16xf32>
    %239 = tpu.matmul %236, %237, %cst_98 {dimension_numbers = #tpu.dot_dimension_numbers<[2], [2], [1], [1], [0, 0, 0, 1, 1, 1], [0], [0]>} : vector<2x16x64xf32>, vector<2x16x64xf32>, vector<2x16x16xf32> -> vector<2x16x16xf32>
    "tpu.trace_stop"() : () -> ()
    %cst_99 = arith.constant 1.250000e-01 : f32
    %240 = vector.broadcast %cst_99 : f32 to vector<2x16x16xf32>
    %241 = arith.mulf %239, %240 : vector<2x16x16xf32>
    %242 = vector.broadcast %65 : vector<2x1x16xf32> to vector<2x16x16xf32>
    %243 = arith.addf %241, %242 : vector<2x16x16xf32>
    %cst_100 = arith.constant dense<0xFF800000> : vector<2x16xf32>
    %244 = vector.multi_reduction <maximumf>, %243, %cst_100 [2] : vector<2x16x16xf32> to vector<2x16xf32>
    %245 = vector.shape_cast %244 : vector<2x16xf32> to vector<2x16x1xf32>
    %246 = vector.broadcast %245 : vector<2x16x1xf32> to vector<2x16x16xf32>
    %247 = arith.subf %243, %246 : vector<2x16x16xf32>
    %248 = math.exp %247 : vector<2x16x16xf32>
    %cst_101 = arith.constant dense<0.000000e+00> : vector<2x16xf32>
    %249 = vector.multi_reduction <add>, %248, %cst_101 [2] : vector<2x16x16xf32> to vector<2x16xf32>
    %250 = vector.shape_cast %249 : vector<2x16xf32> to vector<2x16x1xf32>
    %251 = vector.broadcast %250 : vector<2x16x1xf32> to vector<2x16x16xf32>
    %252 = arith.divf %248, %251 : vector<2x16x16xf32>
    "tpu.trace_start"() <{level = 10 : i32, message = "bqk,bkd->bqd"}> : () -> ()
    %cst_102 = arith.constant dense<0.000000e+00> : vector<2x16x64xf32>
    %253 = tpu.matmul %252, %238, %cst_102 {dimension_numbers = #tpu.dot_dimension_numbers<[2], [1], [1], [2], [0, 0, 0, 1, 1, 2], [0], [0]>} : vector<2x16x16xf32>, vector<2x16x64xf32>, vector<2x16x64xf32> -> vector<2x16x64xf32>
    "tpu.trace_stop"() : () -> ()
    %254 = tpu.concatenate %235, %253 in 2 : vector<2x16x64xf32>, vector<2x16x64xf32> -> vector<2x16x128xf32>
    %255 = vector.shape_cast %254 : vector<2x16x128xf32> to vector<32x128xf32>
    %c1_103 = arith.constant 1 : index
    %c0_104 = arith.constant 0 : index
    %c0_105 = arith.constant 0 : index
    %256 = vector.load %arg9[%c1_103, %c0_104, %c0_105] : memref<2x128x128xf32, #tpu.memory_space<vmem>>, vector<1x128x128xf32>
    %257 = vector.shape_cast %256 : vector<1x128x128xf32> to vector<128x128xf32>
    %cst_106 = arith.constant dense<0.000000e+00> : vector<32x128xf32>
    %258 = tpu.matmul %255, %257, %cst_106 {dimension_numbers = #tpu.dot_dimension_numbers<[1], [0], [0], [1], [0, 0, 1, 1], [], []>} : vector<32x128xf32>, vector<128x128xf32>, vector<32x128xf32> -> vector<32x128xf32>
    %c1_107 = arith.constant 1 : index
    %c0_108 = arith.constant 0 : index
    %c0_109 = arith.constant 0 : index
    %259 = vector.load %arg10[%c1_107, %c0_108, %c0_109] : memref<2x1x128xf32, #tpu.memory_space<vmem>>, vector<1x1x128xf32>
    %260 = vector.shape_cast %259 : vector<1x1x128xf32> to vector<1x128xf32>
    %261 = vector.broadcast %260 : vector<1x128xf32> to vector<32x128xf32>
    %262 = arith.addf %258, %261 : vector<32x128xf32>
    %263 = arith.addf %262, %204 : vector<32x128xf32>
    %c1_110 = arith.constant 1 : index
    %c0_111 = arith.constant 0 : index
    %c0_112 = arith.constant 0 : index
    %264 = vector.load %arg11[%c1_110, %c0_111, %c0_112] : memref<2x1x128xf32, #tpu.memory_space<vmem>>, vector<1x1x128xf32>
    %265 = vector.shape_cast %264 : vector<1x1x128xf32> to vector<1x128xf32>
    %c1_113 = arith.constant 1 : index
    %c0_114 = arith.constant 0 : index
    %c0_115 = arith.constant 0 : index
    %266 = vector.load %arg12[%c1_113, %c0_114, %c0_115] : memref<2x1x128xf32, #tpu.memory_space<vmem>>, vector<1x1x128xf32>
    %267 = vector.shape_cast %266 : vector<1x1x128xf32> to vector<1x128xf32>
    %cst_116 = arith.constant dense<0.000000e+00> : vector<32xf32>
    %268 = vector.multi_reduction <add>, %263, %cst_116 [1] : vector<32x128xf32> to vector<32xf32>
    %269 = vector.shape_cast %268 : vector<32xf32> to vector<32x1xf32>
    %cst_117 = arith.constant 1.280000e+02 : f32
    %270 = vector.broadcast %cst_117 : f32 to vector<32x1xf32>
    %271 = arith.divf %269, %270 : vector<32x1xf32>
    %272 = vector.broadcast %271 : vector<32x1xf32> to vector<32x128xf32>
    %273 = arith.subf %263, %272 : vector<32x128xf32>
    %274 = arith.mulf %273, %273 : vector<32x128xf32>
    %cst_118 = arith.constant dense<0.000000e+00> : vector<32xf32>
    %275 = vector.multi_reduction <add>, %274, %cst_118 [1] : vector<32x128xf32> to vector<32xf32>
    %276 = vector.shape_cast %275 : vector<32xf32> to vector<32x1xf32>
    %cst_119 = arith.constant 1.280000e+02 : f32
    %277 = vector.broadcast %cst_119 : f32 to vector<32x1xf32>
    %278 = arith.divf %276, %277 : vector<32x1xf32>
    %279 = vector.broadcast %271 : vector<32x1xf32> to vector<32x128xf32>
    %280 = arith.subf %263, %279 : vector<32x128xf32>
    %cst_120 = arith.constant 9.99999996E-13 : f32
    %281 = vector.broadcast %cst_120 : f32 to vector<32x1xf32>
    %282 = arith.addf %278, %281 : vector<32x1xf32>
    %283 = math.rsqrt %282 : vector<32x1xf32>
    %284 = vector.broadcast %283 : vector<32x1xf32> to vector<32x128xf32>
    %285 = arith.mulf %280, %284 : vector<32x128xf32>
    %286 = vector.broadcast %265 : vector<1x128xf32> to vector<32x128xf32>
    %287 = arith.mulf %285, %286 : vector<32x128xf32>
    %288 = vector.broadcast %267 : vector<1x128xf32> to vector<32x128xf32>
    %289 = arith.addf %287, %288 : vector<32x128xf32>
    %c1_121 = arith.constant 1 : index
    %c0_122 = arith.constant 0 : index
    %c0_123 = arith.constant 0 : index
    %290 = vector.load %arg13[%c1_121, %c0_122, %c0_123] : memref<2x128x256xf32, #tpu.memory_space<vmem>>, vector<1x128x256xf32>
    %291 = vector.shape_cast %290 : vector<1x128x256xf32> to vector<128x256xf32>
    %cst_124 = arith.constant dense<0.000000e+00> : vector<32x256xf32>
    %292 = tpu.matmul %289, %291, %cst_124 {dimension_numbers = #tpu.dot_dimension_numbers<[1], [0], [0], [1], [0, 0, 1, 1], [], []>} : vector<32x128xf32>, vector<128x256xf32>, vector<32x256xf32> -> vector<32x256xf32>
    %c1_125 = arith.constant 1 : index
    %c0_126 = arith.constant 0 : index
    %c0_127 = arith.constant 0 : index
    %293 = vector.load %arg14[%c1_125, %c0_126, %c0_127] : memref<2x1x256xf32, #tpu.memory_space<vmem>>, vector<1x1x256xf32>
    %294 = vector.shape_cast %293 : vector<1x1x256xf32> to vector<1x256xf32>
    %295 = vector.broadcast %294 : vector<1x256xf32> to vector<32x256xf32>
    %296 = arith.addf %292, %295 : vector<32x256xf32>
    %297 = arith.mulf %296, %296 : vector<32x256xf32>
    %298 = arith.mulf %296, %297 : vector<32x256xf32>
    %cst_128 = arith.constant 4.471500e-02 : f32
    %299 = vector.broadcast %cst_128 : f32 to vector<32x256xf32>
    %300 = arith.mulf %299, %298 : vector<32x256xf32>
    %301 = arith.addf %296, %300 : vector<32x256xf32>
    %cst_129 = arith.constant 0.797884583 : f32
    %302 = vector.broadcast %cst_129 : f32 to vector<32x256xf32>
    %303 = arith.mulf %302, %301 : vector<32x256xf32>
    %304 = math.tanh %303 : vector<32x256xf32>
    %cst_130 = arith.constant 1.000000e+00 : f32
    %305 = vector.broadcast %cst_130 : f32 to vector<32x256xf32>
    %306 = arith.addf %305, %304 : vector<32x256xf32>
    %cst_131 = arith.constant 5.000000e-01 : f32
    %307 = vector.broadcast %cst_131 : f32 to vector<32x256xf32>
    %308 = arith.mulf %307, %306 : vector<32x256xf32>
    %309 = arith.mulf %296, %308 : vector<32x256xf32>
    %c1_132 = arith.constant 1 : index
    %c0_133 = arith.constant 0 : index
    %c0_134 = arith.constant 0 : index
    %310 = vector.load %arg15[%c1_132, %c0_133, %c0_134] : memref<2x256x128xf32, #tpu.memory_space<vmem>>, vector<1x256x128xf32>
    %311 = vector.shape_cast %310 : vector<1x256x128xf32> to vector<256x128xf32>
    %cst_135 = arith.constant dense<0.000000e+00> : vector<32x128xf32>
    %312 = tpu.matmul %309, %311, %cst_135 {dimension_numbers = #tpu.dot_dimension_numbers<[1], [0], [0], [1], [0, 0, 1, 1], [], []>} : vector<32x256xf32>, vector<256x128xf32>, vector<32x128xf32> -> vector<32x128xf32>
    %c1_136 = arith.constant 1 : index
    %c0_137 = arith.constant 0 : index
    %c0_138 = arith.constant 0 : index
    %313 = vector.load %arg16[%c1_136, %c0_137, %c0_138] : memref<2x1x128xf32, #tpu.memory_space<vmem>>, vector<1x1x128xf32>
    %314 = vector.shape_cast %313 : vector<1x1x128xf32> to vector<1x128xf32>
    %315 = vector.broadcast %314 : vector<1x128xf32> to vector<32x128xf32>
    %316 = arith.addf %312, %315 : vector<32x128xf32>
    %317 = arith.addf %316, %289 : vector<32x128xf32>
    %c1_139 = arith.constant 1 : index
    %c0_140 = arith.constant 0 : index
    %c0_141 = arith.constant 0 : index
    %318 = vector.load %arg17[%c1_139, %c0_140, %c0_141] : memref<2x1x128xf32, #tpu.memory_space<vmem>>, vector<1x1x128xf32>
    %319 = vector.shape_cast %318 : vector<1x1x128xf32> to vector<1x128xf32>
    %c1_142 = arith.constant 1 : index
    %c0_143 = arith.constant 0 : index
    %c0_144 = arith.constant 0 : index
    %320 = vector.load %arg18[%c1_142, %c0_143, %c0_144] : memref<2x1x128xf32, #tpu.memory_space<vmem>>, vector<1x1x128xf32>
    %321 = vector.shape_cast %320 : vector<1x1x128xf32> to vector<1x128xf32>
    %cst_145 = arith.constant dense<0.000000e+00> : vector<32xf32>
    %322 = vector.multi_reduction <add>, %317, %cst_145 [1] : vector<32x128xf32> to vector<32xf32>
    %323 = vector.shape_cast %322 : vector<32xf32> to vector<32x1xf32>
    %cst_146 = arith.constant 1.280000e+02 : f32
    %324 = vector.broadcast %cst_146 : f32 to vector<32x1xf32>
    %325 = arith.divf %323, %324 : vector<32x1xf32>
    %326 = vector.broadcast %325 : vector<32x1xf32> to vector<32x128xf32>
    %327 = arith.subf %317, %326 : vector<32x128xf32>
    %328 = arith.mulf %327, %327 : vector<32x128xf32>
    %cst_147 = arith.constant dense<0.000000e+00> : vector<32xf32>
    %329 = vector.multi_reduction <add>, %328, %cst_147 [1] : vector<32x128xf32> to vector<32xf32>
    %330 = vector.shape_cast %329 : vector<32xf32> to vector<32x1xf32>
    %cst_148 = arith.constant 1.280000e+02 : f32
    %331 = vector.broadcast %cst_148 : f32 to vector<32x1xf32>
    %332 = arith.divf %330, %331 : vector<32x1xf32>
    %333 = vector.broadcast %325 : vector<32x1xf32> to vector<32x128xf32>
    %334 = arith.subf %317, %333 : vector<32x128xf32>
    %cst_149 = arith.constant 9.99999996E-13 : f32
    %335 = vector.broadcast %cst_149 : f32 to vector<32x1xf32>
    %336 = arith.addf %332, %335 : vector<32x1xf32>
    %337 = math.rsqrt %336 : vector<32x1xf32>
    %338 = vector.broadcast %337 : vector<32x1xf32> to vector<32x128xf32>
    %339 = arith.mulf %334, %338 : vector<32x128xf32>
    %340 = vector.broadcast %319 : vector<1x128xf32> to vector<32x128xf32>
    %341 = arith.mulf %339, %340 : vector<32x128xf32>
    %342 = vector.broadcast %321 : vector<1x128xf32> to vector<32x128xf32>
    %343 = arith.addf %341, %342 : vector<32x128xf32>
    %344 = vector.shape_cast %343 : vector<32x128xf32> to vector<2x16x128xf32>
    %345 = vector.extract_strided_slice %344 {offsets = [0, 0, 0], sizes = [2, 1, 128], strides = [1, 1, 1]} : vector<2x16x128xf32> to vector<2x1x128xf32>
    %346 = vector.shape_cast %345 : vector<2x1x128xf32> to vector<2x128xf32>
    %c0_150 = arith.constant 0 : index
    %c0_151 = arith.constant 0 : index
    %347 = vector.load %arg19[%c0_150, %c0_151] : memref<128x128xf32, #tpu.memory_space<vmem>>, vector<128x128xf32>
    %cst_152 = arith.constant dense<0.000000e+00> : vector<2x128xf32>
    %348 = tpu.matmul %346, %347, %cst_152 {dimension_numbers = #tpu.dot_dimension_numbers<[1], [0], [0], [1], [0, 0, 1, 1], [], []>} : vector<2x128xf32>, vector<128x128xf32>, vector<2x128xf32> -> vector<2x128xf32>
    %c0_153 = arith.constant 0 : index
    %c0_154 = arith.constant 0 : index
    %349 = vector.load %arg20[%c0_153, %c0_154] : memref<1x128xf32, #tpu.memory_space<vmem>>, vector<1x128xf32>
    %350 = vector.broadcast %349 : vector<1x128xf32> to vector<2x128xf32>
    %351 = arith.addf %348, %350 : vector<2x128xf32>
    %352 = math.tanh %351 : vector<2x128xf32>
    %c0_155 = arith.constant 0 : index
    %c0_156 = arith.constant 0 : index
    %353 = vector.load %arg21[%c0_155, %c0_156] : memref<128x128xf32, #tpu.memory_space<vmem>>, vector<128x128xf32>
    %cst_157 = arith.constant dense<0.000000e+00> : vector<2x128xf32>
    %354 = tpu.matmul %352, %353, %cst_157 {dimension_numbers = #tpu.dot_dimension_numbers<[1], [0], [0], [1], [0, 0, 1, 1], [], []>} : vector<2x128xf32>, vector<128x128xf32>, vector<2x128xf32> -> vector<2x128xf32>
    %c0_158 = arith.constant 0 : index
    %c0_159 = arith.constant 0 : index
    %355 = vector.load %arg22[%c0_158, %c0_159] : memref<1x128xf32, #tpu.memory_space<vmem>>, vector<1x128xf32>
    %356 = vector.broadcast %355 : vector<1x128xf32> to vector<2x128xf32>
    %357 = arith.addf %354, %356 : vector<2x128xf32>
    %c0_160 = arith.constant 0 : index
    %c0_161 = arith.constant 0 : index
    %358 = vector.load %arg23[%c0_160, %c0_161] : memref<2x128xf32, #tpu.memory_space<vmem>>, vector<2x128xf32>
    tpu.vector_store %arg23[%c0_160, %c0_161], %357 {strides = array<i32>} : memref<2x128xf32, #tpu.memory_space<vmem>>, vector<2x128xf32>,
    return
  }
  func.func @transform_0(%arg0: i32) -> (i32, i32) {
    %c0_i32 = arith.constant 0 : i32
    %c0_i32_0 = arith.constant 0 : i32
    %c0_i32_1 = arith.constant 0 : i32
    return %c0_i32, %c0_i32_0 : i32, i32
  }
  func.func @transform_1(%arg0: i32) -> (i32, i32) {
    %c0_i32 = arith.constant 0 : i32
    %c0_i32_0 = arith.constant 0 : i32
    %c0_i32_1 = arith.constant 0 : i32
    return %c0_i32, %c0_i32_0 : i32, i32
  }
  func.func @transform_2(%arg0: i32) -> (i32, i32) {
    %c0_i32 = arith.constant 0 : i32
    %c0_i32_0 = arith.constant 0 : i32
    %c0_i32_1 = arith.constant 0 : i32
    return %c0_i32, %c0_i32_0 : i32, i32
  }
  func.func @transform_3(%arg0: i32) -> (i32, i32, i32) {
    %c0_i32 = arith.constant 0 : i32
    %c0_i32_0 = arith.constant 0 : i32
    %c0_i32_1 = arith.constant 0 : i32
    %c0_i32_2 = arith.constant 0 : i32
    return %c0_i32, %c0_i32_0, %c0_i32_1 : i32, i32, i32
  }
  func.func @transform_4(%arg0: i32) -> (i32, i32) {
    %c0_i32 = arith.constant 0 : i32
    %c0_i32_0 = arith.constant 0 : i32
    %c0_i32_1 = arith.constant 0 : i32
    return %c0_i32, %c0_i32_0 : i32, i32
  }
  func.func @transform_5(%arg0: i32) -> (i32, i32) {
    %c0_i32 = arith.constant 0 : i32
    %c0_i32_0 = arith.constant 0 : i32
    %c0_i32_1 = arith.constant 0 : i32
    return %c0_i32, %c0_i32_0 : i32, i32
  }
  func.func @transform_6(%arg0: i32) -> (i32, i32, i32) {
    %c0_i32 = arith.constant 0 : i32
    %c0_i32_0 = arith.constant 0 : i32
    %c0_i32_1 = arith.constant 0 : i32
    %c0_i32_2 = arith.constant 0 : i32
    return %c0_i32, %c0_i32_0, %c0_i32_1 : i32, i32, i32
  }
  func.func @transform_7(%arg0: i32) -> (i32, i32, i32) {
    %c0_i32 = arith.constant 0 : i32
    %c0_i32_0 = arith.constant 0 : i32
    %c0_i32_1 = arith.constant 0 : i32
    %c0_i32_2 = arith.constant 0 : i32
    return %c0_i32, %c0_i32_0, %c0_i32_1 : i32, i32, i32
  }
  func.func @transform_8(%arg0: i32) -> (i32, i32, i32) {
    %c0_i32 = arith.constant 0 : i32
    %c0_i32_0 = arith.constant 0 : i32
    %c0_i32_1 = arith.constant 0 : i32
    %c0_i32_2 = arith.constant 0 : i32
    return %c0_i32, %c0_i32_0, %c0_i32_1 : i32, i32, i32
  }
  func.func @transform_9(%arg0: i32) -> (i32, i32, i32) {
    %c0_i32 = arith.constant 0 : i32
    %c0_i32_0 = arith.constant 0 : i32
    %c0_i32_1 = arith.constant 0 : i32
    %c0_i32_2 = arith.constant 0 : i32
    return %c0_i32, %c0_i32_0, %c0_i32_1 : i32, i32, i32
  }
  func.func @transform_10(%arg0: i32) -> (i32, i32, i32) {
    %c0_i32 = arith.constant 0 : i32
    %c0_i32_0 = arith.constant 0 : i32
    %c0_i32_1 = arith.constant 0 : i32
    %c0_i32_2 = arith.constant 0 : i32
    return %c0_i32, %c0_i32_0, %c0_i32_1 : i32, i32, i32
  }
  func.func @transform_11(%arg0: i32) -> (i32, i32, i32) {
    %c0_i32 = arith.constant 0 : i32
    %c0_i32_0 = arith.constant 0 : i32
    %c0_i32_1 = arith.constant 0 : i32
    %c0_i32_2 = arith.constant 0 : i32
    return %c0_i32, %c0_i32_0, %c0_i32_1 : i32, i32, i32
  }
  func.func @transform_12(%arg0: i32) -> (i32, i32, i32) {
    %c0_i32 = arith.constant 0 : i32
    %c0_i32_0 = arith.constant 0 : i32
    %c0_i32_1 = arith.constant 0 : i32
    %c0_i32_2 = arith.constant 0 : i32
    return %c0_i32, %c0_i32_0, %c0_i32_1 : i32, i32, i32
  }
  func.func @transform_13(%arg0: i32) -> (i32, i32, i32) {
    %c0_i32 = arith.constant 0 : i32
    %c0_i32_0 = arith.constant 0 : i32
    %c0_i32_1 = arith.constant 0 : i32
    %c0_i32_2 = arith.constant 0 : i32
    return %c0_i32, %c0_i32_0, %c0_i32_1 : i32, i32, i32
  }
  func.func @transform_14(%arg0: i32) -> (i32, i32, i32) {
    %c0_i32 = arith.constant 0 : i32
    %c0_i32_0 = arith.constant 0 : i32
    %c0_i32_1 = arith.constant 0 : i32
    %c0_i32_2 = arith.constant 0 : i32
    return %c0_i32, %c0_i32_0, %c0_i32_1 : i32, i32, i32
  }
  func.func @transform_15(%arg0: i32) -> (i32, i32, i32) {
    %c0_i32 = arith.constant 0 : i32
    %c0_i32_0 = arith.constant 0 : i32
    %c0_i32_1 = arith.constant 0 : i32
    %c0_i32_2 = arith.constant 0 : i32
    return %c0_i32, %c0_i32_0, %c0_i32_1 : i32, i32, i32
  }
  func.func @transform_16(%arg0: i32) -> (i32, i32, i32) {
    %c0_i32 = arith.constant 0 : i32
    %c0_i32_0 = arith.constant 0 : i32
    %c0_i32_1 = arith.constant 0 : i32
    %c0_i32_2 = arith.constant 0 : i32
    return %c0_i32, %c0_i32_0, %c0_i32_1 : i32, i32, i32
  }
  func.func @transform_17(%arg0: i32) -> (i32, i32, i32) {
    %c0_i32 = arith.constant 0 : i32
    %c0_i32_0 = arith.constant 0 : i32
    %c0_i32_1 = arith.constant 0 : i32
    %c0_i32_2 = arith.constant 0 : i32
    return %c0_i32, %c0_i32_0, %c0_i32_1 : i32, i32, i32
  }
  func.func @transform_18(%arg0: i32) -> (i32, i32) {
    %c0_i32 = arith.constant 0 : i32
    %c0_i32_0 = arith.constant 0 : i32
    %c0_i32_1 = arith.constant 0 : i32
    return %c0_i32, %c0_i32_0 : i32, i32
  }
  func.func @transform_19(%arg0: i32) -> (i32, i32) {
    %c0_i32 = arith.constant 0 : i32
    %c0_i32_0 = arith.constant 0 : i32
    %c0_i32_1 = arith.constant 0 : i32
    return %c0_i32, %c0_i32_0 : i32, i32
  }
  func.func @transform_20(%arg0: i32) -> (i32, i32) {
    %c0_i32 = arith.constant 0 : i32
    %c0_i32_0 = arith.constant 0 : i32
    %c0_i32_1 = arith.constant 0 : i32
    return %c0_i32, %c0_i32_0 : i32, i32
  }
  func.func @transform_21(%arg0: i32) -> (i32, i32) {
    %c0_i32 = arith.constant 0 : i32
    %c0_i32_0 = arith.constant 0 : i32
    %c0_i32_1 = arith.constant 0 : i32
    return %c0_i32, %c0_i32_0 : i32, i32
  }
  func.func @transform_22(%arg0: i32) -> (i32, i32) {
    %c0_i32 = arith.constant 0 : i32
    %c0_i32_0 = arith.constant 0 : i32
    %c0_i32_1 = arith.constant 0 : i32
    return %c0_i32, %c0_i32_0 : i32, i32
  }
}

</mosaic_0001>

<bundles_post_ra>
// kernel: forward.1
= control target key start
LH: loop header
LB: loop body
LE: loop exit
PB: predicated region body
PF: predicated region fallthrough
CT: control target
= control target key end

     0   :  { %s6898_s0 = inlined_call_operand.hbm [shape: f32[16,128], index: 0, kind: input, shape index: {}]   ;;  %s6899_s1 = inlined_call_operand.hbm [shape: f32[8,128], index: 1, kind: input, shape index: {}]   ;;  %s6900_s2 = inlined_call_operand.hbm [shape: f32[16,128], index: 2, kind: input, shape index: {}]   ;;  %s6901_s3 = inlined_call_operand.hbm [shape: f32[2,1,16], index: 3, kind: input, shape index: {}]   ;;  %s6902_s4 = inlined_call_operand.hbm [shape: f32[1,128], index: 4, kind: input, shape index: {}]   ;;  %s6903_s5 = inlined_call_operand.hbm [shape: f32[1,128], index: 5, kind: input, shape index: {}]   ;;  %s6904_s6 = inlined_call_operand.hbm [shape: f32[2,128,384], index: 6, kind: input, shape index: {}]   ;;  %s6905_s7 = inlined_call_operand.hbm [shape: f32[2,1,384], index: 7, kind: input, shape index: {}]   ;;  %s6906_s8 = inlined_call_operand.hbm [shape: f32[2,128,128], index: 8, kind: input, shape index: {}]   ;;  %s6907_s9 = inlined_call_operand.hbm [shape: f32[2,1,128], index: 9, kind: input, shape index: {}]   ;;  %s6908_s10 = inlined_call_operand.hbm [shape: f32[2,1,128], index: 10, kind: input, shape index: {}]   ;;  %s6909_s11 = inlined_call_operand.hbm [shape: f32[2,1,128], index: 11, kind: input, shape index: {}]   ;;  %s6910_s12 = inlined_call_operand.hbm [shape: f32[2,128,256], index: 12, kind: input, shape index: {}]   ;;  %s6911_s13 = inlined_call_operand.hbm [shape: f32[2,1,256], index: 13, kind: input, shape index: {}]   ;;  %s6912_s14 = inlined_call_operand.hbm [shape: f32[2,256,128], index: 14, kind: input, shape index: {}]   ;;  %s6913_s15 = inlined_call_operand.hbm [shape: f32[2,1,128], index: 15, kind: input, shape index: {}]   ;;  %s6914_s16 = inlined_call_operand.hbm [shape: f32[2,1,128], index: 16, kind: input, shape index: {}]   ;;  %s6915_s17 = inlined_call_operand.hbm [shape: f32[2,1,128], index: 17, kind: input, shape index: {}]   ;;  %s6916_s18 = inlined_call_operand.hbm [shape: f32[128,128], index: 18, kind: input, shape index: {}]   ;;  %s6917_s19 = inlined_call_operand.hbm [shape: f32[1,128], index: 19, kind: input, shape index: {}]   ;;  %s6918_s20 = inlined_call_operand.hbm [shape: f32[128,128], index: 20, kind: input, shape index: {}]   ;;  %s6919_s21 = inlined_call_operand.hbm [shape: f32[1,128], index: 21, kind: input, shape index: {}]   ;;  %s6920_s22 = inlined_call_operand.hbm [shape: f32[2,128], index: 22, kind: output, shape index: {}]  }
   0x1   :  { %6931 = sst [smem:[#allocation51_spill]] %s6898_s0 }
   0x2   :  { %6932 = sst [smem:[#allocation52_spill]] %s6899_s1 }
   0x3   :  { %6933 = sst [smem:[#allocation53_spill]] %s6900_s2 }
   0x4   :  { %6934 = sst [smem:[#allocation54_spill]] %s6901_s3 }
   0x5   :  { %6935 = sst [smem:[#allocation55_spill]] %s6902_s4 }
   0x6   :  { %6936 = sst [smem:[#allocation56_spill]] %s6903_s5 }
   0x7   :  { %6937 = sst [smem:[#allocation57_spill]] %s6904_s6 }
   0x8   :  { %6938 = sst [smem:[#allocation58_spill]] %s6918_s20 }
   0x9   :  { %6939 = sst [smem:[#allocation59_spill]] %s6919_s21 }
   0xa   :  { %6940 = sst [smem:[#allocation60_spill]] %s6920_s22 }
   0xb   :  { %27 = vsyncpa [#allocation3], 0 }
   0xc   :  { %28 = vsyncpa [#allocation6], 0 }
   0xd   :  { %29 = vsyncpa [#allocation9], 0 }
   0xe   :  { %30 = vsyncpa [#allocation12], 0 }
   0xf   :  { %31 = vsyncpa [#allocation15], 0 }
  0x10   :  { %32 = vsyncpa [#allocation18], 0 }
  0x11   :  { %33 = vsyncpa [#allocation21], 0 }
  0x12   :  { %34 = vsyncpa [#allocation24], 0 }
  0x13   :  { %35 = vsyncpa [#allocation27], 0 }
  0x14   :  { %36 = vsyncpa [#allocation30], 0 }
  0x15   :  { %37 = vsyncpa [#allocation33], 0 }
  0x16   :  { %38 = vsyncpa [#allocation36], 0 }
  0x17   :  { %39 = vsyncpa [#allocation4], 0  ;;  %s5820_s3 = smov [#allocation5]   ;;  %s5821_s29 = smov [#allocation8]  }
  0x18   :  { %s58_s28 = sshll.u32 %s5820_s3, 4  ;;  %s79_s30 = sshll.u32 %s5821_s29, 4  ;;  %s59_s28 = int_to_ptr.vmem [resolvable:$true] %s58_s28  ;;  %s5973_s30 = int_to_ptr.vmem [resolvable:$true] %s79_s30 }
  0x19   :  { %s6941_s23 = sld [smem:[#allocation52_spill]] }
  0x1f   :  { %s5288_s1 = scalar_lea.hbm %s6941_s23, 128 }
  0x20   :  { %p5289_p0 = scmp.ne.s32.totalorder %s6941_s23, %s5288_s1  ;;  %p5292_p1 = scmp.lt.u32.totalorder %s5288_s1, %s6941_s23 }
  0x22   :  { %p5294_p2 = pnand %p5292_p1, %p5289_p0 }
  0x24   :  { %5297 = shalt.err (!%p5294_p2)
}
  0x25   :  { %s5298_s26 = scalar_lea.vmem %s59_s28, 128  ;;  %p5303_p4 = scmp.lt.s32.totalorder %s59_s28, %s59_s28 }
  0x26   :  { %p5299_p3 = scmp.ne.s32.totalorder %s59_s28, %s5298_s26  ;;  %p5304_p5 = scmp.lt.s32.totalorder %s5298_s26, %s5298_s26 }
  0x28   :  { %p5305_p6 = por %p5304_p5, %p5303_p4 }
  0x2a   :  { %p5306_p7 = pnand %p5305_p6, %p5299_p3 }
  0x2c   :  { %5309 = shalt.err (!%p5306_p7)
}
  0x2d   :  { %61 = dma.hbm_to_vmem [thread:$0]  %s6941_s23, 128, %s59_s28, [#allocation6]  }
  0x2e   :  { %s6942_s4 = sld [smem:[#allocation54_spill]] }
  0x34   :  { %s5310_s0 = scalar_lea.hbm %s6942_s4, 32 }
  0x35   :  { %p5311_p8 = scmp.ne.s32.totalorder %s6942_s4, %s5310_s0  ;;  %p5314_p9 = scmp.lt.u32.totalorder %s5310_s0, %s6942_s4 }
  0x37   :  { %p5316_p10 = pnand %p5314_p9, %p5311_p8 }
  0x39   :  { %5319 = shalt.err (!%p5316_p10)
}
  0x3a   :  { %s5320_s25 = scalar_lea.vmem %s5973_s30, 32  ;;  %p5325_p12 = scmp.lt.s32.totalorder %s5973_s30, %s5973_s30 }
  0x3b   :  { %p5321_p11 = scmp.ne.s32.totalorder %s5973_s30, %s5320_s25  ;;  %p5326_p13 = scmp.lt.s32.totalorder %s5320_s25, %s5320_s25 }
  0x3d   :  { %p5327_p0 = por %p5326_p13, %p5325_p12 }
  0x3f   :  { %p5328_p1 = pnand %p5327_p0, %p5321_p11 }
  0x41   :  { %5331 = shalt.err (!%p5328_p1)
}
  0x42   :  { %s5822_s28 = smov 16   ;;  %s5823_s23 = smov 1  }
  0x43   :  { %85 = dma.hbm_to_vmem [thread:$0]  %s6942_s4, 32, %s5973_s30, [#allocation9], %s5822_s28, %s5822_s28, %s5823_s23  }
  0x44   :  { %s5824_s27 = smov [#allocation11]   ;;  %s5825_s29 = smov [#allocation14]  }
  0x45   :  { %s102_s3 = sshll.u32 %s5824_s27, 4  ;;  %s123_s0 = sshll.u32 %s5825_s29, 4  ;;  %s103_s3 = int_to_ptr.vmem [resolvable:$true] %s102_s3  ;;  %s6007_s0 = int_to_ptr.vmem [resolvable:$true] %s123_s0 }
  0x46   :  { %s6943_s1 = sld [smem:[#allocation56_spill]] }
  0x4c   :  { %s5332_s6 = scalar_lea.hbm %s6943_s1, 16 }
  0x4d   :  { %p5333_p2 = scmp.ne.s32.totalorder %s6943_s1, %s5332_s6  ;;  %p5336_p3 = scmp.lt.u32.totalorder %s5332_s6, %s6943_s1 }
  0x4f   :  { %p5338_p4 = pnand %p5336_p3, %p5333_p2 }
  0x51   :  { %5341 = shalt.err (!%p5338_p4)
}
  0x52   :  { %s5342_s30 = scalar_lea.vmem %s103_s3, 16  ;;  %s5346_s4 = scalar_lea.vmem %s103_s3, 32 }
  0x53   :  { %p5343_p5 = scmp.ne.s32.totalorder %s103_s3, %s5342_s30  ;;  %p5347_p6 = scmp.lt.s32.totalorder %s103_s3, %s103_s3 }
  0x54   :  { %p5348_p7 = scmp.lt.s32.totalorder %s5346_s4, %s5342_s30 }
  0x56   :  { %p5349_p8 = por %p5348_p7, %p5347_p6 }
  0x58   :  { %p5350_p9 = pnand %p5349_p8, %p5343_p5 }
  0x5a   :  { %5353 = shalt.err (!%p5350_p9)
}
  0x5b   :  { %105 = dma.hbm_to_vmem [thread:$0]  %s6943_s1, 16, %s103_s3, [#allocation12]  }
  0x5c   :  { %s5354_s29 = scalar_lea.hbm %s6905_s7, 96 }
  0x5d   :  { %p5355_p10 = scmp.ne.s32.totalorder %s6905_s7, %s5354_s29  ;;  %p5358_p11 = scmp.lt.u32.totalorder %s5354_s29, %s6905_s7 }
  0x5f   :  { %p5360_p12 = pnand %p5358_p11, %p5355_p10 }
  0x61   :  { %5363 = shalt.err (!%p5360_p12)
}
  0x62   :  { %s5364_s6 = scalar_lea.vmem %s6007_s0, 96  ;;  %p5369_p0 = scmp.lt.s32.totalorder %s6007_s0, %s6007_s0 }
  0x63   :  { %p5365_p13 = scmp.ne.s32.totalorder %s6007_s0, %s5364_s6  ;;  %p5370_p1 = scmp.lt.s32.totalorder %s5364_s6, %s5364_s6 }
  0x65   :  { %p5371_p2 = por %p5370_p1, %p5369_p0 }
  0x67   :  { %p5372_p3 = pnand %p5371_p2, %p5365_p13 }
  0x69   :  { %5375 = shalt.err (!%p5372_p3)
}
  0x6a   :  { %s5826_s3 = smov 48   ;;  %s5827_s1 = smov 3  }
  0x6b   :  { %129 = dma.hbm_to_vmem [thread:$0]  %s6905_s7, 96, %s6007_s0, [#allocation15], %s5826_s3, %s5826_s3, %s5827_s1  }
  0x6c   :  { %s5828_s4 = smov [#allocation17]   ;;  %s5829_s2 = smov [#allocation20]  }
  0x6d   :  { %s147_s26 = sshll.u32 %s5828_s4, 4  ;;  %s171_s22 = sshll.u32 %s5829_s2, 4  ;;  %s148_s26 = int_to_ptr.vmem [resolvable:$true] %s147_s26  ;;  %s6038_s22 = int_to_ptr.vmem [resolvable:$true] %s171_s22 }
  0x6e   :  { %s5376_s20 = scalar_lea.hbm %s6907_s9, 32 }
  0x6f   :  { %p5377_p4 = scmp.ne.s32.totalorder %s6907_s9, %s5376_s20  ;;  %p5380_p5 = scmp.lt.u32.totalorder %s5376_s20, %s6907_s9 }
  0x71   :  { %p5382_p6 = pnand %p5380_p5, %p5377_p4 }
  0x73   :  { %5385 = shalt.err (!%p5382_p6)
}
  0x74   :  { %s5386_s7 = scalar_lea.vmem %s148_s26, 32  ;;  %p5391_p8 = scmp.lt.s32.totalorder %s148_s26, %s148_s26 }
  0x75   :  { %p5387_p7 = scmp.ne.s32.totalorder %s148_s26, %s5386_s7  ;;  %p5392_p9 = scmp.lt.s32.totalorder %s5386_s7, %s5386_s7 }
  0x77   :  { %p5393_p10 = por %p5392_p9, %p5391_p8 }
  0x79   :  { %p5394_p11 = pnand %p5393_p10, %p5387_p7 }
  0x7b   :  { %5397 = shalt.err (!%p5394_p11)
}
  0x7c   :  { %153 = dma.hbm_to_vmem [thread:$0]  %s6907_s9, 32, %s148_s26, [#allocation18], %s5822_s28, %s5822_s28, %s5823_s23  }
  0x7d   :  { %s5398_s30 = scalar_lea.hbm %s6909_s11, 32 }
  0x7e   :  { %p5399_p12 = scmp.ne.s32.totalorder %s6909_s11, %s5398_s30  ;;  %p5402_p13 = scmp.lt.u32.totalorder %s5398_s30, %s6909_s11 }
  0x80   :  { %p5404_p0 = pnand %p5402_p13, %p5399_p12 }
  0x82   :  { %5407 = shalt.err (!%p5404_p0)
}
  0x83   :  { %s5408_s20 = scalar_lea.vmem %s6038_s22, 32  ;;  %p5413_p2 = scmp.lt.s32.totalorder %s6038_s22, %s6038_s22 }
  0x84   :  { %p5409_p1 = scmp.ne.s32.totalorder %s6038_s22, %s5408_s20  ;;  %p5414_p3 = scmp.lt.s32.totalorder %s5408_s20, %s5408_s20 }
  0x86   :  { %p5415_p4 = por %p5414_p3, %p5413_p2 }
  0x88   :  { %p5416_p5 = pnand %p5415_p4, %p5409_p1 }
  0x8a   :  { %5419 = shalt.err (!%p5416_p5)
}
  0x8b   :  { %177 = dma.hbm_to_vmem [thread:$0]  %s6909_s11, 32, %s6038_s22, [#allocation21], %s5822_s28, %s5822_s28, %s5823_s23  }
  0x8c   :  { %s5830_s21 = smov [#allocation23]   ;;  %s5420_s7 = scalar_lea.hbm %s6911_s13, 64 }
  0x8d   :  { %s195_s5 = sshll.u32 %s5830_s21, 4  ;;  %p5421_p6 = scmp.ne.s32.totalorder %s6911_s13, %s5420_s7  ;;  %s196_s5 = int_to_ptr.vmem [resolvable:$true] %s195_s5 }
  0x8e   :  { %p5424_p7 = scmp.lt.u32.totalorder %s5420_s7, %s6911_s13 }
  0x90   :  { %p5426_p8 = pnand %p5424_p7, %p5421_p6 }
  0x92   :  { %5429 = shalt.err (!%p5426_p8)
}
  0x93   :  { %s5430_s30 = scalar_lea.vmem %s196_s5, 64  ;;  %p5435_p10 = scmp.lt.s32.totalorder %s196_s5, %s196_s5 }
  0x94   :  { %p5431_p9 = scmp.ne.s32.totalorder %s196_s5, %s5430_s30  ;;  %p5436_p11 = scmp.lt.s32.totalorder %s5430_s30, %s5430_s30 }
  0x96   :  { %p5437_p12 = por %p5436_p11, %p5435_p10 }
  0x98   :  { %p5438_p13 = pnand %p5437_p12, %p5431_p9 }
  0x9a   :  { %5441 = shalt.err (!%p5438_p13)
}
  0x9b   :  { %s5831_s11 = smov 32   ;;  %s5832_s22 = smov 2  }
  0x9c   :  { %201 = dma.hbm_to_vmem [thread:$0]  %s6911_s13, 64, %s196_s5, [#allocation24], %s5831_s11, %s5831_s11, %s5832_s22  }
  0x9d   :  { %s5833_s27 = smov [#allocation26]   ;;  %s5834_s20 = smov [#allocation29]  }
  0x9e   :  { %s219_s29 = sshll.u32 %s5833_s27, 4  ;;  %s243_s9 = sshll.u32 %s5834_s20, 4  ;;  %s220_s29 = int_to_ptr.vmem [resolvable:$true] %s219_s29  ;;  %s244_s9 = int_to_ptr.vmem [resolvable:$true] %s243_s9 }
  0x9f   :  { %s5442_s24 = scalar_lea.hbm %s6913_s15, 32 }
  0xa0   :  { %p5443_p0 = scmp.ne.s32.totalorder %s6913_s15, %s5442_s24  ;;  %p5446_p1 = scmp.lt.u32.totalorder %s5442_s24, %s6913_s15 }
  0xa2   :  { %p5448_p2 = pnand %p5446_p1, %p5443_p0 }
  0xa4   :  { %5451 = shalt.err (!%p5448_p2)
}
  0xa5   :  { %s5452_s13 = scalar_lea.vmem %s220_s29, 32  ;;  %p5457_p4 = scmp.lt.s32.totalorder %s220_s29, %s220_s29 }
  0xa6   :  { %p5453_p3 = scmp.ne.s32.totalorder %s220_s29, %s5452_s13  ;;  %p5458_p5 = scmp.lt.s32.totalorder %s5452_s13, %s5452_s13 }
  0xa8   :  { %p5459_p6 = por %p5458_p5, %p5457_p4 }
  0xaa   :  { %p5460_p7 = pnand %p5459_p6, %p5453_p3 }
  0xac   :  { %5463 = shalt.err (!%p5460_p7)
}
  0xad   :  { %225 = dma.hbm_to_vmem [thread:$0]  %s6913_s15, 32, %s220_s29, [#allocation27], %s5822_s28, %s5822_s28, %s5823_s23  }
  0xae   :  { %s5464_s11 = scalar_lea.hbm %s6915_s17, 32 }
  0xaf   :  { %p5465_p8 = scmp.ne.s32.totalorder %s6915_s17, %s5464_s11  ;;  %p5468_p9 = scmp.lt.u32.totalorder %s5464_s11, %s6915_s17 }
  0xb1   :  { %p5470_p10 = pnand %p5468_p9, %p5465_p8 }
  0xb3   :  { %5473 = shalt.err (!%p5470_p10)
}
  0xb4   :  { %s5474_s20 = scalar_lea.vmem %s244_s9, 32  ;;  %p5479_p12 = scmp.lt.s32.totalorder %s244_s9, %s244_s9 }
  0xb5   :  { %p5475_p11 = scmp.ne.s32.totalorder %s244_s9, %s5474_s20  ;;  %p5480_p13 = scmp.lt.s32.totalorder %s5474_s20, %s5474_s20 }
  0xb7   :  { %p5481_p0 = por %p5480_p13, %p5479_p12 }
  0xb9   :  { %p5482_p1 = pnand %p5481_p0, %p5475_p11 }
  0xbb   :  { %5485 = shalt.err (!%p5482_p1)
}
  0xbc   :  { %249 = dma.hbm_to_vmem [thread:$0]  %s6915_s17, 32, %s244_s9, [#allocation30], %s5822_s28, %s5822_s28, %s5823_s23  }
  0xbd   :  { %s5835_s26 = smov [#allocation32]   ;;  %s5836_s24 = smov [#allocation2]  }
  0xbe   :  { %s268_s21 = sshll.u32 %s5835_s26, 4  ;;  %s45_s6 = sshll.u32 %s5836_s24, 4  ;;  %s269_s21 = int_to_ptr.vmem [resolvable:$true] %s268_s21  ;;  %s46_s6 = int_to_ptr.vmem [resolvable:$true] %s45_s6 }
  0xbf   :  { %s5486_s3 = scalar_lea.hbm %s6917_s19, 16 }
  0xc0   :  { %p5487_p2 = scmp.ne.s32.totalorder %s6917_s19, %s5486_s3  ;;  %p5490_p3 = scmp.lt.u32.totalorder %s5486_s3, %s6917_s19 }
  0xc2   :  { %p5492_p4 = pnand %p5490_p3, %p5487_p2 }
  0xc4   :  { %5495 = shalt.err (!%p5492_p4)
}
  0xc5   :  { %s5496_s17 = scalar_lea.vmem %s269_s21, 16  ;;  %s5500_s9 = scalar_lea.vmem %s269_s21, 32 }
  0xc6   :  { %p5497_p5 = scmp.ne.s32.totalorder %s269_s21, %s5496_s17  ;;  %p5501_p6 = scmp.lt.s32.totalorder %s269_s21, %s269_s21 }
  0xc7   :  { %p5502_p7 = scmp.lt.s32.totalorder %s5500_s9, %s5496_s17 }
  0xc9   :  { %p5503_p8 = por %p5502_p7, %p5501_p6 }
  0xcb   :  { %p5504_p9 = pnand %p5503_p8, %p5497_p5 }
  0xcd   :  { %5507 = shalt.err (!%p5504_p9)
}
  0xce   :  { %271 = dma.hbm_to_vmem [thread:$0]  %s6917_s19, 16, %s269_s21, [#allocation33]  }
  0xcf   :  { %s6944_s2 = sld [smem:[#allocation51_spill]] }
  0xd5   :  { %s5508_s27 = scalar_lea.hbm %s6944_s2, 256 }
  0xd6   :  { %p5509_p10 = scmp.ne.s32.totalorder %s6944_s2, %s5508_s27  ;;  %p5512_p11 = scmp.lt.u32.totalorder %s5508_s27, %s6944_s2 }
  0xd8   :  { %p5514_p12 = pnand %p5512_p11, %p5509_p10 }
  0xda   :  { %5517 = shalt.err (!%p5514_p12)
}
  0xdb   :  { %s5518_s24 = scalar_lea.vmem %s46_s6, 256  ;;  %p5523_p0 = scmp.lt.s32.totalorder %s46_s6, %s46_s6 }
  0xdc   :  { %p5519_p13 = scmp.ne.s32.totalorder %s46_s6, %s5518_s24  ;;  %p5524_p1 = scmp.lt.s32.totalorder %s5518_s24, %s5518_s24 }
  0xde   :  { %p5525_p2 = por %p5524_p1, %p5523_p0 }
  0xe0   :  { %p5526_p3 = pnand %p5525_p2, %p5519_p13 }
  0xe2   :  { %5529 = shalt.err (!%p5526_p3)
}
  0xe3   :  { %s5837_s19 = smov 128   ;;  %s5838_s21 = smov 8  }
  0xe4   :  { %51 = dma.hbm_to_vmem [thread:$0]  %s6944_s2, 256, %s46_s6, [#allocation3], %s5837_s19, %s5837_s19, %s5838_s21  }
  0xe5   :  { %s5839_s3 = smov [#allocation7]   ;;  %s5840_s5 = smov [#allocation10]  }
  0xe6   :  { %s67_s13 = sshll.u32 %s5839_s3, 4  ;;  %s92_s1 = sshll.u32 %s5840_s5, 4  ;;  %s68_s13 = int_to_ptr.vmem [resolvable:$true] %s67_s13  ;;  %s93_s1 = int_to_ptr.vmem [resolvable:$true] %s92_s1 }
  0xe7   :  { %s6945_s9 = sld [smem:[#allocation53_spill]] }
  0xed   :  { %s5530_s30 = scalar_lea.hbm %s6945_s9, 256 }
  0xee   :  { %p5531_p4 = scmp.ne.s32.totalorder %s6945_s9, %s5530_s30  ;;  %p5534_p5 = scmp.lt.u32.totalorder %s5530_s30, %s6945_s9 }
  0xf0   :  { %p5536_p6 = pnand %p5534_p5, %p5531_p4 }
  0xf2   :  { %5539 = shalt.err (!%p5536_p6)
}
  0xf3   :  { %s5540_s6 = scalar_lea.vmem %s68_s13, 256  ;;  %p5545_p8 = scmp.lt.s32.totalorder %s68_s13, %s68_s13 }
  0xf4   :  { %p5541_p7 = scmp.ne.s32.totalorder %s68_s13, %s5540_s6  ;;  %p5546_p9 = scmp.lt.s32.totalorder %s5540_s6, %s5540_s6 }
  0xf6   :  { %p5547_p10 = por %p5546_p9, %p5545_p8 }
  0xf8   :  { %p5548_p11 = pnand %p5547_p10, %p5541_p7 }
  0xfa   :  { %5551 = shalt.err (!%p5548_p11)
}
  0xfb   :  { %73 = dma.hbm_to_vmem [thread:$0]  %s6945_s9, 256, %s68_s13, [#allocation6], %s5837_s19, %s5837_s19, %s5838_s21  }
  0xfc   :  { %s6946_s26 = sld [smem:[#allocation55_spill]] }
 0x102   :  { %s5552_s24 = scalar_lea.hbm %s6946_s26, 16 }
 0x103   :  { %p5553_p12 = scmp.ne.s32.totalorder %s6946_s26, %s5552_s24  ;;  %p5556_p13 = scmp.lt.u32.totalorder %s5552_s24, %s6946_s26 }
 0x105   :  { %p5558_p0 = pnand %p5556_p13, %p5553_p12 }
 0x107   :  { %5561 = shalt.err (!%p5558_p0)
}
 0x108   :  { %s5562_s25 = scalar_lea.vmem %s93_s1, 16  ;;  %s5566_s17 = scalar_lea.vmem %s93_s1, 32 }
 0x109   :  { %p5563_p1 = scmp.ne.s32.totalorder %s93_s1, %s5562_s25  ;;  %p5567_p2 = scmp.lt.s32.totalorder %s93_s1, %s93_s1 }
 0x10a   :  { %p5568_p3 = scmp.lt.s32.totalorder %s5566_s17, %s5562_s25 }
 0x10c   :  { %p5569_p4 = por %p5568_p3, %p5567_p2 }
 0x10e   :  { %p5570_p5 = pnand %p5569_p4, %p5563_p1 }
 0x110   :  { %5573 = shalt.err (!%p5570_p5)
}
 0x111   :  { %95 = dma.hbm_to_vmem [thread:$0]  %s6946_s26, 16, %s93_s1, [#allocation9]  }
 0x112   :  { %s5841_s30 = smov [#allocation13]   ;;  %s6947_s27 = sld [smem:[#allocation57_spill]] }
 0x113   :  { %s111_s11 = sshll.u32 %s5841_s30, 4  ;;  %s112_s11 = int_to_ptr.vmem [resolvable:$true] %s111_s11 }
 0x118   :  { %s5574_s6 = scalar_lea.hbm %s6947_s27, 12288 }
 0x119   :  { %p5575_p6 = scmp.ne.s32.totalorder %s6947_s27, %s5574_s6  ;;  %p5578_p7 = scmp.lt.u32.totalorder %s5574_s6, %s6947_s27 }
 0x11b   :  { %p5580_p8 = pnand %p5578_p7, %p5575_p6 }
 0x11d   :  { %5583 = shalt.err (!%p5580_p8)
}
 0x11e   :  { %s5584_s24 = scalar_lea.vmem %s112_s11, 12288  ;;  %p5589_p10 = scmp.lt.s32.totalorder %s112_s11, %s112_s11 }
 0x11f   :  { %p5585_p9 = scmp.ne.s32.totalorder %s112_s11, %s5584_s24  ;;  %p5590_p11 = scmp.lt.s32.totalorder %s5584_s24, %s5584_s24 }
 0x121   :  { %p5591_p12 = por %p5590_p11, %p5589_p10 }
 0x123   :  { %p5592_p13 = pnand %p5591_p12, %p5585_p9 }
 0x125   :  { %5595 = shalt.err (!%p5592_p13)
}
 0x126   :  { %s5842_s1 = smov 384   ;;  %s5843_s26 = smov 24  }
 0x127   :  { %117 = dma.hbm_to_vmem [thread:$0]  %s6947_s27, 12288, %s112_s11, [#allocation12], %s5842_s1, %s5842_s1, %s5843_s26  }
 0x128   :  { %s5844_s3 = smov [#allocation16]   ;;  %s5845_s25 = smov [#allocation19]  }
 0x129   :  { %s135_s5 = sshll.u32 %s5844_s3, 4  ;;  %s159_s17 = sshll.u32 %s5845_s25, 4  ;;  %s136_s5 = int_to_ptr.vmem [resolvable:$true] %s135_s5  ;;  %s6183_s17 = int_to_ptr.vmem [resolvable:$true] %s159_s17 }
 0x12a   :  { %s5596_s30 = scalar_lea.hbm %s6906_s8, 4096 }
 0x12b   :  { %p5597_p0 = scmp.ne.s32.totalorder %s6906_s8, %s5596_s30  ;;  %p5600_p1 = scmp.lt.u32.totalorder %s5596_s30, %s6906_s8 }
 0x12d   :  { %p5602_p2 = pnand %p5600_p1, %p5597_p0 }
 0x12f   :  { %5605 = shalt.err (!%p5602_p2)
}
 0x130   :  { %s5606_s11 = scalar_lea.vmem %s136_s5, 4096  ;;  %p5611_p4 = scmp.lt.s32.totalorder %s136_s5, %s136_s5 }
 0x131   :  { %p5607_p3 = scmp.ne.s32.totalorder %s136_s5, %s5606_s11  ;;  %p5612_p5 = scmp.lt.s32.totalorder %s5606_s11, %s5606_s11 }
 0x133   :  { %p5613_p6 = por %p5612_p5, %p5611_p4 }
 0x135   :  { %p5614_p7 = pnand %p5613_p6, %p5607_p3 }
 0x137   :  { %5617 = shalt.err (!%p5614_p7)
}
 0x138   :  { %141 = dma.hbm_to_vmem [thread:$0]  %s6906_s8, 4096, %s136_s5, [#allocation15], %s5837_s19, %s5837_s19, %s5838_s21  }
 0x139   :  { %s5618_s24 = scalar_lea.hbm %s6908_s10, 32 }
 0x13a   :  { %p5619_p8 = scmp.ne.s32.totalorder %s6908_s10, %s5618_s24  ;;  %p5622_p9 = scmp.lt.u32.totalorder %s5618_s24, %s6908_s10 }
 0x13c   :  { %p5624_p10 = pnand %p5622_p9, %p5619_p8 }
 0x13e   :  { %5627 = shalt.err (!%p5624_p10)
}
 0x13f   :  { %s5628_s3 = scalar_lea.vmem %s6183_s17, 32  ;;  %p5633_p12 = scmp.lt.s32.totalorder %s6183_s17, %s6183_s17 }
 0x140   :  { %p5629_p11 = scmp.ne.s32.totalorder %s6183_s17, %s5628_s3  ;;  %p5634_p13 = scmp.lt.s32.totalorder %s5628_s3, %s5628_s3 }
 0x142   :  { %p5635_p0 = por %p5634_p13, %p5633_p12 }
 0x144   :  { %p5636_p1 = pnand %p5635_p0, %p5629_p11 }
 0x146   :  { %5639 = shalt.err (!%p5636_p1)
}
 0x147   :  { %165 = dma.hbm_to_vmem [thread:$0]  %s6908_s10, 32, %s6183_s17, [#allocation18], %s5822_s28, %s5822_s28, %s5823_s23  }
 0x148   :  { %s5846_s25 = smov [#allocation22]   ;;  %s5847_s9 = smov [#allocation25]  }
 0x149   :  { %s183_s13 = sshll.u32 %s5846_s25, 4  ;;  %s207_s30 = sshll.u32 %s5847_s9, 4  ;;  %s184_s13 = int_to_ptr.vmem [resolvable:$true] %s183_s13  ;;  %s208_s30 = int_to_ptr.vmem [resolvable:$true] %s207_s30 }
 0x14a   :  { %s5640_s6 = scalar_lea.hbm %s6910_s12, 8192 }
 0x14b   :  { %p5641_p2 = scmp.ne.s32.totalorder %s6910_s12, %s5640_s6  ;;  %p5644_p3 = scmp.lt.u32.totalorder %s5640_s6, %s6910_s12 }
 0x14d   :  { %p5646_p4 = pnand %p5644_p3, %p5641_p2 }
 0x14f   :  { %5649 = shalt.err (!%p5646_p4)
}
 0x150   :  { %s5650_s10 = scalar_lea.vmem %s184_s13, 8192  ;;  %p5655_p6 = scmp.lt.s32.totalorder %s184_s13, %s184_s13 }
 0x151   :  { %p5651_p5 = scmp.ne.s32.totalorder %s184_s13, %s5650_s10  ;;  %p5656_p7 = scmp.lt.s32.totalorder %s5650_s10, %s5650_s10 }
 0x153   :  { %p5657_p8 = por %p5656_p7, %p5655_p6 }
 0x155   :  { %p5658_p9 = pnand %p5657_p8, %p5651_p5 }
 0x157   :  { %5661 = shalt.err (!%p5658_p9)
}
 0x158   :  { %s5848_s17 = smov 256   ;;  %s5662_s26 = scalar_lea.hbm %s6912_s14, 8192 }
 0x159   :  { %189 = dma.hbm_to_vmem [thread:$0]  %s6910_s12, 8192, %s184_s13, [#allocation21], %s5848_s17, %s5848_s17, %s5822_s28  }
 0x15a   :  { %p5663_p10 = scmp.ne.s32.totalorder %s6912_s14, %s5662_s26  ;;  %p5666_p11 = scmp.lt.u32.totalorder %s5662_s26, %s6912_s14 }
 0x15c   :  { %p5668_p12 = pnand %p5666_p11, %p5663_p10 }
 0x15e   :  { %5671 = shalt.err (!%p5668_p12)
}
 0x15f   :  { %s5672_s5 = scalar_lea.vmem %s208_s30, 8192  ;;  %p5677_p0 = scmp.lt.s32.totalorder %s208_s30, %s208_s30 }
 0x160   :  { %p5673_p13 = scmp.ne.s32.totalorder %s208_s30, %s5672_s5  ;;  %p5678_p1 = scmp.lt.s32.totalorder %s5672_s5, %s5672_s5 }
 0x162   :  { %p5679_p2 = por %p5678_p1, %p5677_p0 }
 0x164   :  { %p5680_p3 = pnand %p5679_p2, %p5673_p13 }
 0x166   :  { %5683 = shalt.err (!%p5680_p3)
}
 0x167   :  { %213 = dma.hbm_to_vmem [thread:$0]  %s6912_s14, 8192, %s208_s30, [#allocation24], %s5837_s19, %s5837_s19, %s5838_s21  }
 0x168   :  { %s5849_s13 = smov [#allocation28]   ;;  %s5850_s22 = smov [#allocation31]  }
 0x169   :  { %s231_s9 = sshll.u32 %s5849_s13, 4  ;;  %s255_s4 = sshll.u32 %s5850_s22, 4  ;;  %s232_s9 = int_to_ptr.vmem [resolvable:$true] %s231_s9  ;;  %s256_s4 = int_to_ptr.vmem [resolvable:$true] %s255_s4 }
 0x16a   :  { %s5684_s11 = scalar_lea.hbm %s6914_s16, 32 }
 0x16b   :  { %p5685_p4 = scmp.ne.s32.totalorder %s6914_s16, %s5684_s11  ;;  %p5688_p5 = scmp.lt.u32.totalorder %s5684_s11, %s6914_s16 }
 0x16d   :  { %p5690_p6 = pnand %p5688_p5, %p5685_p4 }
 0x16f   :  { %5693 = shalt.err (!%p5690_p6)
}
 0x170   :  { %s5694_s14 = scalar_lea.vmem %s232_s9, 32  ;;  %p5699_p8 = scmp.lt.s32.totalorder %s232_s9, %s232_s9 }
 0x171   :  { %p5695_p7 = scmp.ne.s32.totalorder %s232_s9, %s5694_s14  ;;  %p5700_p9 = scmp.lt.s32.totalorder %s5694_s14, %s5694_s14 }
 0x173   :  { %p5701_p10 = por %p5700_p9, %p5699_p8 }
 0x175   :  { %p5702_p11 = pnand %p5701_p10, %p5695_p7 }
 0x177   :  { %5705 = shalt.err (!%p5702_p11)
}
 0x178   :  { %237 = dma.hbm_to_vmem [thread:$0]  %s6914_s16, 32, %s232_s9, [#allocation27], %s5822_s28, %s5822_s28, %s5823_s23  }
 0x179   :  { %s5706_s1 = scalar_lea.hbm %s6916_s18, 2048 }
 0x17a   :  { %p5707_p12 = scmp.ne.s32.totalorder %s6916_s18, %s5706_s1  ;;  %p5710_p13 = scmp.lt.u32.totalorder %s5706_s1, %s6916_s18 }
 0x17c   :  { %p5712_p0 = pnand %p5710_p13, %p5707_p12 }
 0x17e   :  { %5715 = shalt.err (!%p5712_p0)
}
 0x17f   :  { %s5716_s8 = scalar_lea.vmem %s256_s4, 2048  ;;  %p5721_p2 = scmp.lt.s32.totalorder %s256_s4, %s256_s4 }
 0x180   :  { %p5717_p1 = scmp.ne.s32.totalorder %s256_s4, %s5716_s8  ;;  %p5722_p3 = scmp.lt.s32.totalorder %s5716_s8, %s5716_s8 }
 0x182   :  { %p5723_p4 = por %p5722_p3, %p5721_p2 }
 0x184   :  { %p5724_p5 = pnand %p5723_p4, %p5717_p1 }
 0x186   :  { %5727 = shalt.err (!%p5724_p5)
}
 0x187   :  { %261 = dma.hbm_to_vmem [thread:$0]  %s6916_s18, 2048, %s256_s4, [#allocation30], %s5837_s19, %s5837_s19, %s5838_s21  }
 0x188   :  { %s5851_s23 = smov [#allocation34]   ;;  %s5852_s12 = smov [#allocation35]  }
 0x189   :  { %s277_s5 = sshll.u32 %s5851_s23, 4  ;;  %s290_s25 = sshll.u32 %s5852_s12, 4  ;;  %s278_s5 = int_to_ptr.vmem [resolvable:$true] %s277_s5  ;;  %s291_s25 = int_to_ptr.vmem [resolvable:$true] %s290_s25 }
 0x18a   :  { %s6948_s22 = sld [smem:[#allocation58_spill]] }
 0x190   :  { %s5728_s6 = scalar_lea.hbm %s6948_s22, 2048 }
 0x191   :  { %p5729_p6 = scmp.ne.s32.totalorder %s6948_s22, %s5728_s6  ;;  %p5732_p7 = scmp.lt.u32.totalorder %s5728_s6, %s6948_s22 }
 0x193   :  { %p5734_p8 = pnand %p5732_p7, %p5729_p6 }
 0x195   :  { %5737 = shalt.err (!%p5734_p8)
}
 0x196   :  { %s5738_s18 = scalar_lea.vmem %s278_s5, 2048  ;;  %p5743_p10 = scmp.lt.s32.totalorder %s278_s5, %s278_s5 }
 0x197   :  { %p5739_p9 = scmp.ne.s32.totalorder %s278_s5, %s5738_s18  ;;  %p5744_p11 = scmp.lt.s32.totalorder %s5738_s18, %s5738_s18 }
 0x199   :  { %p5745_p12 = por %p5744_p11, %p5743_p10 }
 0x19b   :  { %p5746_p13 = pnand %p5745_p12, %p5739_p9 }
 0x19d   :  { %5749 = shalt.err (!%p5746_p13)
}
 0x19e   :  { %283 = dma.hbm_to_vmem [thread:$0]  %s6948_s22, 2048, %s278_s5, [#allocation33], %s5837_s19, %s5837_s19, %s5838_s21  }
 0x19f   :  { %s6949_s30 = sld [smem:[#allocation59_spill]] }
 0x1a5   :  { %s5750_s15 = scalar_lea.hbm %s6949_s30, 16 }
 0x1a6   :  { %p5751_p0 = scmp.ne.s32.totalorder %s6949_s30, %s5750_s15  ;;  %p5754_p1 = scmp.lt.u32.totalorder %s5750_s15, %s6949_s30 }
 0x1a8   :  { %p5756_p2 = pnand %p5754_p1, %p5751_p0 }
 0x1aa   :  { %5759 = shalt.err (!%p5756_p2)
}
 0x1ab   :  { %s5760_s7 = scalar_lea.vmem %s291_s25, 16  ;;  %s5764_s0 = scalar_lea.vmem %s291_s25, 32 }
 0x1ac   :  { %p5761_p3 = scmp.ne.s32.totalorder %s291_s25, %s5760_s7  ;;  %p5765_p4 = scmp.lt.s32.totalorder %s291_s25, %s291_s25 }
 0x1ad   :  { %p5766_p5 = scmp.lt.s32.totalorder %s5764_s0, %s5760_s7 }
 0x1af   :  { %p5767_p6 = por %p5766_p5, %p5765_p4 }
 0x1b1   :  { %p5768_p7 = pnand %p5767_p6, %p5761_p3 }
 0x1b3   :  { %5771 = shalt.err (!%p5768_p7)
}
 0x1b4   :  { %293 = dma.hbm_to_vmem [thread:$0]  %s6949_s30, 16, %s291_s25, [#allocation36]  }
 0x1b5   :  { %5794 = dma.done.wait [#allocation3], 256  }
 0x1b6   :  { %5795 = vsyncadd [#allocation3], 4294967040 }
 0x1b7   :  { %5796 = dma.done.wait [#allocation6], 384  }
 0x1b8   :  { %5797 = vsyncadd [#allocation6], 4294966912 }
 0x1b9   :  { %5798 = dma.done.wait [#allocation9], 48  }
 0x1ba   :  { %5799 = vsyncadd [#allocation9], 4294967248 }
 0x1bb   :  { %5800 = dma.done.wait [#allocation12], 12304  }
 0x1bc   :  { %5801 = vsyncadd [#allocation12], 4294954992 }
 0x1bd   :  { %5802 = dma.done.wait [#allocation15], 4192  }
 0x1be   :  { %5803 = vsyncadd [#allocation15], 4294963104 }
 0x1bf   :  { %5804 = dma.done.wait [#allocation18], 64  }
 0x1c0   :  { %5805 = vsyncadd [#allocation18], 4294967232 }
 0x1c1   :  { %5806 = dma.done.wait [#allocation21], 8224  }
 0x1c2   :  { %5807 = vsyncadd [#allocation21], 4294959072 }
 0x1c3   :  { %5808 = dma.done.wait [#allocation24], 8256  }
 0x1c4   :  { %5809 = vsyncadd [#allocation24], 4294959040 }
 0x1c5   :  { %5810 = dma.done.wait [#allocation27], 64  }
 0x1c6   :  { %5811 = vsyncadd [#allocation27], 4294967232 }
 0x1c7   :  { %5812 = dma.done.wait [#allocation30], 2080  }
 0x1c8   :  { %5813 = vsyncadd [#allocation30], 4294965216 }
 0x1c9   :  { %5814 = dma.done.wait [#allocation33], 2064  }
 0x1ca   :  { %5815 = vsyncadd [#allocation33], 4294965232 }
 0x1cb   :  { %5816 = dma.done.wait [#allocation36], 16  }
 0x1cc   :  { %5817 = vsyncadd [#allocation36], 4294967280  ;;  %v362_v0 = vld [vmem:[#allocation2] sm:$0xff]  ;;  %v363_v1 = vld [vmem:[#allocation2 + $0x8] sm:$0xff]  ;;  %vm693_vm0 = vcmask 523264   ;;  %vm888_vm2 = vcmask 130048  }
 0x1cd   :  { %364 = vadd.xlane.f32.xlu0 %v362_v0  ;;  %v403_v2 = vld [vmem:[#allocation7] sm:$0xff]  ;;  %v405_v3 = vld [vmem:[#allocation5] sm:$0xff]  ;;  %v457_v17 = vld [vmem:[#allocation13 + $0x18] sm:$0xff]  ;;  %s5854_s3 = smov 64   ;;  %vm5856_vm3 = vmmov 0   ;;  %vm3748_vm4 = vcmask 1041409  }
 0x1ce   :  { %v406_v4 = vadd.f32 %v405_v3, %v403_v2  ;;  %v455_v13 = vld [vmem:[#allocation13 + $0x8] sm:$0xff]  ;;  %v458_v14 = vld [vmem:[#allocation13 + $0x20] sm:$0xff]  ;;  %v461_v18 = vld [vmem:[#allocation13 + $0x38] sm:$0xff]  ;;  %s5857_s8 = smov [#allocation37]  }
 0x1cf   :  { %v454_v15 = vld [vmem:[#allocation13] sm:$0xff]  ;;  %v4606_v16 = vpack.c.bf16 %v458_v14, %v455_v13  ;;  %v464_v19 = vld [vmem:[#allocation13 + $0x50] sm:$0xff]  ;;  %v463_v23 = vld [vmem:[#allocation13 + $0x48] sm:$0xff]  ;;  %s3922_s16 = sshll.u32 %s5857_s8, 4  ;;  %s3923_s16 = int_to_ptr.vmem [resolvable:$true] %s3922_s16 }
 0x1d0   :  { %v4608_v20 = vpack.c.bf16 %v457_v17, %v454_v15  ;;  %v4610_v21 = vpack.c.bf16 %v464_v19, %v461_v18  ;;  %v460_v22 = vld [vmem:[#allocation13 + $0x30] sm:$0xff]  ;;  %v6305_v33 = vld [vmem:[#allocation10] ss:$0 sm:$0xff]  ;;  %v6307_v36 = vld [vmem:[#allocation11] ss:$0 sm:$0xff]  ;;  %s5772_s28 = scalar_lea.vmem %s3923_s16, 32  ;;  %p5777_p9 = scmp.lt.s32.totalorder %s3923_s16, %s3923_s16 }
 0x1d1   :  { %366 = vadd.xlane.f32.xlu0 %v363_v1  ;;  %4607 = vmatprep.subr.bf16.mxu0 %v4606_v16  ;;  %v4612_v24 = vpack.c.bf16 %v463_v23, %v460_v22  ;;  %v404_v39 = vld [vmem:[#allocation7 + $0x8] sm:$0xff]  ;;  %v467_v48 = vld [vmem:[#allocation13 + $0x68] sm:$0xff]  ;;  %v470_v49 = vld [vmem:[#allocation13 + $0x80] sm:$0xff]  ;;  %p5773_p8 = scmp.ne.s32.totalorder %s3923_s16, %s5772_s28  ;;  %p5778_p10 = scmp.lt.s32.totalorder %s5772_s28, %s5772_s28 }
 0x1d2   :  { %4609 = vmatpush1.bf16.msra.mxu0 %v4608_v20  ;;  %v4614_v50 = vpack.c.bf16 %v470_v49, %v467_v48  ;;  %v466_v51 = vld [vmem:[#allocation13 + $0x60] sm:$0xff]  ;;  %v469_v52 = vld [vmem:[#allocation13 + $0x78] sm:$0xff]  ;;  %v476_v55 = vld [vmem:[#allocation13 + $0xb0] sm:$0xff]  ;;  %v5853_v20 = vmov 0.0  }
 0x1d3   :  { %4611 = vmatprep.subr.bf16.mxu0 %v4610_v21  ;;  %v4616_v53 = vpack.c.bf16 %v469_v52, %v466_v51  ;;  %v473_v54 = vld [vmem:[#allocation13 + $0x98] sm:$0xff]  ;;  %v472_v57 = vld [vmem:[#allocation13 + $0x90] sm:$0xff]  ;;  %v475_v58 = vld [vmem:[#allocation13 + $0xa8] sm:$0xff]  ;;  %583 = vmatprep.mubr.f32.mxu0 %v5853_v20  ;;  %p5779_p11 = por %p5778_p10, %p5777_p9 }
 0x1d4   :  { %v4618_v56 = vpack.c.bf16 %v476_v55, %v473_v54  ;;  %v4620_v59 = vpack.c.bf16 %v475_v58, %v472_v57  ;;  %v479_v60 = vld [vmem:[#allocation13 + $0xc8] sm:$0xff]  ;;  %v482_v61 = vld [vmem:[#allocation13 + $0xe0] sm:$0xff]  ;;  %v485_v2 = vld [vmem:[#allocation13 + $0xf8] sm:$0xff] }
 0x1d5   :  { %409 = vadd.xlane.f32.xlu0 %v406_v4  ;;  %v4622_v62 = vpack.c.bf16 %v482_v61, %v479_v60  ;;  %v478_v63 = vld [vmem:[#allocation13 + $0xc0] sm:$0xff]  ;;  %v488_v3 = vld [vmem:[#allocation13 + $0x110] sm:$0xff]  ;;  %v497_v14 = vld [vmem:[#allocation13 + $0x158] sm:$0xff]  ;;  %p5780_p12 = pnand %p5779_p11, %p5773_p8 }
 0x1d6   :  { %4613 = vmatpush1.bf16.msra.mxu0 %v4612_v24  ;;  %v500_v15 = vld [vmem:[#allocation13 + $0x170] sm:$0xff]  ;;  %v499_v18 = vld [vmem:[#allocation13 + $0x168] sm:$0xff]  ;;  %v462_v23 = vld [vmem:[#allocation13 + $0x40] sm:$0xff] }
 0x1d7   :  { %4615 = vmatprep.subr.bf16.mxu0 %v4614_v50  ;;  %v4634_v16 = vpack.c.bf16 %v500_v15, %v497_v14  ;;  %v496_v17 = vld [vmem:[#allocation13 + $0x150] sm:$0xff]  ;;  %v459_v22 = vld [vmem:[#allocation13 + $0x28] sm:$0xff]  ;;  %v477_v48 = vld [vmem:[#allocation13 + $0xb8] sm:$0xff] }
 0x1d8   :  { %v4636_v19 = vpack.c.bf16 %v499_v18, %v496_v17  ;;  %v456_v21 = vld [vmem:[#allocation13 + $0x10] sm:$0xff]  ;;  %v483_v52 = vld [vmem:[#allocation13 + $0xe8] sm:$0xff]  ;;  %v486_v54 = vld [vmem:[#allocation13 + $0x100] sm:$0xff] }
 0x1d9   :  { %v4638_v24 = vpack.c.bf16 %v459_v22, %v456_v21  ;;  %v480_v51 = vld [vmem:[#allocation13 + $0xd0] sm:$0xff]  ;;  %v489_v55 = vld [vmem:[#allocation13 + $0x118] sm:$0xff]  ;;  %v495_v57 = vld [vmem:[#allocation13 + $0x148] sm:$0xff] }
 0x1da   :  { %4617 = vmatpush1.bf16.msra.mxu0 %v4616_v53  ;;  %v501_v60 = vld [vmem:[#allocation13 + $0x178] sm:$0xff]  ;;  %v502_v14 = vld [vmem:[#allocation14] sm:$0x7]  ;;  %vm6377_vm1 = vmpackc.low %vm693_vm0, %vm693_vm0 }
 0x1db   :  { %4619 = vmatprep.subr.bf16.mxu0 %v4618_v56  ;;  %4639 = vmatprep.subr.bf16.mxu1 %v4638_v24  ;;  %v492_v56 = vld [vmem:[#allocation13 + $0x130] sm:$0xff] }
 0x1dc   :  { %4641 = vmatpush3.bf16.msra.mxu1 %v4638_v24  ;;  %v4662_v58 = vpack.c.bf16 %v495_v57, %v492_v56  ;;  %v448_v56 = vld [vmem:[#allocation8] sm:$0x1] }
 0x1dd   :  { %v450_v57 = vsub.f32 1.0, %v448_v56 }
 0x1de   :  { %4621 = vmatpush1.bf16.msra.mxu0 %v4620_v59  ;;  %v498_v59 = vld [vmem:[#allocation13 + $0x160] sm:$0xff] }
 0x1df   :  { %4623 = vmatprep.subr.bf16.mxu0 %v4622_v62  ;;  %v4666_v61 = vpack.c.bf16 %v501_v60, %v498_v59  ;;  %v449_v59 = vld [vmem:[#allocation8 + $0x1] sm:$0x1] }
 0x25a   :  { %v365_v5 = vpop.xlane.xlu0 %364 }
 0x25b   :  { %v369_v6 = vmul.f32 0.0078125, %v365_v5  ;;  %v484_v5 = vld [vmem:[#allocation13 + $0xf0] sm:$0xff] }
 0x25d   :  { %v371_v7 = vsub.f32 %v362_v0, %v369_v6  ;;  %v481_v0 = vld [vmem:[#allocation13 + $0xd8] sm:$0xff]  ;;  %v487_v6 = vld [vmem:[#allocation13 + $0x108] sm:$0xff] }
 0x25e   :  { %v367_v8 = vpop.xlane.xlu0 %366 }
 0x25f   :  { %v370_v9 = vmul.f32 0.0078125, %v367_v8  ;;  %v373_v10 = vmul.f32 %v371_v7, %v371_v7  ;;  %v491_v8 = vld [vmem:[#allocation13 + $0x128] sm:$0xff] }
 0x261   :  { %v372_v11 = vsub.f32 %v363_v1, %v370_v9  ;;  %375 = vadd.xlane.f32.xlu1 %v373_v10  ;;  %v4624_v1 = vpack.c.bf16 %v481_v0, %v478_v63  ;;  %v494_v9 = vld [vmem:[#allocation13 + $0x140] sm:$0xff] }
 0x262   :  { %v410_v31 = vpop.xlane.xlu0 %409  ;;  %v4630_v10 = vpack.c.bf16 %v494_v9, %v491_v8 }
 0x263   :  { %v374_v12 = vmul.f32 %v372_v11, %v372_v11  ;;  %v415_v34 = vmul.f32 0.0078125, %v410_v31  ;;  %4625 = vmatpush1.bf16.msra.mxu0 %v4624_v1 }
 0x265   :  { %377 = vadd.xlane.f32.xlu1 %v374_v12  ;;  %v6310_v40 = vsub.f32 %v406_v4, %v415_v34  ;;  %v4626_v4 = vpack.c.bf16 %v488_v3, %v485_v2  ;;  %v493_v12 = vld [vmem:[#allocation13 + $0x138] sm:$0xff] }
 0x267   :  { %v421_v46 = vmul.f32 %v6310_v40, %v6310_v40  ;;  %4627 = vmatprep.subr.bf16.mxu0 %v4626_v4 }
 0x2ee   :  { %v376_v25 = vpop.xlane.xlu1 %375 }
 0x2ef   :  { %v379_v26 = vmul.f32 0.0078125, %v376_v25  ;;  %v465_v25 = vld [vmem:[#allocation13 + $0x58] sm:$0xff] }
 0x2f1   :  { %v381_v27 = vadd.f32 1e-12, %v379_v26  ;;  %v4642_v26 = vpack.c.bf16 %v465_v25, %v462_v23 }
 0x2f2   :  { %v378_v28 = vpop.xlane.xlu1 %377 }
 0x2f3   :  { %5152 = vrsqrt.f32 %v381_v27  ;;  %v380_v29 = vmul.f32 0.0078125, %v378_v28  ;;  %v468_v27 = vld [vmem:[#allocation13 + $0x70] sm:$0xff]  ;;  %v471_v28 = vld [vmem:[#allocation13 + $0x88] sm:$0xff]  ;;  %4643 = vmatprep.subr.bf16.mxu1 %v4642_v26 }
 0x2f4   :  { %4645 = vmatpush3.bf16.msra.mxu1 %v4642_v26 }
 0x2f5   :  { %v382_v30 = vadd.f32 1e-12, %v380_v29  ;;  %v4646_v29 = vpack.c.bf16 %v471_v28, %v468_v27 }
 0x2f7   :  { %5154 = vrsqrt.f32 %v382_v30  ;;  %4647 = vmatprep.subr.bf16.mxu1 %v4646_v29 }
 0x2f8   :  { %4649 = vmatpush3.bf16.msra.mxu1 %v4646_v29 }
 0x2fd   :  { %v5153_v32 = vpop.eup %5152 }
 0x2fe   :  { %v385_v35 = vmul.f32 %v5153_v32, %v371_v7  ;;  %v4628_v7 = vpack.c.bf16 %v487_v6, %v484_v5 }
 0x300   :  { %v393_v37 = vmul.f32 %v6305_v33, %v385_v35  ;;  %4629 = vmatpush1.bf16.msra.mxu0 %v4628_v7 }
 0x301   :  { %v5155_v38 = vpop.eup %5154  ;;  %4631 = vmatprep.subr.bf16.mxu0 %v4630_v10 }
 0x302   :  { %v401_v41 = vadd.f32 %v6307_v36, %v393_v37  ;;  %v386_v42 = vmul.f32 %v5155_v38, %v372_v11  ;;  %v490_v11 = vld [vmem:[#allocation13 + $0x120] sm:$0xff] }
 0x303   :  { %v4632_v13 = vpack.c.bf16 %v493_v12, %v490_v11  ;;  %v504_v12 = vlaneseq }
 0x304   :  { %v6313_v43 = vadd.f32 %v404_v39, %v401_v41  ;;  %v394_v44 = vmul.f32 %v6305_v33, %v386_v42 }
 0x305   :  { %4633 = vmatpush1.bf16.msra.mxu0 %v4632_v13  ;;  %v6350_v13 = vshrl.u32 %v504_v12, 7 }
 0x306   :  { %411 = vadd.xlane.f32.xlu1 %v6313_v43  ;;  %v402_v45 = vadd.f32 %v6307_v36, %v394_v44  ;;  %4635 = vmatprep.subr.bf16.mxu0 %v4634_v16 }
 0x307   :  { %v514_v18 = vsub.s32 2, %v6350_v13 }
 0x308   :  { %v6320_v47 = vadd.f32 %v404_v39, %v402_v45 }
 0x309   :  { %4637 = vmatpush1.bf16.msra.mxu0 %v4636_v19  ;;  %v6362_v19 = vsub.s32 1, %v6350_v13  ;;  %v515_v21 = vrot.slane %v502_v14, %v514_v18 }
 0x30a   :  { %413 = vadd.xlane.f32.xlu0 %v6320_v47  ;;  %424 = vadd.xlane.f32.xlu1 %v421_v46  ;;  %v474_v46 = vld [vmem:[#allocation13 + $0xa0] sm:$0xff] }
 0x30b   :  { %v4650_v50 = vpack.c.bf16 %v477_v48, %v474_v46  ;;  %v511_v22 = vrot.slane %v502_v14, %v6362_v19 }
 0x30d   :  { %4651 = vmatprep.subr.bf16.mxu1 %v4650_v50 }
 0x30e   :  { %4653 = vmatpush3.bf16.msra.mxu1 %v4650_v50 }
 0x393   :  { %v412_v30 = vpop.xlane.xlu1 %411 }
 0x394   :  { %v416_v31 = vmul.f32 0.0078125, %v412_v30 }
 0x396   :  { %v419_v32 = vsub.f32 %v6313_v43, %v416_v31 }
 0x397   :  { %v414_v34 = vpop.xlane.xlu0 %413  ;;  %v425_v35 = vpop.xlane.xlu1 %424 }
 0x398   :  { %v417_v37 = vmul.f32 0.0078125, %v414_v34  ;;  %v430_v38 = vmul.f32 0.0078125, %v425_v35  ;;  %v422_v39 = vmul.f32 %v419_v32, %v419_v32 }
 0x39a   :  { %v420_v41 = vsub.f32 %v6320_v47, %v417_v37  ;;  %v433_v42 = vadd.f32 1e-12, %v430_v38  ;;  %426 = vadd.xlane.f32.xlu0 %v422_v39  ;;  %v4654_v47 = vpack.c.bf16 %v483_v52, %v480_v51 }
 0x39c   :  { %5156 = vrsqrt.f32 %v433_v42  ;;  %v423_v44 = vmul.f32 %v420_v41, %v420_v41  ;;  %4655 = vmatprep.subr.bf16.mxu1 %v4654_v47 }
 0x39d   :  { %4657 = vmatpush3.bf16.msra.mxu1 %v4654_v47 }
 0x39e   :  { %428 = vadd.xlane.f32.xlu1 %v423_v44 }
 0x3a6   :  { %v5157_v45 = vpop.eup %5156 }
 0x3a7   :  { %v439_v49 = vmul.f32 %v5157_v45, %v6310_v40  ;;  %v4658_v40 = vpack.c.bf16 %v489_v55, %v486_v54 }
 0x3a9   :  { %v442_v43 = vmul.f32 %v6305_v33, %v439_v49  ;;  %4659 = vmatprep.subr.bf16.mxu1 %v4658_v40 }
 0x3aa   :  { %4661 = vmatpush3.bf16.msra.mxu1 %v4658_v40 }
 0x3ab   :  { %v6329_v53 = vadd.f32 %v6307_v36, %v442_v43  ;;  %4663 = vmatprep.subr.bf16.mxu1 %v4662_v58 }
 0x3ad   :  { %584 = vmatmul.mubr.f32.vlgmr.msra.gmra.mrb[0].mxu0 %v6329_v53  ;;  %4304 = vmatprep.mubr.f32.mxu1 %v6329_v53 }
 0x3ae   :  { %589 = vmatprep.mubr.f32.mxu0 %v5853_v20  ;;  %4665 = vmatpush3.bf16.msra.mxu1 %v4662_v58  ;;  %v452_v58 = vmul.f32 -1e+09, %v450_v57 }
 0x3af   :  { %4667 = vmatprep.subr.bf16.mxu1 %v4666_v61 }
 0x3b2   :  { %4669 = vmatpush3.bf16.msra.mxu1 %v4666_v61  ;;  %v451_v61 = vsub.f32 1.0, %v449_v59 }
 0x427   :  { %v427_v62 = vpop.xlane.xlu0 %426 }
 0x428   :  { %v431_v63 = vmul.f32 0.0078125, %v427_v62 }
 0x42a   :  { %v434_v0 = vadd.f32 1e-12, %v431_v63 }
 0x42b   :  { %v429_v1 = vpop.xlane.xlu1 %428 }
 0x42c   :  { %5158 = vrsqrt.f32 %v434_v0  ;;  %v432_v2 = vmul.f32 0.0078125, %v429_v1 }
 0x42e   :  { %v435_v3 = vadd.f32 1e-12, %v432_v2 }
 0x430   :  { %5160 = vrsqrt.f32 %v435_v3  ;;  %v453_v3 = vmul.f32 -1e+09, %v451_v61 }
 0x436   :  { %v5159_v4 = vpop.eup %5158 }
 0x437   :  { %v440_v5 = vmul.f32 %v5159_v4, %v419_v32 }
 0x439   :  { %v443_v6 = vmul.f32 %v6305_v33, %v440_v5 }
 0x43a   :  { %v5161_v7 = vpop.eup %5160 }
 0x43b   :  { %v6336_v8 = vadd.f32 %v6307_v36, %v443_v6  ;;  %v441_v9 = vmul.f32 %v5161_v7, %v420_v41 }
 0x43d   :  { %590 = vmatmul.mubr.f32.gmra.mrb[2].mxu0 %v6336_v8  ;;  %4305 = vmatmul.mubr.f32.vlgmr.msra.gmra.mrb[0].mxu1 %v6336_v8  ;;  %v444_v10 = vmul.f32 %v6305_v33, %v441_v9  ;;  %v6353_v33 = vsub.s32 0, %v6350_v13 }
 0x43e   :  { %4307 = vmatprep.mubr.f32.mxu1 %v6329_v53  ;;  %595 = vmatprep.mubr.f32.mxu0 %v5853_v20 }
 0x43f   :  { %v6344_v11 = vadd.f32 %v6307_v36, %v444_v10  ;;  %v507_v15 = vrot.slane %v502_v14, %v6353_v33  ;;  %v6429_v60 = vrot.slane %v452_v58, %v6353_v33  ;;  %v6436_v7 = vrot.slane %v453_v3, %v6353_v33 }
 0x441   :  { %596 = vmatmul.mubr.f32.gmra.mrb[4].mxu0 %v6329_v53  ;;  %4308 = vmatmul.mubr.f32.gmra.mrb[2].mxu1 %v6344_v11 }
 0x442   :  { %601 = vmatprep.mubr.f32.mxu0 %v5853_v20 }
 0x445   :  { %602 = vmatmul.mubr.f32.gmra.mrb[6].mxu0 %v6344_v11 }
 0x480   :  { %v585_v16 = vpop.f32.mrb[0].mxu0 }
 0x481   :  { %v6356_v36 = vadd.f32 %v585_v16, %v507_v15  ;;  %v587_v17 = vpop.f32.mrb[1].mxu0 }
 0x482   :  { %v6369_v28 = vadd.f32 %v587_v17, %v511_v22 }
 0x483   :  { %4314 = vmatprep.mubr.msk.f32.mxu1 %vm693_vm0, %v6356_v36 }
 0x510   :  { %v591_v23 = vpop.f32.mrb[2].mxu0  ;;  %v4306_v24 = vpop.f32.mrb[0].mxu1 }
 0x511   :  { %v6367_v25 = vadd.f32 %v4306_v24, %v515_v21  ;;  %v593_v26 = vpop.f32.mrb[3].mxu0  ;;  %v674_v27 = vpop.f32.mrb[1].mxu1  ;;  %v6407_v52 = vadd.f32 %v591_v23, %v507_v15 }
 0x512   :  { %v6371_v29 = vadd.f32 %v593_v26, %v511_v22  ;;  %v6373_v30 = vadd.f32 %v674_v27, %v515_v21 }
 0x514   :  { %v5092_v32 = vpack.i.bf16 %v6371_v29, %v6369_v28  ;;  %v4670_v34 = vpack.c.bf16 %v6371_v29, %v6369_v28  ;;  %v5102_v35 = vpack.i.bf16 %v6367_v25, %v6373_v30  ;;  %v4682_v37 = vpack.c.bf16 %v6367_v25, %v6373_v30  ;;  %v597_v38 = vpop.f32.mrb[4].mxu0  ;;  %v4309_v39 = vpop.f32.mrb[2].mxu1 }
 0x515   :  { %v6389_v41 = vadd.f32 %v4309_v39, %v515_v21  ;;  %v599_v42 = vpop.f32.mrb[5].mxu0  ;;  %v684_v44 = vpop.f32.mrb[3].mxu1  ;;  %v6413_v55 = vadd.f32 %v597_v38, %v507_v15 }
 0x516   :  { %v6391_v45 = vadd.f32 %v684_v44, %v515_v21  ;;  %4672 = vmatprep.subr.msk.bf16.mxu1 %vm6377_vm1, %v4670_v34  ;;  %v6403_v43 = vadd.f32 %v599_v42, %v511_v22 }
 0x517   :  { %4675 = vmatpush3.bf16.xpose.msk.msra.mxu1 %vm6377_vm1, %v4670_v34 }
 0x518   :  { %v5107_v46 = vpack.i.bf16 %v6389_v41, %v6391_v45  ;;  %v6401_v48 = vpack.c.bf16 %v6389_v41, %v6391_v45  ;;  %v603_v49 = vpop.f32.mrb[6].mxu0 }
 0x519   :  { %v605_v50 = vpop.f32.mrb[7].mxu0  ;;  %v6423_v40 = vadd.f32 %v603_v49, %v507_v15 }
 0x51a   :  { %v6405_v51 = vadd.f32 %v605_v50, %v511_v22 }
 0x51c   :  { %v5097_v47 = vpack.i.bf16 %v6405_v51, %v6403_v43  ;;  %v4676_v54 = vpack.c.bf16 %v6405_v51, %v6403_v43 }
 0x51e   :  { %4315 = vmatmul.mubr.msk.f32.vlgmr.msra.gmra.mrb[4].mxu1 %vm693_vm0, %v6407_v52  ;;  %4678 = vmatprep.subr.msk.bf16.mxu1 %vm6377_vm1, %v4676_v54 }
 0x51f   :  { %4681 = vmatpush3.bf16.xpose.msk.msra.mxu1 %vm6377_vm1, %v4676_v54  ;;  %4321 = vmatprep.mubr.msk.f32.mxu1 %vm693_vm0, %v6413_v55 }
 0x520   :  { %4683 = vmatprep.subr.bf16.mxu1 %v4682_v37 }
 0x526   :  { %4322 = vmatmul.mubr.msk.f32.vlgmr.msra.gmra.mrb[6].mxu1 %vm693_vm0, %v6423_v40 }
 0x527   :  { %4685 = vmatpush3.bf16.msra.mxu1 %v4682_v37 }
 0x528   :  { %4687 = vmatprep.subr.bf16.mxu1 %v6401_v48 }
 0x5f1   :  { %v4316_v62 = vpop.f32.mrb[4].mxu1 }
 0x5f2   :  { %v869_v63 = vmul.f32 0.125, %v4316_v62  ;;  %v772_v0 = vpop.f32.mrb[5].mxu1 }
 0x5f3   :  { %v868_v1 = vmul.f32 0.125, %v772_v0 }
 0x5f4   :  { %v885_v2 = vadd.f32 %v6429_v60, %v869_v63 }
 0x5f5   :  { %v884_v4 = vadd.f32 %v6429_v60, %v868_v1 }
 0x5f6   :  { %v892_v5 = vsel %vm888_vm2, %v885_v2, -inf }
 0x5f7   :  { %893 = vmax.xlane.f32.xlu1 %v892_v5  ;;  %v889_v6 = vsel %vm888_vm2, %v884_v4, -inf }
 0x5f8   :  { %890 = vmax.xlane.f32.xlu0 %v889_v6 }
 0x5f9   :  { %v4323_v9 = vpop.f32.mrb[6].mxu1 }
 0x5fa   :  { %v871_v10 = vmul.f32 0.125, %v4323_v9  ;;  %v859_v12 = vpop.f32.mrb[7].mxu1 }
 0x5fb   :  { %v870_v14 = vmul.f32 0.125, %v859_v12 }
 0x5fc   :  { %v887_v15 = vadd.f32 %v6436_v7, %v871_v10 }
 0x5fd   :  { %v886_v16 = vadd.f32 %v6436_v7, %v870_v14 }
 0x5fe   :  { %v898_v17 = vsel %vm888_vm2, %v887_v15, -inf }
 0x5ff   :  { %899 = vmax.xlane.f32.xlu1 %v898_v17  ;;  %v895_v21 = vsel %vm888_vm2, %v886_v16, -inf }
 0x600   :  { %896 = vmax.xlane.f32.xlu0 %v895_v21 }
 0x684   :  { %v894_v22 = vpop.xlane.xlu1 %893 }
 0x685   :  { %v902_v23 = vsub.f32 %v885_v2, %v894_v22  ;;  %v891_v24 = vpop.xlane.xlu0 %890 }
 0x686   :  { %v901_v26 = vsub.f32 %v884_v4, %v891_v24 }
 0x687   :  { %v907_v27 = vmul.f32 1.442695, %v902_v23 }
 0x688   :  { %v905_v34 = vmul.f32 1.442695, %v901_v26 }
 0x689   :  { %5162 = vpow2.f32 %v907_v27 }
 0x68a   :  { %5164 = vpow2.f32 %v905_v34 }
 0x68c   :  { %v900_v37 = vpop.xlane.xlu1 %899 }
 0x68d   :  { %v904_v38 = vsub.f32 %v887_v15, %v900_v37  ;;  %v897_v39 = vpop.xlane.xlu0 %896 }
 0x68e   :  { %v903_v42 = vsub.f32 %v886_v16, %v897_v39 }
 0x68f   :  { %v911_v44 = vmul.f32 1.442695, %v904_v38 }
 0x690   :  { %v909_v49 = vmul.f32 1.442695, %v903_v42 }
 0x691   :  { %5166 = vpow2.f32 %v911_v44 }
 0x692   :  { %5168 = vpow2.f32 %v909_v49 }
 0x693   :  { %v5163_v50 = vpop.eup %5162 }
 0x694   :  { %v5165_v54 = vpop.eup %5164  ;;  %v916_v56 = vsel %vm888_vm2, %v5163_v50, 0.0 }
 0x695   :  { %917 = vadd.xlane.f32.xlu1 %v916_v56  ;;  %v913_v57 = vsel %vm888_vm2, %v5165_v54, 0.0 }
 0x696   :  { %914 = vadd.xlane.f32.xlu0 %v913_v57 }
 0x69b   :  { %v5167_v58 = vpop.eup %5166 }
 0x69c   :  { %v5169_v59 = vpop.eup %5168  ;;  %v922_v61 = vsel %vm888_vm2, %v5167_v58, 0.0 }
 0x69d   :  { %923 = vadd.xlane.f32.xlu1 %v922_v61  ;;  %v919_v62 = vsel %vm888_vm2, %v5169_v59, 0.0 }
 0x69e   :  { %920 = vadd.xlane.f32.xlu0 %v919_v62 }
 0x6ae   :  { %1095 = vrot.lane.b32.xlu1 %v6356_v36, %s5854_s3 }
 0x6b2   :  { %5098 = vrot.lane.b32.xlu1 %v5097_v47, %s5854_s3 }
 0x6b4   :  { %5093 = vrot.lane.b32.xlu0 %v5092_v32, %s5854_s3 }
 0x6b6   :  { %1097 = vrot.lane.b32.xlu1 %v6407_v52, %s5854_s3 }
 0x6b8   :  { %1186 = vrot.lane.b32.xlu0 %v6413_v55, %s5854_s3 }
 0x6ba   :  { %1188 = vrot.lane.b32.xlu1 %v6423_v40, %s5854_s3 }
 0x722   :  { %v918_v36 = vpop.xlane.xlu1 %917 }
 0x723   :  { %5170 = vrcp.f32 %v918_v36  ;;  %v915_v63 = vpop.xlane.xlu0 %914 }
 0x724   :  { %5172 = vrcp.f32 %v915_v63 }
 0x72a   :  { %v924_v43 = vpop.xlane.xlu1 %923 }
 0x72b   :  { %5174 = vrcp.f32 %v924_v43  ;;  %v921_v51 = vpop.xlane.xlu0 %920 }
 0x72c   :  { %5176 = vrcp.f32 %v921_v51 }
 0x72d   :  { %v5171_v47 = vpop.eup %5170 }
 0x72e   :  { %v5173_v28 = vpop.eup %5172  ;;  %v1096_v29 = vpop.permute.xlu1 %1095  ;;  %v928_v52 = vmul.f32 %v5171_v47, %v5163_v50 }
 0x72f   :  { %v5094_v32 = vpop.permute.xlu0 %5093  ;;  %v926_v0 = vmul.f32 %v5173_v28, %v5165_v54 }
 0x730   :  { %v5096_v1 = vunpack.i.h.bf16 %v5094_v32  ;;  %v5095_v2 = vunpack.i.l.bf16 %v5094_v32 }
 0x731   :  { %4328 = vmatprep.mubr.msk.f32.mxu1 %vm888_vm2, %v926_v0 }
 0x732   :  { %v4690_v55 = vpack.c.bf16 %v5096_v1, %v5095_v2  ;;  %4329 = vmatmul.mubr.msk.f32.vlgmr.msra.gmra.mrb[8].mxu1 %vm888_vm2, %v928_v52  ;;  %v5099_v40 = vpop.permute.xlu1 %5098 }
 0x733   :  { %4689 = vmatpush3.bf16.msra.mxu1 %v6401_v48  ;;  %v5101_v5 = vunpack.i.h.bf16 %v5099_v40  ;;  %v5100_v6 = vunpack.i.l.bf16 %v5099_v40  ;;  %v1187_v14 = vpop.permute.xlu0 %1186 }
 0x734   :  { %4692 = vmatprep.subr.msk.bf16.mxu1 %vm6377_vm1, %v4690_v55 }
 0x735   :  { %v5175_v3 = vpop.eup %5174  ;;  %v4696_v12 = vpack.c.bf16 %v5101_v5, %v5100_v6 }
 0x736   :  { %v5177_v4 = vpop.eup %5176  ;;  %v932_v10 = vmul.f32 %v5175_v3, %v5167_v58  ;;  %v1098_v48 = vpop.permute.xlu1 %1097 }
 0x737   :  { %v930_v9 = vmul.f32 %v5177_v4, %v5169_v59 }
 0x739   :  { %4335 = vmatprep.mubr.msk.f32.mxu1 %vm888_vm2, %v930_v9 }
 0x73a   :  { %4336 = vmatmul.mubr.msk.f32.vlgmr.msra.gmra.mrb[10].mxu1 %vm888_vm2, %v932_v10  ;;  %v1189_v15 = vpop.permute.xlu1 %1188 }
 0x73b   :  { %4342 = vmatprep.mubr.msk.f32.mxu1 %vm693_vm0, %v1096_v29 }
 0x73c   :  { %4695 = vmatpush3.bf16.xpose.msk.msra.mxu1 %vm6377_vm1, %v4690_v55 }
 0x73d   :  { %4698 = vmatprep.subr.msk.bf16.mxu1 %vm6377_vm1, %v4696_v12 }
 0x743   :  { %4343 = vmatmul.mubr.msk.f32.vlgmr.msra.gmra.mrb[12].mxu1 %vm693_vm0, %v1098_v48 }
 0x744   :  { %4701 = vmatpush3.bf16.xpose.msk.msra.mxu1 %vm6377_vm1, %v4696_v12  ;;  %4349 = vmatprep.mubr.msk.f32.mxu1 %vm693_vm0, %v1187_v14 }
 0x74b   :  { %4350 = vmatmul.mubr.msk.f32.vlgmr.msra.gmra.mrb[14].mxu1 %vm693_vm0, %v1189_v15 }
 0x805   :  { %v6479_v16 = vpop.f32.mrb[8].mxu1 }
 0x806   :  { %v6481_v17 = vpop.f32.mrb[9].mxu1 }
 0x80d   :  { %v6483_v21 = vpop.f32.mrb[10].mxu1 }
 0x80e   :  { %v6485_v22 = vpop.f32.mrb[11].mxu1 }
 0x816   :  { %v4344_v23 = vpop.f32.mrb[12].mxu1 }
 0x817   :  { %v1278_v24 = vmul.f32 0.125, %v4344_v23  ;;  %v1177_v26 = vpop.f32.mrb[13].mxu1 }
 0x818   :  { %v1277_v27 = vmul.f32 0.125, %v1177_v26 }
 0x819   :  { %v1282_v34 = vadd.f32 %v1278_v24, %v6429_v60 }
 0x81a   :  { %v1281_v37 = vadd.f32 %v1277_v27, %v6429_v60 }
 0x81b   :  { %v1288_v38 = vsel %vm888_vm2, %v1282_v34, -inf }
 0x81c   :  { %1289 = vmax.xlane.f32.xlu1 %v1288_v38  ;;  %v1285_v39 = vsel %vm888_vm2, %v1281_v37, -inf }
 0x81d   :  { %1286 = vmax.xlane.f32.xlu0 %v1285_v39  ;;  %v1527_v39 = vld [vmem:[#allocation16] sm:$0xff] }
 0x81e   :  { %v4351_v42 = vpop.f32.mrb[14].mxu1 }
 0x81f   :  { %v1268_v44 = vpop.f32.mrb[15].mxu1  ;;  %v1280_v49 = vmul.f32 0.125, %v4351_v42  ;;  %v1528_v42 = vld [vmem:[#allocation16 + $0x8] sm:$0xff] }
 0x820   :  { %v1279_v50 = vmul.f32 0.125, %v1268_v44  ;;  %v1529_v44 = vld [vmem:[#allocation16 + $0x10] sm:$0xff] }
 0x821   :  { %v1284_v57 = vadd.f32 %v1280_v49, %v6436_v7  ;;  %v4710_v49 = vpack.c.bf16 %v1528_v42, %v1527_v39  ;;  %v1706_v39 = vld [vmem:[#allocation22 + $0x8] sm:$0xff]  ;;  %v1708_v42 = vld [vmem:[#allocation22 + $0x18] sm:$0xff] }
 0x822   :  { %v1283_v54 = vadd.f32 %v1279_v50, %v6436_v7  ;;  %v1530_v50 = vld [vmem:[#allocation16 + $0x18] sm:$0xff] }
 0x823   :  { %v1294_v58 = vsel %vm888_vm2, %v1284_v57, -inf }
 0x824   :  { %v1291_v56 = vsel %vm888_vm2, %v1283_v54, -inf }
 0x825   :  { %1292 = vmax.xlane.f32.xlu0 %v1291_v56  ;;  %v1531_v56 = vld [vmem:[#allocation16 + $0x20] sm:$0xff] }
 0x829   :  { %1295 = vmax.xlane.f32.xlu0 %v1294_v58 }
 0x8a9   :  { %v1290_v59 = vpop.xlane.xlu1 %1289 }
 0x8aa   :  { %v1298_v61 = vsub.f32 %v1282_v34, %v1290_v59  ;;  %v1287_v62 = vpop.xlane.xlu0 %1286  ;;  %v1533_v59 = vld [vmem:[#allocation16 + $0x30] sm:$0xff] }
 0x8ab   :  { %v1297_v36 = vsub.f32 %v1281_v37, %v1287_v62 }
 0x8ac   :  { %v1303_v63 = vmul.f32 1.442695, %v1298_v61  ;;  %v1534_v61 = vld [vmem:[#allocation16 + $0x38] sm:$0xff] }
 0x8ad   :  { %v1301_v43 = vmul.f32 1.442695, %v1297_v36  ;;  %v4722_v62 = vpack.c.bf16 %v1534_v61, %v1533_v59  ;;  %v1535_v36 = vld [vmem:[#allocation16 + $0x40] sm:$0xff]  ;;  %v1711_v59 = vld [vmem:[#allocation22 + $0x30] sm:$0xff]  ;;  %v1714_v61 = vld [vmem:[#allocation22 + $0x48] sm:$0xff] }
 0x8ae   :  { %5178 = vpow2.f32 %v1303_v63  ;;  %v1536_v63 = vld [vmem:[#allocation16 + $0x48] sm:$0xff] }
 0x8af   :  { %5180 = vpow2.f32 %v1301_v43  ;;  %v4726_v43 = vpack.c.bf16 %v1536_v63, %v1535_v36  ;;  %v1715_v63 = vld [vmem:[#allocation22 + $0x50] sm:$0xff] }
 0x8b2   :  { %v1293_v51 = vpop.xlane.xlu0 %1292 }
 0x8b3   :  { %v1299_v47 = vsub.f32 %v1283_v54, %v1293_v51  ;;  %v4714_v54 = vpack.c.bf16 %v1530_v50, %v1529_v44  ;;  %v1537_v51 = vld [vmem:[#allocation16 + $0x50] sm:$0xff]  ;;  %v1705_v44 = vld [vmem:[#allocation22] sm:$0xff] }
 0x8b4   :  { %v1707_v50 = vld [vmem:[#allocation22 + $0x10] sm:$0xff] }
 0x8b5   :  { %v1305_v28 = vmul.f32 1.442695, %v1299_v47  ;;  %v1538_v47 = vld [vmem:[#allocation16 + $0x58] sm:$0xff] }
 0x8b6   :  { %v1296_v29 = vpop.xlane.xlu0 %1295 }
 0x8b7   :  { %5182 = vpow2.f32 %v1305_v28  ;;  %v1300_v32 = vsub.f32 %v1284_v57, %v1296_v29  ;;  %v1532_v57 = vld [vmem:[#allocation16 + $0x28] sm:$0xff]  ;;  %v4730_v28 = vpack.c.bf16 %v1538_v47, %v1537_v51  ;;  %v1539_v29 = vld [vmem:[#allocation16 + $0x60] sm:$0xff] }
 0x8b8   :  { %v5179_v0 = vpop.eup %5178  ;;  %v4718_v58 = vpack.c.bf16 %v1532_v57, %v1531_v56  ;;  %v4744_v56 = vpack.c.bf16 %v1707_v50, %v1705_v44  ;;  %v1734_v44 = vld [vmem:[#allocation22 + $0xe8] sm:$0xff]  ;;  %v1733_v50 = vld [vmem:[#allocation22 + $0xe0] sm:$0xff] }
 0x8b9   :  { %v5181_v52 = vpop.eup %5180  ;;  %v1307_v1 = vmul.f32 1.442695, %v1300_v32  ;;  %v1312_v2 = vsel %vm888_vm2, %v5179_v0, 0.0  ;;  %v1540_v32 = vld [vmem:[#allocation16 + $0x68] sm:$0xff] }
 0x8ba   :  { %1313 = vadd.xlane.f32.xlu1 %v1312_v2  ;;  %v1309_v55 = vsel %vm888_vm2, %v5181_v52, 0.0 }
 0x8bb   :  { %5184 = vpow2.f32 %v1307_v1  ;;  %1310 = vadd.xlane.f32.xlu0 %v1309_v55  ;;  %v1542_v1 = vld [vmem:[#allocation16 + $0x78] sm:$0xff] }
 0x8c1   :  { %v5183_v40 = vpop.eup %5182 }
 0x8c2   :  { %v1315_v3 = vsel %vm888_vm2, %v5183_v40, 0.0 }
 0x8c3   :  { %1316 = vadd.xlane.f32.xlu0 %v1315_v3 }
 0x8c5   :  { %v5185_v4 = vpop.eup %5184 }
 0x8c6   :  { %v1318_v5 = vsel %vm888_vm2, %v5185_v4, 0.0 }
 0x8c7   :  { %1319 = vadd.xlane.f32.xlu1 %v1318_v5 }
 0x8d8   :  { %5108 = vrot.lane.b32.xlu1 %v5107_v46, %s5854_s3 }
 0x8d9   :  { %5103 = vrot.lane.b32.xlu0 %v5102_v35, %s5854_s3 }
 0x947   :  { %v1314_v9 = vpop.xlane.xlu1 %1313 }
 0x948   :  { %v1311_v6 = vpop.xlane.xlu0 %1310 }
 0x949   :  { %5186 = vrcp.f32 %v1311_v6 }
 0x94a   :  { %5188 = vrcp.f32 %v1314_v9 }
 0x950   :  { %v1317_v10 = vpop.xlane.xlu0 %1316 }
 0x951   :  { %5190 = vrcp.f32 %v1317_v10 }
 0x953   :  { %v5187_v12 = vpop.eup %5186 }
 0x954   :  { %v1320_v48 = vpop.xlane.xlu1 %1319  ;;  %v5104_v14 = vpop.permute.xlu0 %5103  ;;  %v1322_v15 = vmul.f32 %v5187_v12, %v5181_v52  ;;  %v1541_v52 = vld [vmem:[#allocation16 + $0x70] sm:$0xff] }
 0x955   :  { %5192 = vrcp.f32 %v1320_v48  ;;  %v5106_v23 = vunpack.i.h.bf16 %v5104_v14  ;;  %v5105_v24 = vunpack.i.l.bf16 %v5104_v14  ;;  %v5189_v45 = vpop.eup %5188  ;;  %v4738_v2 = vpack.c.bf16 %v1542_v1, %v1541_v52 }
 0x956   :  { %4356 = vmatprep.mubr.msk.f32.mxu0 %vm888_vm2, %v1322_v15  ;;  %v1324_v26 = vmul.f32 %v5189_v45, %v5179_v0  ;;  %v4734_v0 = vpack.c.bf16 %v1540_v32, %v1539_v29 }
 0x957   :  { %v4702_v41 = vpack.c.bf16 %v5106_v23, %v5105_v24 }
 0x958   :  { %v5109_v46 = vpop.permute.xlu1 %5108 }
 0x959   :  { %v5111_v25 = vunpack.i.h.bf16 %v5109_v46  ;;  %v5110_v30 = vunpack.i.l.bf16 %v5109_v46  ;;  %4703 = vmatprep.subr.bf16.mxu0 %v4702_v41  ;;  %v3968_v46 = vld [vmem:[#allocation17] ss:$0 sm:$0xff] }
 0x95a   :  { %4705 = vmatpush3.bf16.msra.mxu0 %v4702_v41 }
 0x95b   :  { %v5191_v35 = vpop.eup %5190  ;;  %v4706_v27 = vpack.c.bf16 %v5111_v25, %v5110_v30  ;;  %4711 = vmatprep.subr.bf16.mxu0 %v4710_v49 }
 0x95c   :  { %v1326_v34 = vmul.f32 %v5191_v35, %v5183_v40 }
 0x95d   :  { %4357 = vmatmul.mubr.msk.f32.vlgmr.msra.gmra.mrb[8].mxu0 %vm888_vm2, %v1324_v26  ;;  %4707 = vmatprep.subr.bf16.mxu1 %v4706_v27 }
 0x95e   :  { %4709 = vmatpush3.bf16.msra.mxu1 %v4706_v27  ;;  %4363 = vmatprep.mubr.msk.f32.mxu1 %vm888_vm2, %v1326_v34 }
 0x95f   :  { %v5193_v37 = vpop.eup %5192  ;;  %4713 = vmatpush3.bf16.msra.mxu0 %v4710_v49  ;;  %v4742_v49 = vpack.c.bf16 %v1708_v42, %v1706_v39  ;;  %v1731_v39 = vld [vmem:[#allocation22 + $0xd0] sm:$0xff] }
 0x960   :  { %v1328_v38 = vmul.f32 %v5193_v37, %v5185_v4  ;;  %4715 = vmatprep.subr.bf16.mxu0 %v4714_v54 }
 0x961   :  { %4743 = vmatprep.subr.bf16.mxu1 %v4742_v49  ;;  %v1736_v49 = vld [vmem:[#allocation22 + $0xf8] sm:$0xff] }
 0x962   :  { %4364 = vmatmul.mubr.msk.f32.vlgmr.msra.gmra.mrb[16].mxu1 %vm888_vm2, %v1328_v38 }
 0x963   :  { %1813 = vmatprep.mubr.f32.mxu1 %v5853_v20  ;;  %4717 = vmatpush3.bf16.msra.mxu0 %v4714_v54  ;;  %v1712_v54 = vld [vmem:[#allocation22 + $0x38] sm:$0xff] }
 0x964   :  { %4719 = vmatprep.subr.bf16.mxu0 %v4718_v58  ;;  %4745 = vmatpush1.bf16.msra.mxu1 %v4744_v56 }
 0x967   :  { %4721 = vmatpush3.bf16.msra.mxu0 %v4718_v58  ;;  %v1709_v58 = vld [vmem:[#allocation22 + $0x20] sm:$0xff] }
 0x968   :  { %4723 = vmatprep.subr.bf16.mxu0 %v4722_v62 }
 0x96b   :  { %4725 = vmatpush3.bf16.msra.mxu0 %v4722_v62  ;;  %v1716_v62 = vld [vmem:[#allocation22 + $0x58] sm:$0xff] }
 0x96c   :  { %4727 = vmatprep.subr.bf16.mxu0 %v4726_v43  ;;  %v4750_v36 = vpack.c.bf16 %v1716_v62, %v1714_v61 }
 0x96f   :  { %4729 = vmatpush3.bf16.msra.mxu0 %v4726_v43 }
 0x970   :  { %4731 = vmatprep.subr.bf16.mxu0 %v4730_v28 }
 0x973   :  { %4733 = vmatpush3.bf16.msra.mxu0 %v4730_v28 }
 0x974   :  { %4735 = vmatprep.subr.bf16.mxu0 %v4734_v0 }
 0x977   :  { %4737 = vmatpush3.bf16.msra.mxu0 %v4734_v0 }
 0x978   :  { %4739 = vmatprep.subr.bf16.mxu0 %v4738_v2 }
 0x97b   :  { %4741 = vmatpush3.bf16.msra.mxu0 %v4738_v2 }
 0xa30   :  { %v4358_v55 = vpop.f32.mrb[8].mxu0 }
 0xa31   :  { %v1409_v40 = vpop.f32.mrb[9].mxu0 }
 0xa32   :  { %v5112_v3 = vpack.i.bf16 %v4358_v55, %v1409_v40 }
 0xa34   :  { %5113 = vrot.lane.b32.xlu1 %v5112_v3, %s5854_s3 }
 0xa35   :  { %v4365_v4 = vpop.f32.mrb[16].mxu1 }
 0xa36   :  { %v1498_v5 = vpop.f32.mrb[17].mxu1 }
 0xa37   :  { %v5117_v6 = vpack.i.bf16 %v4365_v4, %v1498_v5 }
 0xa39   :  { %5118 = vrot.lane.b32.xlu1 %v5117_v6, %s5854_s3 }
 0xaa6   :  { %v5114_v9 = vpop.permute.xlu1 %5113 }
 0xaa7   :  { %v5116_v10 = vunpack.i.h.bf16 %v5114_v9  ;;  %v5115_v12 = vunpack.i.l.bf16 %v5114_v9 }
 0xaa9   :  { %v1523_v48 = vsel %vm693_vm0, %v6481_v17, %v5115_v12  ;;  %v1524_v14 = vsel %vm693_vm0, %v6479_v16, %v5116_v10  ;;  %v1718_v10 = vld [vmem:[#allocation22 + $0x68] sm:$0xff]  ;;  %v1720_v12 = vld [vmem:[#allocation22 + $0x78] sm:$0xff] }
 0xaaa   :  { %4398 = vmatprep.mubr.f32.mxu0 %v1523_v48  ;;  %v4754_v48 = vpack.c.bf16 %v1720_v12, %v1718_v10 }
 0xaab   :  { %v5119_v15 = vpop.permute.xlu1 %5118  ;;  %4399 = vmatmul.mubr.f32.vlgmr.msra.gmra.mrb[10].mxu0 %v1524_v14  ;;  %v1717_v14 = vld [vmem:[#allocation22 + $0x60] sm:$0xff] }
 0xaac   :  { %v5121_v23 = vunpack.i.h.bf16 %v5119_v15  ;;  %v5120_v24 = vunpack.i.l.bf16 %v5119_v15  ;;  %v1719_v15 = vld [vmem:[#allocation22 + $0x70] sm:$0xff] }
 0xaae   :  { %v1525_v41 = vsel %vm693_vm0, %v6485_v22, %v5120_v24  ;;  %v1526_v45 = vsel %vm693_vm0, %v6483_v21, %v5121_v23  ;;  %v4756_v23 = vpack.c.bf16 %v1719_v15, %v1717_v14  ;;  %v1722_v24 = vld [vmem:[#allocation22 + $0x88] sm:$0xff] }
 0xaaf   :  { %4401 = vmatprep.mubr.f32.mxu0 %v1525_v41  ;;  %v1724_v41 = vld [vmem:[#allocation22 + $0x98] sm:$0xff] }
 0xab0   :  { %4402 = vmatmul.mubr.f32.gmra.mrb[12].mxu0 %v1526_v45  ;;  %v4758_v45 = vpack.c.bf16 %v1724_v41, %v1722_v24  ;;  %v1927_v24 = vld [vmem:[#allocation25 + $0x88] sm:$0xff]  ;;  %v1910_v41 = vld [vmem:[#allocation25] sm:$0xff] }
 0xb7e   :  { %v4400_v25 = vpop.f32.mrb[10].mxu0 }
 0xb7f   :  { %v1622_v30 = vadd.f32 %v4400_v25, %v3968_v46  ;;  %v1616_v17 = vpop.f32.mrb[11].mxu0  ;;  %v1723_v25 = vld [vmem:[#allocation22 + $0x90] sm:$0xff] }
 0xb80   :  { %v1617_v35 = vadd.f32 %v3968_v46, %v1616_v17  ;;  %v1726_v17 = vld [vmem:[#allocation22 + $0xa8] sm:$0xff] }
 0xb81   :  { %v1636_v16 = vadd.f32 %v1622_v30, %v6336_v8  ;;  %v1710_v8 = vld [vmem:[#allocation22 + $0x28] sm:$0xff] }
 0xb82   :  { %v1635_v26 = vadd.f32 %v1617_v35, %v6329_v53  ;;  %v4746_v57 = vpack.c.bf16 %v1712_v54, %v1710_v8  ;;  %v1728_v35 = vld [vmem:[#allocation22 + $0xb8] sm:$0xff]  ;;  %v4770_v8 = vpack.c.bf16 %v1736_v49, %v1734_v44  ;;  %v1735_v54 = vld [vmem:[#allocation22 + $0xf0] sm:$0xff] }
 0xb83   :  { %1643 = vadd.xlane.f32.xlu1 %v1636_v16  ;;  %v4403_v27 = vpop.f32.mrb[12].mxu0  ;;  %v4772_v56 = vpack.c.bf16 %v1735_v54, %v1733_v50  ;;  %v1916_v49 = vld [vmem:[#allocation25 + $0x30] sm:$0xff]  ;;  %v1917_v50 = vld [vmem:[#allocation25 + $0x38] sm:$0xff]  ;;  %v1934_v54 = vld [vmem:[#allocation25 + $0xc0] sm:$0xff] }
 0xb84   :  { %v1626_v34 = vpop.f32.mrb[13].mxu0  ;;  %1641 = vadd.xlane.f32.xlu0 %v1635_v26  ;;  %v1632_v22 = vadd.f32 %v4403_v27, %v3968_v46  ;;  %4747 = vmatprep.subr.bf16.mxu1 %v4746_v57  ;;  %v1727_v27 = vld [vmem:[#allocation22 + $0xb0] sm:$0xff] }
 0xb85   :  { %v1627_v37 = vadd.f32 %v3968_v46, %v1626_v34  ;;  %v1721_v46 = vld [vmem:[#allocation22 + $0x80] sm:$0xff] }
 0xb86   :  { %v1638_v21 = vadd.f32 %v1632_v22, %v6344_v11  ;;  %v1713_v11 = vld [vmem:[#allocation22 + $0x40] sm:$0xff]  ;;  %v4760_v30 = vpack.c.bf16 %v1723_v25, %v1721_v46  ;;  %v1732_v22 = vld [vmem:[#allocation22 + $0xd8] sm:$0xff] }
 0xb87   :  { %v1637_v38 = vadd.f32 %v1627_v37, %v6329_v53  ;;  %v4748_v53 = vpack.c.bf16 %v1711_v59, %v1709_v58  ;;  %v4752_v43 = vpack.c.bf16 %v1715_v63, %v1713_v11  ;;  %v1730_v37 = vld [vmem:[#allocation22 + $0xc8] sm:$0xff]  ;;  %v1928_v25 = vld [vmem:[#allocation25 + $0x90] sm:$0xff] }
 0xb89   :  { %1645 = vadd.xlane.f32.xlu0 %v1637_v38  ;;  %4749 = vmatpush1.bf16.msra.mxu1 %v4748_v53 }
 0xb8a   :  { %4751 = vmatprep.subr.bf16.mxu1 %v4750_v36 }
 0xb8d   :  { %1647 = vadd.xlane.f32.xlu0 %v1638_v21  ;;  %4753 = vmatpush1.bf16.msra.mxu1 %v4752_v43 }
 0xb8e   :  { %4755 = vmatprep.subr.bf16.mxu1 %v4754_v48 }
 0xb91   :  { %4757 = vmatpush1.bf16.msra.mxu1 %v4756_v23  ;;  %v1926_v23 = vld [vmem:[#allocation25 + $0x80] sm:$0xff] }
 0xb92   :  { %4759 = vmatprep.subr.bf16.mxu1 %v4758_v45  ;;  %v1911_v45 = vld [vmem:[#allocation25 + $0x8] sm:$0xff] }
 0xb93   :  { %v4776_v46 = vpack.c.bf16 %v1911_v45, %v1910_v41 }
 0xb95   :  { %4761 = vmatpush1.bf16.msra.mxu1 %v4760_v30  ;;  %v1929_v30 = vld [vmem:[#allocation25 + $0x98] sm:$0xff] }
 0xc10   :  { %v1644_v51 = vpop.xlane.xlu1 %1643 }
 0xc11   :  { %v1650_v47 = vmul.f32 0.0078125, %v1644_v51  ;;  %v1642_v28 = vpop.xlane.xlu0 %1641 }
 0xc12   :  { %v1649_v29 = vmul.f32 0.0078125, %v1642_v28 }
 0xc13   :  { %v6526_v32 = vsub.f32 %v1636_v16, %v1650_v47  ;;  %v4762_v16 = vpack.c.bf16 %v1728_v35, %v1726_v17  ;;  %v4778_v17 = vpack.c.bf16 %v1929_v30, %v1928_v25  ;;  %v1912_v35 = vld [vmem:[#allocation25 + $0x10] sm:$0xff] }
 0xc14   :  { %v6528_v0 = vsub.f32 %v1635_v26, %v1649_v29  ;;  %v1725_v26 = vld [vmem:[#allocation22 + $0xa0] sm:$0xff] }
 0xc15   :  { %v1658_v52 = vmul.f32 %v6526_v32, %v6526_v32  ;;  %v4764_v34 = vpack.c.bf16 %v1727_v27, %v1725_v26  ;;  %4763 = vmatprep.subr.bf16.mxu1 %v4762_v16  ;;  %v1913_v16 = vld [vmem:[#allocation25 + $0x18] sm:$0xff]  ;;  %v1930_v27 = vld [vmem:[#allocation25 + $0xa0] sm:$0xff] }
 0xc16   :  { %v1646_v1 = vpop.xlane.xlu0 %1645  ;;  %v1657_v2 = vmul.f32 %v6528_v0, %v6528_v0  ;;  %v4780_v26 = vpack.c.bf16 %v1913_v16, %v1912_v35 }
 0xc17   :  { %v1651_v55 = vmul.f32 0.0078125, %v1646_v1  ;;  %1663 = vadd.xlane.f32.xlu1 %v1658_v52  ;;  %4765 = vmatpush1.bf16.msra.mxu1 %v4764_v34  ;;  %v3969_v52 = vld [vmem:[#allocation19] ss:$0 sm:$0xff]  ;;  %v1931_v34 = vld [vmem:[#allocation25 + $0xa8] sm:$0xff] }
 0xc18   :  { %1661 = vadd.xlane.f32.xlu0 %v1657_v2 }
 0xc19   :  { %v6534_v40 = vsub.f32 %v1637_v38, %v1651_v55  ;;  %v4766_v38 = vpack.c.bf16 %v1732_v22, %v1730_v37  ;;  %v3970_v55 = vld [vmem:[#allocation20] ss:$0 sm:$0xff]  ;;  %v4782_v37 = vpack.c.bf16 %v1931_v34, %v1930_v27  ;;  %v1914_v22 = vld [vmem:[#allocation25 + $0x20] sm:$0xff] }
 0xc1a   :  { %v1648_v3 = vpop.xlane.xlu0 %1647 }
 0xc1b   :  { %v1652_v4 = vmul.f32 0.0078125, %v1648_v3  ;;  %v1659_v5 = vmul.f32 %v6534_v40, %v6534_v40  ;;  %4767 = vmatprep.subr.bf16.mxu1 %v4766_v38  ;;  %v1915_v38 = vld [vmem:[#allocation25 + $0x28] sm:$0xff] }
 0xc1d   :  { %v6538_v6 = vsub.f32 %v1638_v21, %v1652_v4  ;;  %1665 = vadd.xlane.f32.xlu0 %v1659_v5  ;;  %v1729_v21 = vld [vmem:[#allocation22 + $0xc0] sm:$0xff] }
 0xc1e   :  { %v4768_v42 = vpack.c.bf16 %v1731_v39, %v1729_v21  ;;  %v4784_v21 = vpack.c.bf16 %v1915_v38, %v1914_v22  ;;  %v1932_v39 = vld [vmem:[#allocation25 + $0xb0] sm:$0xff] }
 0xc1f   :  { %v1660_v9 = vmul.f32 %v6538_v6, %v6538_v6 }
 0xc20   :  { %4769 = vmatpush1.bf16.msra.mxu1 %v4768_v42  ;;  %v1933_v42 = vld [vmem:[#allocation25 + $0xb8] sm:$0xff] }
 0xc21   :  { %1667 = vadd.xlane.f32.xlu1 %v1660_v9  ;;  %4771 = vmatprep.subr.bf16.mxu1 %v4770_v8  ;;  %v4786_v44 = vpack.c.bf16 %v1933_v42, %v1932_v39  ;;  %v4788_v8 = vpack.c.bf16 %v1917_v50, %v1916_v49 }
 0xc24   :  { %4773 = vmatpush1.bf16.msra.mxu1 %v4772_v56  ;;  %v1935_v56 = vld [vmem:[#allocation25 + $0xc8] sm:$0xff] }
 0xca4   :  { %v1664_v57 = vpop.xlane.xlu1 %1663 }
 0xca5   :  { %v1670_v58 = vmul.f32 0.0078125, %v1664_v57  ;;  %v1662_v59 = vpop.xlane.xlu0 %1661  ;;  %v4790_v57 = vpack.c.bf16 %v1935_v56, %v1934_v54 }
 0xca6   :  { %v1669_v61 = vmul.f32 0.0078125, %v1662_v59  ;;  %v1919_v59 = vld [vmem:[#allocation25 + $0x48] sm:$0xff] }
 0xca7   :  { %v1674_v62 = vadd.f32 1e-12, %v1670_v58  ;;  %v1918_v58 = vld [vmem:[#allocation25 + $0x40] sm:$0xff] }
 0xca8   :  { %v1673_v53 = vadd.f32 1e-12, %v1669_v61  ;;  %v4792_v61 = vpack.c.bf16 %v1919_v59, %v1918_v58 }
 0xca9   :  { %5194 = vrsqrt.f32 %v1674_v62  ;;  %v1936_v62 = vld [vmem:[#allocation25 + $0xd0] sm:$0xff] }
 0xcaa   :  { %5196 = vrsqrt.f32 %v1673_v53  ;;  %v1666_v36 = vpop.xlane.xlu0 %1665  ;;  %v1937_v53 = vld [vmem:[#allocation25 + $0xd8] sm:$0xff] }
 0xcab   :  { %v1671_v11 = vmul.f32 0.0078125, %v1666_v36  ;;  %v4794_v36 = vpack.c.bf16 %v1937_v53, %v1936_v62 }
 0xcad   :  { %v1675_v63 = vadd.f32 1e-12, %v1671_v11  ;;  %v1920_v11 = vld [vmem:[#allocation25 + $0x50] sm:$0xff] }
 0xcae   :  { %v1668_v43 = vpop.xlane.xlu1 %1667 }
 0xcaf   :  { %5198 = vrsqrt.f32 %v1675_v63  ;;  %v1672_v51 = vmul.f32 0.0078125, %v1668_v43  ;;  %v1921_v63 = vld [vmem:[#allocation25 + $0x58] sm:$0xff] }
 0xcb0   :  { %v4796_v43 = vpack.c.bf16 %v1921_v63, %v1920_v11 }
 0xcb1   :  { %v1676_v47 = vadd.f32 1e-12, %v1672_v51  ;;  %v1938_v51 = vld [vmem:[#allocation25 + $0xe0] sm:$0xff] }
 0xcb3   :  { %v5195_v28 = vpop.eup %5194  ;;  %5200 = vrsqrt.f32 %v1676_v47  ;;  %v1939_v47 = vld [vmem:[#allocation25 + $0xe8] sm:$0xff] }
 0xcb4   :  { %v5197_v29 = vpop.eup %5196  ;;  %v1682_v2 = vmul.f32 %v5195_v28, %v6526_v32  ;;  %v4798_v28 = vpack.c.bf16 %v1939_v47, %v1938_v51 }
 0xcb5   :  { %v1681_v1 = vmul.f32 %v5197_v29, %v6528_v0  ;;  %v1922_v29 = vld [vmem:[#allocation25 + $0x60] sm:$0xff] }
 0xcb6   :  { %v1692_v9 = vmul.f32 %v3969_v52, %v1682_v2  ;;  %v1940_v2 = vld [vmem:[#allocation25 + $0xf0] sm:$0xff] }
 0xcb7   :  { %v1691_v3 = vmul.f32 %v3969_v52, %v1681_v1 }
 0xcb8   :  { %v6549_v48 = vadd.f32 %v3970_v55, %v1692_v9  ;;  %v1925_v9 = vld [vmem:[#allocation25 + $0x78] sm:$0xff] }
 0xcb9   :  { %v5199_v4 = vpop.eup %5198  ;;  %v6544_v5 = vadd.f32 %v3970_v55, %v1691_v3 }
 0xcba   :  { %v1683_v10 = vmul.f32 %v5199_v4, %v6534_v40  ;;  %v1924_v4 = vld [vmem:[#allocation25 + $0x70] sm:$0xff] }
 0xcbb   :  { %1814 = vmatmul.mubr.f32.vlgmr.msra.gmra.mrb[18].mxu1 %v6544_v5 }
 0xcbc   :  { %1819 = vmatprep.mubr.f32.mxu1 %v5853_v20  ;;  %v1693_v14 = vmul.f32 %v3969_v52, %v1683_v10  ;;  %v4804_v10 = vpack.c.bf16 %v1925_v9, %v1924_v4 }
 0xcbd   :  { %v5201_v12 = vpop.eup %5200 }
 0xcbe   :  { %v1684_v0 = vmul.f32 %v5201_v12, %v6538_v6  ;;  %v6554_v32 = vadd.f32 %v3970_v55, %v1693_v14  ;;  %v4774_v6 = vpack.c.bf16 %v1927_v24, %v1926_v23  ;;  %v1737_v12 = vld [vmem:[#allocation23] sm:$0x3] }
 0xcbf   :  { %1820 = vmatmul.mubr.f32.gmra.mrb[20].mxu1 %v6549_v48  ;;  %v1742_v14 = vrot.slane %v1737_v12, %v6353_v33 }
 0xcc0   :  { %1825 = vmatprep.mubr.f32.mxu1 %v5853_v20  ;;  %v1694_v15 = vmul.f32 %v3969_v52, %v1684_v0  ;;  %4775 = vmatprep.subr.bf16.mxu0 %v4774_v6  ;;  %v1923_v52 = vld [vmem:[#allocation25 + $0x68] sm:$0xff]  ;;  %v1746_v0 = vrot.slane %v1737_v12, %v6362_v19 }
 0xcc1   :  { %4777 = vmatpush3.bf16.msra.mxu0 %v4776_v46  ;;  %v4800_v1 = vpack.c.bf16 %v1923_v52, %v1922_v29 }
 0xcc2   :  { %v6558_v40 = vadd.f32 %v3970_v55, %v1694_v15  ;;  %4779 = vmatprep.subr.bf16.mxu0 %v4778_v17  ;;  %v1941_v55 = vld [vmem:[#allocation25 + $0xf8] sm:$0xff] }
 0xcc3   :  { %1826 = vmatmul.mubr.f32.gmra.mrb[22].mxu1 %v6554_v32  ;;  %v4802_v3 = vpack.c.bf16 %v1941_v55, %v1940_v2 }
 0xcc4   :  { %1831 = vmatprep.mubr.f32.mxu1 %v5853_v20 }
 0xcc5   :  { %4781 = vmatpush3.bf16.msra.mxu0 %v4780_v26 }
 0xcc6   :  { %4783 = vmatprep.subr.bf16.mxu0 %v4782_v37 }
 0xcc7   :  { %1832 = vmatmul.mubr.f32.gmra.mrb[24].mxu1 %v6558_v40 }
 0xcc8   :  { %2235 = vmatprep.mubr.f32.mxu1 %v5853_v20 }
 0xcc9   :  { %4785 = vmatpush3.bf16.msra.mxu0 %v4784_v21 }
 0xcca   :  { %4787 = vmatprep.subr.bf16.mxu0 %v4786_v44 }
 0xccd   :  { %4789 = vmatpush3.bf16.msra.mxu0 %v4788_v8 }
 0xcce   :  { %4791 = vmatprep.subr.bf16.mxu0 %v4790_v57 }
 0xcd1   :  { %4793 = vmatpush3.bf16.msra.mxu0 %v4792_v61 }
 0xcd2   :  { %4795 = vmatprep.subr.bf16.mxu0 %v4794_v36 }
 0xcd5   :  { %4797 = vmatpush3.bf16.msra.mxu0 %v4796_v43 }
 0xcd6   :  { %4799 = vmatprep.subr.bf16.mxu0 %v4798_v28 }
 0xcd9   :  { %4801 = vmatpush3.bf16.msra.mxu0 %v4800_v1 }
 0xcda   :  { %4803 = vmatprep.subr.bf16.mxu0 %v4802_v3 }
 0xcdd   :  { %4805 = vmatpush3.bf16.msra.mxu0 %v4804_v10 }
 0xd8e   :  { %v1815_v15 = vpop.f32.mrb[18].mxu1 }
 0xd8f   :  { %v6564_v23 = vadd.f32 %v1815_v15, %v1742_v14  ;;  %v1817_v24 = vpop.f32.mrb[19].mxu1 }
 0xd90   :  { %v6566_v6 = vadd.f32 %v1817_v24, %v1746_v0 }
 0xd91   :  { %v1838_v41 = vmul.f32 %v6564_v23, %v6564_v23 }
 0xd92   :  { %v1839_v45 = vmul.f32 %v6566_v6, %v6566_v6  ;;  %v1821_v46 = vpop.f32.mrb[20].mxu1 }
 0xd93   :  { %v1846_v25 = vmul.f32 %v1838_v41, %v6564_v23  ;;  %v6573_v30 = vadd.f32 %v1821_v46, %v1742_v14  ;;  %v1823_v17 = vpop.f32.mrb[21].mxu1 }
 0xd94   :  { %v1847_v35 = vmul.f32 %v1839_v45, %v6566_v6  ;;  %v6576_v16 = vadd.f32 %v1823_v17, %v1746_v0 }
 0xd95   :  { %v1854_v26 = vmul.f32 0.044715, %v1846_v25  ;;  %v1840_v27 = vmul.f32 %v6573_v30, %v6573_v30 }
 0xd96   :  { %v1855_v34 = vmul.f32 0.044715, %v1847_v35  ;;  %v1841_v37 = vmul.f32 %v6576_v16, %v6576_v16  ;;  %v1827_v22 = vpop.f32.mrb[22].mxu1 }
 0xd97   :  { %v1862_v38 = vadd.f32 %v1854_v26, %v6564_v23  ;;  %v1848_v21 = vmul.f32 %v1840_v27, %v6573_v30  ;;  %v6584_v39 = vadd.f32 %v1827_v22, %v1742_v14  ;;  %v1829_v42 = vpop.f32.mrb[23].mxu1 }
 0xd98   :  { %v1863_v44 = vadd.f32 %v1855_v34, %v6566_v6  ;;  %v1849_v49 = vmul.f32 %v1841_v37, %v6576_v16  ;;  %v6588_v50 = vadd.f32 %v1829_v42, %v1746_v0 }
 0xd99   :  { %v1870_v8 = vmul.f32 0.7978846, %v1862_v38  ;;  %v1856_v54 = vmul.f32 0.044715, %v1848_v21  ;;  %v1842_v56 = vmul.f32 %v6584_v39, %v6584_v39 }
 0xd9a   :  { %v1871_v57 = vmul.f32 0.7978846, %v1863_v44  ;;  %v1857_v58 = vmul.f32 0.044715, %v1849_v49  ;;  %v1843_v59 = vmul.f32 %v6588_v50, %v6588_v50  ;;  %v1833_v61 = vpop.f32.mrb[24].mxu1 }
 0xd9b   :  { %5202 = vtanh.f32 %v1870_v8  ;;  %v1864_v62 = vadd.f32 %v1856_v54, %v6573_v30  ;;  %v1850_v53 = vmul.f32 %v1842_v56, %v6584_v39  ;;  %v6596_v36 = vadd.f32 %v1833_v61, %v1742_v14  ;;  %v1835_v11 = vpop.f32.mrb[25].mxu1 }
 0xd9c   :  { %v1865_v63 = vadd.f32 %v1857_v58, %v6576_v16  ;;  %v1851_v43 = vmul.f32 %v1843_v59, %v6588_v50  ;;  %v1836_v51 = vadd.f32 %v1835_v11, %v1746_v0  ;;  %5204 = vtanh.f32 %v1871_v57 }
 0xd9d   :  { %v1872_v47 = vmul.f32 0.7978846, %v1864_v62  ;;  %v1858_v28 = vmul.f32 0.044715, %v1850_v53  ;;  %v1844_v29 = vmul.f32 %v6596_v36, %v6596_v36 }
 0xd9e   :  { %v1873_v52 = vmul.f32 0.7978846, %v1865_v63  ;;  %v1859_v1 = vmul.f32 0.044715, %v1851_v43  ;;  %v1845_v2 = vmul.f32 %v1836_v51, %v1836_v51 }
 0xd9f   :  { %v1866_v55 = vadd.f32 %v1858_v28, %v6584_v39  ;;  %v1852_v3 = vmul.f32 %v1844_v29, %v6596_v36  ;;  %5206 = vtanh.f32 %v1872_v47 }
 0xda0   :  { %v1867_v4 = vadd.f32 %v1859_v1, %v6588_v50  ;;  %v1853_v9 = vmul.f32 %v1845_v2, %v1836_v51  ;;  %5208 = vtanh.f32 %v1873_v52  ;;  %v3971_v52 = vld [vmem:[#allocation26] ss:$0 sm:$0xff] }
 0xda1   :  { %v1874_v10 = vmul.f32 0.7978846, %v1866_v55  ;;  %v1860_v12 = vmul.f32 0.044715, %v1852_v3 }
 0xda2   :  { %v1875_v14 = vmul.f32 0.7978846, %v1867_v4  ;;  %v1861_v0 = vmul.f32 0.044715, %v1853_v9 }
 0xda3   :  { %v1868_v15 = vadd.f32 %v1860_v12, %v6596_v36  ;;  %5210 = vtanh.f32 %v1874_v10 }
 0xda4   :  { %v1869_v24 = vadd.f32 %v1861_v0, %v1836_v51  ;;  %5212 = vtanh.f32 %v1875_v14 }
 0xda5   :  { %v5203_v41 = vpop.eup %5202  ;;  %v1876_v45 = vmul.f32 0.7978846, %v1868_v15 }
 0xda6   :  { %v5205_v46 = vpop.eup %5204  ;;  %v1886_v25 = vadd.f32 1.0, %v5203_v41  ;;  %v1877_v17 = vmul.f32 0.7978846, %v1869_v24 }
 0xda7   :  { %v1887_v35 = vadd.f32 1.0, %v5205_v46  ;;  %5214 = vtanh.f32 %v1876_v45 }
 0xda8   :  { %v1894_v26 = vmul.f32 0.5, %v1886_v25  ;;  %5216 = vtanh.f32 %v1877_v17  ;;  %v2109_v25 = vld [vmem:[#allocation13 + $0x1a0] sm:$0xff] }
 0xda9   :  { %v5207_v27 = vpop.eup %5206  ;;  %v1895_v34 = vmul.f32 0.5, %v1887_v35  ;;  %v2105_v17 = vld [vmem:[#allocation13 + $0x180] sm:$0xff] }
 0xdaa   :  { %v5209_v37 = vpop.eup %5208  ;;  %v1888_v22 = vadd.f32 1.0, %v5207_v27  ;;  %v1902_v42 = vmul.f32 %v1894_v26, %v6564_v23  ;;  %v2108_v26 = vld [vmem:[#allocation13 + $0x198] sm:$0xff] }
 0xdab   :  { %v1903_v38 = vmul.f32 %v1895_v34, %v6566_v6  ;;  %v1889_v21 = vadd.f32 1.0, %v5209_v37  ;;  %v2112_v27 = vld [vmem:[#allocation13 + $0x1b8] sm:$0xff]  ;;  %v2115_v34 = vld [vmem:[#allocation13 + $0x1d0] sm:$0xff] }
 0xdac   :  { %v1896_v44 = vmul.f32 0.5, %v1888_v22  ;;  %v4810_v37 = vpack.c.bf16 %v2115_v34, %v2112_v27  ;;  %v2107_v22 = vld [vmem:[#allocation13 + $0x190] sm:$0xff]  ;;  %v2134_v34 = vld [vmem:[#allocation13 + $0x268] sm:$0xff] }
 0xdad   :  { %v5211_v49 = vpop.eup %5210  ;;  %2013 = vmatprep.mubr.f32.mxu0 %v1903_v38  ;;  %v1897_v8 = vmul.f32 0.5, %v1889_v21  ;;  %v2110_v38 = vld [vmem:[#allocation13 + $0x1a8] sm:$0xff]  ;;  %v2111_v21 = vld [vmem:[#allocation13 + $0x1b0] sm:$0xff] }
 0xdae   :  { %v5213_v54 = vpop.eup %5212  ;;  %2014 = vmatmul.mubr.f32.vlgmr.msra.gmra.mrb[14].mxu0 %v1902_v42  ;;  %v1890_v56 = vadd.f32 1.0, %v5211_v49  ;;  %v1904_v59 = vmul.f32 %v1896_v44, %v6573_v30  ;;  %v4838_v42 = vpack.c.bf16 %v2110_v38, %v2107_v22  ;;  %v2118_v44 = vld [vmem:[#allocation13 + $0x1e8] sm:$0xff]  ;;  %v2121_v49 = vld [vmem:[#allocation13 + $0x200] sm:$0xff] }
 0xdaf   :  { %v1905_v57 = vmul.f32 %v1897_v8, %v6576_v16  ;;  %v1891_v58 = vadd.f32 1.0, %v5213_v54  ;;  %v2113_v8 = vld [vmem:[#allocation13 + $0x1c0] sm:$0xff]  ;;  %v2116_v54 = vld [vmem:[#allocation13 + $0x1d8] sm:$0xff] }
 0xdb0   :  { %v1898_v61 = vmul.f32 0.5, %v1890_v56  ;;  %4839 = vmatprep.subr.bf16.mxu0 %v4838_v42  ;;  %v4814_v56 = vpack.c.bf16 %v2121_v49, %v2118_v44  ;;  %v2140_v49 = vld [vmem:[#allocation13 + $0x298] sm:$0xff] }
 0xdb1   :  { %v5215_v62 = vpop.eup %5214  ;;  %2018 = vmatprep.mubr.f32.mxu0 %v1905_v57  ;;  %v1899_v53 = vmul.f32 0.5, %v1891_v58  ;;  %v4842_v57 = vpack.c.bf16 %v2116_v54, %v2113_v8  ;;  %v2117_v58 = vld [vmem:[#allocation13 + $0x1e0] sm:$0xff]  ;;  %4841 = vmatpush3.bf16.msra.mxu0 %v4838_v42  ;;  %v2144_v8 = vld [vmem:[#allocation13 + $0x2b8] sm:$0xff] }
 0xdb2   :  { %v5217_v6 = vpop.eup %5216  ;;  %2019 = vmatmul.mubr.f32.gmra.mrb[16].mxu0 %v1904_v59  ;;  %v1892_v11 = vadd.f32 1.0, %v5215_v62  ;;  %v1906_v43 = vmul.f32 %v1898_v61, %v6584_v39  ;;  %v2120_v59 = vld [vmem:[#allocation13 + $0x1f8] sm:$0xff]  ;;  %v2145_v42 = vld [vmem:[#allocation13 + $0x2c0] sm:$0xff] }
 0xdb3   :  { %v1907_v23 = vmul.f32 %v1899_v53, %v6588_v50  ;;  %v1893_v63 = vadd.f32 1.0, %v5217_v6  ;;  %4843 = vmatprep.subr.bf16.mxu0 %v4842_v57  ;;  %v4816_v61 = vpack.c.bf16 %v2120_v59, %v2117_v58  ;;  %v2151_v58 = vld [vmem:[#allocation13 + $0x2f0] sm:$0xff] }
 0xdb4   :  { %v1900_v47 = vmul.f32 0.5, %v1892_v11  ;;  %v2143_v59 = vld [vmem:[#allocation13 + $0x2b0] sm:$0xff] }
 0xdb5   :  { %2023 = vmatprep.mubr.f32.mxu0 %v1907_v23  ;;  %v1901_v28 = vmul.f32 0.5, %v1893_v63  ;;  %4845 = vmatpush3.bf16.msra.mxu0 %v4842_v57  ;;  %v2148_v57 = vld [vmem:[#allocation13 + $0x2d8] sm:$0xff] }
 0xdb6   :  { %2024 = vmatmul.mubr.f32.gmra.mrb[18].mxu0 %v1906_v43  ;;  %v1908_v29 = vmul.f32 %v1900_v47, %v6596_v36 }
 0xdb7   :  { %v1909_v16 = vmul.f32 %v1901_v28, %v1836_v51 }
 0xdb9   :  { %2028 = vmatprep.mubr.f32.mxu0 %v1909_v16 }
 0xdba   :  { %2029 = vmatmul.mubr.f32.gmra.mrb[20].mxu0 %v1908_v29 }
 0xe81   :  { %v4110_v30 = vpop.f32.mrb[14].mxu0 }
 0xe82   :  { %v4111_v1 = vpop.f32.mrb[15].mxu0 }
 0xe83   :  { %v4112_v2 = vadd.f32 %v4111_v1, %v4110_v30 }
 0xe85   :  { %v2016_v55 = vadd.f32 %v4112_v2, %v3971_v52  ;;  %v4113_v3 = vpop.f32.mrb[16].mxu0 }
 0xe86   :  { %v4114_v4 = vpop.f32.mrb[17].mxu0 }
 0xe87   :  { %v4115_v50 = vadd.f32 %v4114_v4, %v4113_v3  ;;  %v2034_v9 = vadd.f32 %v2016_v55, %v6544_v5  ;;  %v2106_v5 = vld [vmem:[#allocation13 + $0x188] sm:$0xff]  ;;  %v2124_v3 = vld [vmem:[#allocation13 + $0x218] sm:$0xff]  ;;  %v2127_v4 = vld [vmem:[#allocation13 + $0x230] sm:$0xff] }
 0xe88   :  { %v4806_v35 = vpack.c.bf16 %v2109_v25, %v2106_v5 }
 0xe89   :  { %v2021_v39 = vadd.f32 %v4115_v50, %v3971_v52  ;;  %2040 = vadd.xlane.f32.xlu0 %v2034_v9  ;;  %v4116_v10 = vpop.f32.mrb[18].mxu0  ;;  %v2119_v50 = vld [vmem:[#allocation13 + $0x1f0] sm:$0xff] }
 0xe8a   :  { %v4117_v12 = vpop.f32.mrb[19].mxu0  ;;  %4807 = vmatprep.subr.bf16.mxu1 %v4806_v35  ;;  %v2139_v35 = vld [vmem:[#allocation13 + $0x290] sm:$0xff] }
 0xe8b   :  { %v4118_v14 = vadd.f32 %v4117_v12, %v4116_v10  ;;  %v2035_v51 = vadd.f32 %v2021_v39, %v6549_v48  ;;  %v4808_v48 = vpack.c.bf16 %v2108_v26, %v2105_v17  ;;  %v2122_v39 = vld [vmem:[#allocation13 + $0x208] sm:$0xff]  ;;  %v2123_v10 = vld [vmem:[#allocation13 + $0x210] sm:$0xff]  ;;  %v2136_v17 = vld [vmem:[#allocation13 + $0x278] sm:$0xff] }
 0xe8c   :  { %v2126_v12 = vld [vmem:[#allocation13 + $0x228] sm:$0xff]  ;;  %v2131_v26 = vld [vmem:[#allocation13 + $0x250] sm:$0xff]  ;;  %v4826_v27 = vpack.c.bf16 %v2139_v35, %v2136_v17 }
 0xe8d   :  { %v2026_v36 = vadd.f32 %v4118_v14, %v3971_v52  ;;  %2042 = vadd.xlane.f32.xlu1 %v2035_v51  ;;  %v4119_v0 = vpop.f32.mrb[20].mxu0  ;;  %4809 = vmatpush1.bf16.msra.mxu1 %v4808_v48  ;;  %v4846_v14 = vpack.c.bf16 %v2122_v39, %v2119_v50  ;;  %v2135_v48 = vld [vmem:[#allocation13 + $0x270] sm:$0xff]  ;;  %v4854_v22 = vpack.c.bf16 %v2134_v34, %v2131_v26 }
 0xe8e   :  { %v4120_v15 = vpop.f32.mrb[21].mxu0  ;;  %4811 = vmatprep.subr.bf16.mxu1 %v4810_v37  ;;  %v2138_v37 = vld [vmem:[#allocation13 + $0x288] sm:$0xff] }
 0xe8f   :  { %v4121_v24 = vadd.f32 %v4120_v15, %v4119_v0  ;;  %v2036_v41 = vadd.f32 %v2026_v36, %v6554_v32  ;;  %v2114_v32 = vld [vmem:[#allocation13 + $0x1c8] sm:$0xff]  ;;  %4847 = vmatprep.subr.bf16.mxu0 %v4846_v14  ;;  %v2133_v0 = vld [vmem:[#allocation13 + $0x260] sm:$0xff]  ;;  %v4828_v38 = vpack.c.bf16 %v2138_v37, %v2135_v48 }
 0xe90   :  { %v2130_v36 = vld [vmem:[#allocation13 + $0x248] sm:$0xff]  ;;  %v2125_v15 = vld [vmem:[#allocation13 + $0x220] sm:$0xff]  ;;  %4849 = vmatpush3.bf16.msra.mxu0 %v4846_v14 }
 0xe91   :  { %v2031_v45 = vadd.f32 %v4121_v24, %v3971_v52  ;;  %2044 = vadd.xlane.f32.xlu0 %v2036_v41  ;;  %v4822_v24 = vpack.c.bf16 %v2133_v0, %v2130_v36  ;;  %v3972_v36 = vld [vmem:[#allocation28] ss:$0 sm:$0xff]  ;;  %v2154_v48 = vld [vmem:[#allocation14 + $0x3] sm:$0x7] }
 0xe92   :  { %v2159_v37 = vrot.slane %v2154_v48, %v6353_v33 }
 0xe93   :  { %v2037_v46 = vadd.f32 %v2031_v45, %v6558_v40  ;;  %v4812_v40 = vpack.c.bf16 %v2114_v32, %v2111_v21  ;;  %v2129_v45 = vld [vmem:[#allocation13 + $0x240] sm:$0xff]  ;;  %v2142_v21 = vld [vmem:[#allocation13 + $0x2a8] sm:$0xff] }
 0xe94   :  { %v2137_v32 = vld [vmem:[#allocation13 + $0x280] sm:$0xff]  ;;  %v4830_v44 = vpack.c.bf16 %v2145_v42, %v2142_v21  ;;  %v2167_v21 = vrot.slane %v2154_v48, %v514_v18  ;;  %v2163_v42 = vrot.slane %v2154_v48, %v6362_v19 }
 0xe95   :  { %2046 = vadd.xlane.f32.xlu1 %v2037_v46  ;;  %4813 = vmatpush1.bf16.msra.mxu1 %v4812_v40  ;;  %v2141_v40 = vld [vmem:[#allocation13 + $0x2a0] sm:$0xff]  ;;  %v4858_v54 = vpack.c.bf16 %v2140_v49, %v2137_v32 }
 0xe96   :  { %4815 = vmatprep.subr.bf16.mxu1 %v4814_v56  ;;  %v4832_v56 = vpack.c.bf16 %v2144_v8, %v2141_v40 }
 0xe99   :  { %4817 = vmatpush1.bf16.msra.mxu1 %v4816_v61  ;;  %v4834_v61 = vpack.c.bf16 %v2151_v58, %v2148_v57 }
 0xf16   :  { %v2041_v62 = vpop.xlane.xlu0 %2040 }
 0xf17   :  { %v2048_v53 = vmul.f32 0.0078125, %v2041_v62  ;;  %v2146_v62 = vld [vmem:[#allocation13 + $0x2c8] sm:$0xff] }
 0xf19   :  { %v6617_v6 = vsub.f32 %v2034_v9, %v2048_v53  ;;  %v4818_v9 = vpack.c.bf16 %v2127_v4, %v2124_v3  ;;  %v2147_v53 = vld [vmem:[#allocation13 + $0x2d0] sm:$0xff] }
 0xf1a   :  { %v2043_v11 = vpop.xlane.xlu1 %2042 }
 0xf1b   :  { %v2049_v23 = vmul.f32 0.0078125, %v2043_v11  ;;  %v2056_v63 = vmul.f32 %v6617_v6, %v6617_v6  ;;  %4819 = vmatprep.subr.bf16.mxu1 %v4818_v9  ;;  %v2150_v11 = vld [vmem:[#allocation13 + $0x2e8] sm:$0xff] }
 0xf1d   :  { %v6621_v43 = vsub.f32 %v2035_v51, %v2049_v23  ;;  %2060 = vadd.xlane.f32.xlu0 %v2056_v63  ;;  %v4820_v51 = vpack.c.bf16 %v2126_v12, %v2123_v10  ;;  %v4862_v23 = vpack.c.bf16 %v2146_v62, %v2143_v59  ;;  %v4836_v63 = vpack.c.bf16 %v2150_v11, %v2147_v53 }
 0xf1e   :  { %v2045_v47 = vpop.xlane.xlu0 %2044 }
 0xf1f   :  { %v2050_v28 = vmul.f32 0.0078125, %v2045_v47  ;;  %v2057_v16 = vmul.f32 %v6621_v43, %v6621_v43  ;;  %4821 = vmatpush1.bf16.msra.mxu1 %v4820_v51  ;;  %v2149_v47 = vld [vmem:[#allocation13 + $0x2e0] sm:$0xff] }
 0xf20   :  { %4823 = vmatprep.subr.bf16.mxu1 %v4822_v24 }
 0xf21   :  { %v6625_v29 = vsub.f32 %v2036_v41, %v2050_v28  ;;  %2062 = vadd.xlane.f32.xlu1 %v2057_v16  ;;  %v2128_v41 = vld [vmem:[#allocation13 + $0x238] sm:$0xff] }
 0xf22   :  { %v2047_v30 = vpop.xlane.xlu1 %2046  ;;  %v4850_v5 = vpack.c.bf16 %v2128_v41, %v2125_v15  ;;  %v2152_v28 = vld [vmem:[#allocation13 + $0x2f8] sm:$0xff]  ;;  %v3973_v15 = vld [vmem:[#allocation29] ss:$0 sm:$0xff] }
 0xf23   :  { %v2051_v52 = vmul.f32 0.0078125, %v2047_v30  ;;  %v2058_v1 = vmul.f32 %v6625_v29, %v6625_v29  ;;  %v4866_v16 = vpack.c.bf16 %v2152_v28, %v2149_v47 }
 0xf24   :  { %4851 = vmatprep.subr.bf16.mxu0 %v4850_v5 }
 0xf25   :  { %v6629_v2 = vsub.f32 %v2037_v46, %v2051_v52  ;;  %2064 = vadd.xlane.f32.xlu0 %v2058_v1  ;;  %v2132_v46 = vld [vmem:[#allocation13 + $0x258] sm:$0xff]  ;;  %4853 = vmatpush3.bf16.msra.mxu0 %v4850_v5 }
 0xf26   :  { %v4824_v25 = vpack.c.bf16 %v2132_v46, %v2129_v45  ;;  %4855 = vmatprep.subr.bf16.mxu0 %v4854_v22 }
 0xf27   :  { %v2059_v55 = vmul.f32 %v6629_v2, %v6629_v2 }
 0xf28   :  { %4825 = vmatpush1.bf16.msra.mxu1 %v4824_v25 }
 0xf29   :  { %2066 = vadd.xlane.f32.xlu1 %v2059_v55  ;;  %4827 = vmatprep.subr.bf16.mxu1 %v4826_v27 }
 0xf2a   :  { %4857 = vmatpush3.bf16.msra.mxu0 %v4854_v22 }
 0xf2b   :  { %4859 = vmatprep.subr.bf16.mxu0 %v4858_v54 }
 0xf2c   :  { %4829 = vmatpush1.bf16.msra.mxu1 %v4828_v38 }
 0xf2d   :  { %4831 = vmatprep.subr.bf16.mxu1 %v4830_v44 }
 0xf2e   :  { %4861 = vmatpush3.bf16.msra.mxu0 %v4858_v54 }
 0xf2f   :  { %4863 = vmatprep.subr.bf16.mxu0 %v4862_v23 }
 0xf30   :  { %4833 = vmatpush1.bf16.msra.mxu1 %v4832_v56 }
 0xf31   :  { %4835 = vmatprep.subr.bf16.mxu1 %v4834_v61 }
 0xf32   :  { %4865 = vmatpush3.bf16.msra.mxu0 %v4862_v23 }
 0xf33   :  { %4867 = vmatprep.subr.bf16.mxu0 %v4866_v16 }
 0xf34   :  { %4837 = vmatpush1.bf16.msra.mxu1 %v4836_v63 }
 0xf36   :  { %4869 = vmatpush3.bf16.msra.mxu0 %v4866_v16 }
 0xfaa   :  { %v2061_v30 = vpop.xlane.xlu0 %2060 }
 0xfab   :  { %v2068_v52 = vmul.f32 0.0078125, %v2061_v30 }
 0xfad   :  { %v2072_v1 = vadd.f32 1e-12, %v2068_v52 }
 0xfae   :  { %v2063_v55 = vpop.xlane.xlu1 %2062 }
 0xfaf   :  { %5218 = vrsqrt.f32 %v2072_v1  ;;  %v2069_v3 = vmul.f32 0.0078125, %v2063_v55 }
 0xfb1   :  { %v2073_v4 = vadd.f32 1e-12, %v2069_v3 }
 0xfb2   :  { %v2065_v50 = vpop.xlane.xlu0 %2064 }
 0xfb3   :  { %5220 = vrsqrt.f32 %v2073_v4  ;;  %v2070_v9 = vmul.f32 0.0078125, %v2065_v50 }
 0xfb5   :  { %v2074_v39 = vadd.f32 1e-12, %v2070_v9 }
 0xfb6   :  { %v2067_v10 = vpop.xlane.xlu1 %2066 }
 0xfb7   :  { %5222 = vrsqrt.f32 %v2074_v39  ;;  %v2071_v12 = vmul.f32 0.0078125, %v2067_v10 }
 0xfb9   :  { %v5219_v14 = vpop.eup %5218  ;;  %v2075_v51 = vadd.f32 1e-12, %v2071_v12 }
 0xfba   :  { %v2080_v0 = vmul.f32 %v5219_v14, %v6617_v6 }
 0xfbb   :  { %5224 = vrsqrt.f32 %v2075_v51 }
 0xfbc   :  { %v2090_v24 = vmul.f32 %v3972_v36, %v2080_v0 }
 0xfbd   :  { %v5221_v41 = vpop.eup %5220 }
 0xfbe   :  { %v6634_v45 = vadd.f32 %v3973_v15, %v2090_v24  ;;  %v2081_v46 = vmul.f32 %v5221_v41, %v6621_v43 }
 0xfc0   :  { %2236 = vmatmul.mubr.f32.vlgmr.msra.gmra.mrb[26].mxu1 %v6634_v45  ;;  %4436 = vmatprep.mubr.f32.mxu0 %v6634_v45  ;;  %v2091_v5 = vmul.f32 %v3972_v36, %v2081_v46 }
 0xfc1   :  { %v5223_v25 = vpop.eup %5222  ;;  %2241 = vmatprep.mubr.f32.mxu1 %v5853_v20 }
 0xfc2   :  { %v6640_v17 = vadd.f32 %v3973_v15, %v2091_v5  ;;  %v2082_v6 = vmul.f32 %v5223_v25, %v6625_v29 }
 0xfc4   :  { %2242 = vmatmul.mubr.f32.gmra.mrb[28].mxu1 %v6640_v17  ;;  %4437 = vmatmul.mubr.f32.vlgmr.msra.gmra.mrb[22].mxu0 %v6640_v17  ;;  %v2092_v35 = vmul.f32 %v3972_v36, %v2082_v6 }
 0xfc5   :  { %v5225_v26 = vpop.eup %5224  ;;  %2247 = vmatprep.mubr.f32.mxu1 %v5853_v20 }
 0xfc6   :  { %v6646_v43 = vadd.f32 %v3973_v15, %v2092_v35  ;;  %v2083_v27 = vmul.f32 %v5225_v26, %v6629_v2 }
 0xfc8   :  { %2248 = vmatmul.mubr.f32.gmra.mrb[30].mxu1 %v6646_v43  ;;  %4439 = vmatprep.mubr.f32.mxu0 %v6646_v43  ;;  %v2093_v34 = vmul.f32 %v3972_v36, %v2083_v27 }
 0xfc9   :  { %2253 = vmatprep.mubr.f32.mxu1 %v5853_v20 }
 0xfca   :  { %v6652_v29 = vadd.f32 %v3973_v15, %v2093_v34 }
 0xfcc   :  { %2254 = vmatmul.mubr.f32.gmra.mrb[32].mxu1 %v6652_v29  ;;  %4440 = vmatmul.mubr.f32.gmra.mrb[24].mxu0 %v6652_v29 }
0x1093   :  { %v2237_v22 = vpop.f32.mrb[26].mxu1 }
0x1094   :  { %v6657_v38 = vadd.f32 %v2237_v22, %v2159_v37  ;;  %v2239_v2 = vpop.f32.mrb[27].mxu1 }
0x1095   :  { %v6666_v54 = vadd.f32 %v2239_v2, %v2163_v42 }
0x1096   :  { %4446 = vmatprep.mubr.msk.f32.mxu1 %vm693_vm0, %v6657_v38 }
0x1097   :  { %v2243_v32 = vpop.f32.mrb[28].mxu1  ;;  %v4438_v44 = vpop.f32.mrb[22].mxu0 }
0x1098   :  { %v6664_v49 = vadd.f32 %v4438_v44, %v2167_v21  ;;  %v2245_v40 = vpop.f32.mrb[29].mxu1  ;;  %v2326_v8 = vpop.f32.mrb[23].mxu0  ;;  %v6692_v52 = vadd.f32 %v2243_v32, %v2159_v37 }
0x1099   :  { %v6668_v56 = vadd.f32 %v2245_v40, %v2163_v42  ;;  %v6670_v57 = vadd.f32 %v2326_v8, %v2167_v21 }
0x109b   :  { %v5122_v13 = vpack.i.bf16 %v6668_v56, %v6666_v54  ;;  %v4870_v18 = vpack.c.bf16 %v6668_v56, %v6666_v54  ;;  %v5132_v58 = vpack.i.bf16 %v6664_v49, %v6670_v57  ;;  %v4882_v59 = vpack.c.bf16 %v6664_v49, %v6670_v57  ;;  %v2249_v61 = vpop.f32.mrb[30].mxu1 }
0x109c   :  { %v2251_v62 = vpop.f32.mrb[31].mxu1  ;;  %v2250_v50 = vadd.f32 %v2249_v61, %v2159_v37 }
0x109d   :  { %4872 = vmatprep.subr.msk.bf16.mxu1 %vm6377_vm1, %v4870_v18  ;;  %v6686_v28 = vadd.f32 %v2251_v62, %v2163_v42 }
0x109e   :  { %4875 = vmatpush3.bf16.xpose.msk.msra.mxu1 %vm6377_vm1, %v4870_v18 }
0x109f   :  { %v2255_v53 = vpop.f32.mrb[32].mxu1  ;;  %v4441_v11 = vpop.f32.mrb[24].mxu0 }
0x10a0   :  { %v6684_v23 = vadd.f32 %v4441_v11, %v2167_v21  ;;  %v2257_v63 = vpop.f32.mrb[33].mxu1  ;;  %v2336_v47 = vpop.f32.mrb[25].mxu0  ;;  %v2256_v9 = vadd.f32 %v2255_v53, %v2159_v37 }
0x10a1   :  { %v6688_v16 = vadd.f32 %v2257_v63, %v2163_v42  ;;  %v6690_v30 = vadd.f32 %v2336_v47, %v2167_v21 }
0x10a3   :  { %v5127_v1 = vpack.i.bf16 %v6688_v16, %v6686_v28  ;;  %v4876_v55 = vpack.c.bf16 %v6688_v16, %v6686_v28  ;;  %v5137_v3 = vpack.i.bf16 %v6684_v23, %v6690_v30  ;;  %v6702_v4 = vpack.c.bf16 %v6684_v23, %v6690_v30 }
0x10a5   :  { %4447 = vmatmul.mubr.msk.f32.vlgmr.msra.gmra.mrb[34].mxu1 %vm693_vm0, %v6692_v52  ;;  %4878 = vmatprep.subr.msk.bf16.mxu1 %vm6377_vm1, %v4876_v55 }
0x10a6   :  { %4881 = vmatpush3.bf16.xpose.msk.msra.mxu1 %vm6377_vm1, %v4876_v55  ;;  %4453 = vmatprep.mubr.msk.f32.mxu1 %vm693_vm0, %v2250_v50 }
0x10a7   :  { %4883 = vmatprep.subr.bf16.mxu1 %v4882_v59 }
0x10ad   :  { %4454 = vmatmul.mubr.msk.f32.vlgmr.msra.gmra.mrb[36].mxu1 %vm693_vm0, %v2256_v9 }
0x10ae   :  { %4885 = vmatpush3.bf16.msra.mxu1 %v4882_v59 }
0x10af   :  { %4887 = vmatprep.subr.bf16.mxu1 %v6702_v4 }
0x1178   :  { %v4448_v39 = vpop.f32.mrb[34].mxu1 }
0x1179   :  { %v2520_v10 = vmul.f32 0.125, %v4448_v39  ;;  %v2423_v12 = vpop.f32.mrb[35].mxu1 }
0x117a   :  { %v2519_v14 = vmul.f32 0.125, %v2423_v12 }
0x117b   :  { %v2524_v51 = vadd.f32 %v2520_v10, %v6429_v60 }
0x117c   :  { %v2523_v36 = vadd.f32 %v2519_v14, %v6429_v60 }
0x117d   :  { %v2530_v0 = vsel %vm888_vm2, %v2524_v51, -inf }
0x117e   :  { %2531 = vmax.xlane.f32.xlu1 %v2530_v0  ;;  %v2527_v15 = vsel %vm888_vm2, %v2523_v36, -inf }
0x117f   :  { %2528 = vmax.xlane.f32.xlu0 %v2527_v15 }
0x1180   :  { %v4455_v24 = vpop.f32.mrb[36].mxu1 }
0x1181   :  { %v2522_v41 = vmul.f32 0.125, %v4455_v24  ;;  %v2510_v46 = vpop.f32.mrb[37].mxu1 }
0x1182   :  { %v2521_v5 = vmul.f32 0.125, %v2510_v46 }
0x1183   :  { %v2526_v25 = vadd.f32 %v2522_v41, %v6436_v7 }
0x1184   :  { %v2525_v6 = vadd.f32 %v2521_v5, %v6436_v7 }
0x1185   :  { %v2536_v35 = vsel %vm888_vm2, %v2526_v25, -inf }
0x1186   :  { %2537 = vmax.xlane.f32.xlu1 %v2536_v35  ;;  %v2533_v26 = vsel %vm888_vm2, %v2525_v6, -inf }
0x1187   :  { %2534 = vmax.xlane.f32.xlu0 %v2533_v26 }
0x120b   :  { %v2532_v27 = vpop.xlane.xlu1 %2531 }
0x120c   :  { %v2540_v34 = vsub.f32 %v2524_v51, %v2532_v27  ;;  %v2529_v48 = vpop.xlane.xlu0 %2528 }
0x120d   :  { %v2539_v37 = vsub.f32 %v2523_v36, %v2529_v48 }
0x120e   :  { %v2545_v22 = vmul.f32 1.442695, %v2540_v34 }
0x120f   :  { %v2543_v2 = vmul.f32 1.442695, %v2539_v37 }
0x1210   :  { %5226 = vpow2.f32 %v2545_v22 }
0x1211   :  { %5228 = vpow2.f32 %v2543_v2 }
0x1213   :  { %v2538_v21 = vpop.xlane.xlu1 %2537 }
0x1214   :  { %v2542_v42 = vsub.f32 %v2526_v25, %v2538_v21  ;;  %v2535_v32 = vpop.xlane.xlu0 %2534 }
0x1215   :  { %v2541_v44 = vsub.f32 %v2525_v6, %v2535_v32 }
0x1216   :  { %v2549_v40 = vmul.f32 1.442695, %v2542_v42 }
0x1217   :  { %v2547_v8 = vmul.f32 1.442695, %v2541_v44 }
0x1218   :  { %5230 = vpow2.f32 %v2549_v40 }
0x1219   :  { %5232 = vpow2.f32 %v2547_v8 }
0x121a   :  { %v5227_v18 = vpop.eup %5226 }
0x121b   :  { %v5229_v59 = vpop.eup %5228  ;;  %v2554_v61 = vsel %vm888_vm2, %v5227_v18, 0.0 }
0x121c   :  { %2555 = vadd.xlane.f32.xlu1 %v2554_v61  ;;  %v2551_v62 = vsel %vm888_vm2, %v5229_v59, 0.0 }
0x121d   :  { %2552 = vadd.xlane.f32.xlu0 %v2551_v62 }
0x1222   :  { %v5231_v53 = vpop.eup %5230 }
0x1223   :  { %v5233_v11 = vpop.eup %5232  ;;  %v2560_v63 = vsel %vm888_vm2, %v5231_v53, 0.0 }
0x1224   :  { %2561 = vadd.xlane.f32.xlu1 %v2560_v63  ;;  %v2557_v47 = vsel %vm888_vm2, %v5233_v11, 0.0 }
0x1225   :  { %2558 = vadd.xlane.f32.xlu0 %v2557_v47 }
0x1235   :  { %5128 = vrot.lane.b32.xlu1 %v5127_v1, %s5854_s3 }
0x1239   :  { %2733 = vrot.lane.b32.xlu1 %v6657_v38, %s5854_s3 }
0x123b   :  { %5123 = vrot.lane.b32.xlu0 %v5122_v13, %s5854_s3 }
0x123d   :  { %2735 = vrot.lane.b32.xlu1 %v6692_v52, %s5854_s3 }
0x123f   :  { %2824 = vrot.lane.b32.xlu0 %v2250_v50, %s5854_s3 }
0x1241   :  { %2826 = vrot.lane.b32.xlu1 %v2256_v9, %s5854_s3 }
0x12a9   :  { %v2556_v28 = vpop.xlane.xlu1 %2555 }
0x12aa   :  { %5234 = vrcp.f32 %v2556_v28  ;;  %v2553_v16 = vpop.xlane.xlu0 %2552 }
0x12ab   :  { %5236 = vrcp.f32 %v2553_v16 }
0x12b1   :  { %v2562_v1 = vpop.xlane.xlu1 %2561 }
0x12b2   :  { %5238 = vrcp.f32 %v2562_v1  ;;  %v2559_v55 = vpop.xlane.xlu0 %2558 }
0x12b3   :  { %5240 = vrcp.f32 %v2559_v55 }
0x12b4   :  { %v5235_v38 = vpop.eup %5234 }
0x12b5   :  { %v5237_v39 = vpop.eup %5236  ;;  %v5129_v10 = vpop.permute.xlu1 %5128  ;;  %v2566_v52 = vmul.f32 %v5235_v38, %v5227_v18 }
0x12b6   :  { %v5131_v54 = vunpack.i.h.bf16 %v5129_v10  ;;  %v5130_v56 = vunpack.i.l.bf16 %v5129_v10  ;;  %v5124_v13 = vpop.permute.xlu0 %5123  ;;  %v2564_v12 = vmul.f32 %v5237_v39, %v5229_v59 }
0x12b7   :  { %v5126_v14 = vunpack.i.h.bf16 %v5124_v13  ;;  %v5125_v50 = vunpack.i.l.bf16 %v5124_v13 }
0x12b8   :  { %v4896_v51 = vpack.c.bf16 %v5131_v54, %v5130_v56  ;;  %4460 = vmatprep.mubr.msk.f32.mxu1 %vm888_vm2, %v2564_v12 }
0x12b9   :  { %v4890_v9 = vpack.c.bf16 %v5126_v14, %v5125_v50  ;;  %v2734_v36 = vpop.permute.xlu1 %2733  ;;  %4461 = vmatmul.mubr.msk.f32.vlgmr.msra.gmra.mrb[38].mxu1 %vm888_vm2, %v2566_v52 }
0x12ba   :  { %4889 = vmatpush3.bf16.msra.mxu1 %v6702_v4  ;;  %4474 = vmatprep.mubr.msk.f32.mxu0 %vm693_vm0, %v2734_v36  ;;  %v2825_v46 = vpop.permute.xlu0 %2824 }
0x12bb   :  { %4898 = vmatprep.subr.msk.bf16.mxu1 %vm6377_vm1, %v4896_v51  ;;  %4892 = vmatprep.subr.msk.bf16.mxu0 %vm6377_vm1, %v4890_v9 }
0x12bc   :  { %v5239_v0 = vpop.eup %5238  ;;  %4895 = vmatpush3.bf16.xpose.msk.msra.mxu0 %vm6377_vm1, %v4890_v9 }
0x12bd   :  { %v5241_v15 = vpop.eup %5240  ;;  %v2570_v41 = vmul.f32 %v5239_v0, %v5231_v53  ;;  %v2736_v4 = vpop.permute.xlu1 %2735 }
0x12be   :  { %v2568_v24 = vmul.f32 %v5241_v15, %v5233_v11 }
0x12c0   :  { %4467 = vmatprep.mubr.msk.f32.mxu1 %vm888_vm2, %v2568_v24 }
0x12c1   :  { %4468 = vmatmul.mubr.msk.f32.vlgmr.msra.gmra.mrb[40].mxu1 %vm888_vm2, %v2570_v41  ;;  %v2827_v5 = vpop.permute.xlu1 %2826 }
0x12c2   :  { %4481 = vmatprep.mubr.msk.f32.mxu1 %vm693_vm0, %v2825_v46 }
0x12c3   :  { %4901 = vmatpush3.bf16.xpose.msk.msra.mxu1 %vm6377_vm1, %v4896_v51  ;;  %4475 = vmatmul.mubr.msk.f32.vlgmr.msra.gmra.mrb[26].mxu0 %vm693_vm0, %v2736_v4 }
0x12ca   :  { %4482 = vmatmul.mubr.msk.f32.vlgmr.msra.gmra.mrb[42].mxu1 %vm693_vm0, %v2827_v5 }
0x138c   :  { %v6753_v25 = vpop.f32.mrb[38].mxu1 }
0x138d   :  { %v6755_v6 = vpop.f32.mrb[39].mxu1 }
0x1394   :  { %v6757_v35 = vpop.f32.mrb[40].mxu1 }
0x1395   :  { %v6759_v26 = vpop.f32.mrb[41].mxu1 }
0x1396   :  { %v4476_v27 = vpop.f32.mrb[26].mxu0 }
0x1397   :  { %v2916_v34 = vmul.f32 0.125, %v4476_v27  ;;  %v2815_v48 = vpop.f32.mrb[27].mxu0 }
0x1398   :  { %v2915_v37 = vmul.f32 0.125, %v2815_v48 }
0x1399   :  { %v2920_v31 = vadd.f32 %v2916_v34, %v6429_v60 }
0x139a   :  { %v2919_v22 = vadd.f32 %v2915_v37, %v6429_v60  ;;  %v3166_v37 = vld [vmem:[#allocation16 + $0x80] sm:$0xff] }
0x139b   :  { %v2926_v2 = vsel %vm888_vm2, %v2920_v31, -inf }
0x139c   :  { %2927 = vmax.xlane.f32.xlu1 %v2926_v2  ;;  %v2923_v21 = vsel %vm888_vm2, %v2919_v22, -inf }
0x139d   :  { %v4483_v42 = vpop.f32.mrb[42].mxu1  ;;  %2924 = vmax.xlane.f32.xlu0 %v2923_v21  ;;  %v3169_v21 = vld [vmem:[#allocation16 + $0x98] sm:$0xff] }
0x139e   :  { %v2906_v32 = vpop.f32.mrb[43].mxu1  ;;  %v2918_v44 = vmul.f32 0.125, %v4483_v42 }
0x139f   :  { %v2917_v40 = vmul.f32 0.125, %v2906_v32  ;;  %v3170_v32 = vld [vmem:[#allocation16 + $0xa0] sm:$0xff] }
0x13a0   :  { %v2922_v59 = vadd.f32 %v2918_v44, %v6436_v7  ;;  %v3171_v44 = vld [vmem:[#allocation16 + $0xa8] sm:$0xff] }
0x13a1   :  { %v2921_v8 = vadd.f32 %v2917_v40, %v6436_v7  ;;  %v4918_v40 = vpack.c.bf16 %v3171_v44, %v3170_v32 }
0x13a2   :  { %v2932_v61 = vsel %vm888_vm2, %v2922_v59, -inf }
0x13a3   :  { %v2929_v18 = vsel %vm888_vm2, %v2921_v8, -inf }
0x13a4   :  { %2930 = vmax.xlane.f32.xlu0 %v2929_v18  ;;  %v3173_v18 = vld [vmem:[#allocation16 + $0xb8] sm:$0xff] }
0x13a8   :  { %2933 = vmax.xlane.f32.xlu0 %v2932_v61  ;;  %v3174_v61 = vld [vmem:[#allocation16 + $0xc0] sm:$0xff] }
0x1429   :  { %v2928_v60 = vpop.xlane.xlu1 %2927 }
0x142a   :  { %v2936_v62 = vsub.f32 %v2920_v31, %v2928_v60  ;;  %v2925_v53 = vpop.xlane.xlu0 %2924  ;;  %v3167_v31 = vld [vmem:[#allocation16 + $0x88] sm:$0xff] }
0x142b   :  { %v2935_v11 = vsub.f32 %v2919_v22, %v2925_v53  ;;  %v3168_v22 = vld [vmem:[#allocation16 + $0x90] sm:$0xff]  ;;  %v4910_v2 = vpack.c.bf16 %v3167_v31, %v3166_v37  ;;  %v3175_v60 = vld [vmem:[#allocation16 + $0xc8] sm:$0xff]  ;;  %v3355_v31 = vld [vmem:[#allocation22 + $0x138] sm:$0xff] }
0x142c   :  { %v2941_v63 = vmul.f32 1.442695, %v2936_v62  ;;  %v4914_v42 = vpack.c.bf16 %v3169_v21, %v3168_v22  ;;  %v4926_v62 = vpack.c.bf16 %v3175_v60, %v3174_v61  ;;  %v3176_v53 = vld [vmem:[#allocation16 + $0xd0] sm:$0xff] }
0x142d   :  { %v2939_v47 = vmul.f32 1.442695, %v2935_v11  ;;  %v3177_v11 = vld [vmem:[#allocation16 + $0xd8] sm:$0xff]  ;;  %v3353_v37 = vld [vmem:[#allocation22 + $0x128] sm:$0xff] }
0x142e   :  { %5242 = vpow2.f32 %v2941_v63  ;;  %v4930_v63 = vpack.c.bf16 %v3177_v11, %v3176_v53  ;;  %v3357_v21 = vld [vmem:[#allocation22 + $0x148] sm:$0xff] }
0x142f   :  { %5244 = vpow2.f32 %v2939_v47  ;;  %v3178_v47 = vld [vmem:[#allocation16 + $0xe0] sm:$0xff] }
0x1431   :  { %v2931_v28 = vpop.xlane.xlu0 %2930 }
0x1432   :  { %v2937_v16 = vsub.f32 %v2921_v8, %v2931_v28  ;;  %v3172_v8 = vld [vmem:[#allocation16 + $0xb0] sm:$0xff]  ;;  %v3179_v28 = vld [vmem:[#allocation16 + $0xe8] sm:$0xff] }
0x1434   :  { %v2943_v1 = vmul.f32 1.442695, %v2937_v16  ;;  %v4934_v16 = vpack.c.bf16 %v3179_v28, %v3178_v47 }
0x1435   :  { %v2934_v55 = vpop.xlane.xlu0 %2933 }
0x1436   :  { %5246 = vpow2.f32 %v2943_v1  ;;  %v2938_v38 = vsub.f32 %v2922_v59, %v2934_v55  ;;  %v4922_v59 = vpack.c.bf16 %v3173_v18, %v3172_v8  ;;  %v3180_v1 = vld [vmem:[#allocation16 + $0xf0] sm:$0xff]  ;;  %v3181_v55 = vld [vmem:[#allocation16 + $0xf8] sm:$0xff] }
0x1438   :  { %v5243_v39 = vpop.eup %5242  ;;  %v2945_v7 = vmul.f32 1.442695, %v2938_v38  ;;  %v4938_v38 = vpack.c.bf16 %v3181_v55, %v3180_v1 }
0x1439   :  { %v5245_v10 = vpop.eup %5244  ;;  %v2950_v54 = vsel %vm888_vm2, %v5243_v39, 0.0 }
0x143a   :  { %5248 = vpow2.f32 %v2945_v7  ;;  %2951 = vadd.xlane.f32.xlu1 %v2950_v54  ;;  %v2947_v56 = vsel %vm888_vm2, %v5245_v10, 0.0 }
0x143b   :  { %2948 = vadd.xlane.f32.xlu0 %v2947_v56 }
0x1440   :  { %v5247_v13 = vpop.eup %5246 }
0x1441   :  { %v2953_v12 = vsel %vm888_vm2, %v5247_v13, 0.0 }
0x1442   :  { %2954 = vadd.xlane.f32.xlu0 %v2953_v12 }
0x1444   :  { %v5249_v52 = vpop.eup %5248 }
0x1445   :  { %v2956_v14 = vsel %vm888_vm2, %v5249_v52, 0.0 }
0x1446   :  { %2957 = vadd.xlane.f32.xlu1 %v2956_v14 }
0x1457   :  { %5138 = vrot.lane.b32.xlu1 %v5137_v3, %s5854_s3 }
0x1458   :  { %5133 = vrot.lane.b32.xlu0 %v5132_v58, %s5854_s3 }
0x14c7   :  { %v2952_v51 = vpop.xlane.xlu1 %2951 }
0x14c8   :  { %v2949_v50 = vpop.xlane.xlu0 %2948 }
0x14c9   :  { %5250 = vrcp.f32 %v2949_v50 }
0x14ca   :  { %5252 = vrcp.f32 %v2952_v51 }
0x14cf   :  { %v2955_v9 = vpop.xlane.xlu0 %2954 }
0x14d0   :  { %5254 = vrcp.f32 %v2955_v9 }
0x14d3   :  { %v5251_v36 = vpop.eup %5250  ;;  %v2958_v0 = vpop.xlane.xlu1 %2957 }
0x14d4   :  { %v5134_v15 = vpop.permute.xlu0 %5133  ;;  %5256 = vrcp.f32 %v2958_v0  ;;  %v2960_v46 = vmul.f32 %v5251_v36, %v5245_v10  ;;  %v5253_v30 = vpop.eup %5252 }
0x14d5   :  { %v5136_v24 = vunpack.i.h.bf16 %v5134_v15  ;;  %v5135_v41 = vunpack.i.l.bf16 %v5134_v15  ;;  %v2962_v4 = vmul.f32 %v5253_v30, %v5243_v39 }
0x14d6   :  { %4488 = vmatprep.mubr.msk.f32.mxu0 %vm888_vm2, %v2960_v46 }
0x14d7   :  { %v4902_v23 = vpack.c.bf16 %v5136_v24, %v5135_v41  ;;  %v5139_v3 = vpop.permute.xlu1 %5138  ;;  %v3998_v41 = vld [vmem:[#allocation17 + $0x1] ss:$0 sm:$0xff] }
0x14d8   :  { %v5141_v49 = vunpack.i.h.bf16 %v5139_v3  ;;  %v5140_v57 = vunpack.i.l.bf16 %v5139_v3 }
0x14d9   :  { %4903 = vmatprep.subr.bf16.mxu0 %v4902_v23 }
0x14da   :  { %4905 = vmatpush3.bf16.msra.mxu0 %v4902_v23  ;;  %v5255_v58 = vpop.eup %5254  ;;  %v4906_v5 = vpack.c.bf16 %v5141_v49, %v5140_v57 }
0x14db   :  { %v2964_v27 = vmul.f32 %v5255_v58, %v5247_v13  ;;  %4911 = vmatprep.subr.bf16.mxu0 %v4910_v2 }
0x14dc   :  { %4907 = vmatprep.subr.bf16.mxu1 %v4906_v5 }
0x14dd   :  { %4489 = vmatmul.mubr.msk.f32.vlgmr.msra.gmra.mrb[28].mxu0 %vm888_vm2, %v2962_v4  ;;  %4909 = vmatpush3.bf16.msra.mxu1 %v4906_v5  ;;  %v3351_v5 = vld [vmem:[#allocation22 + $0x118] sm:$0xff] }
0x14de   :  { %4495 = vmatprep.mubr.msk.f32.mxu1 %vm888_vm2, %v2964_v27  ;;  %v5257_v34 = vpop.eup %5256  ;;  %4913 = vmatpush3.bf16.msra.mxu0 %v4910_v2  ;;  %v3348_v27 = vld [vmem:[#allocation22 + $0x100] sm:$0xff] }
0x14df   :  { %v2966_v48 = vmul.f32 %v5257_v34, %v5249_v52  ;;  %4915 = vmatprep.subr.bf16.mxu0 %v4914_v42  ;;  %v3352_v2 = vld [vmem:[#allocation22 + $0x120] sm:$0xff] }
0x14e1   :  { %4496 = vmatmul.mubr.msk.f32.vlgmr.msra.gmra.mrb[44].mxu1 %vm888_vm2, %v2966_v48  ;;  %v3350_v48 = vld [vmem:[#allocation22 + $0x110] sm:$0xff] }
0x14e2   :  { %3457 = vmatprep.mubr.f32.mxu1 %v5853_v20  ;;  %4917 = vmatpush3.bf16.msra.mxu0 %v4914_v42  ;;  %v4944_v22 = vpack.c.bf16 %v3350_v48, %v3348_v27  ;;  %v3359_v42 = vld [vmem:[#allocation22 + $0x158] sm:$0xff] }
0x14e3   :  { %4919 = vmatprep.subr.bf16.mxu0 %v4918_v40  ;;  %v4950_v44 = vpack.c.bf16 %v3359_v42, %v3357_v21  ;;  %v6818_v42 = vld [vmem:[#allocation20 + $0x1] ss:$0 sm:$0xff] }
0x14e6   :  { %4921 = vmatpush3.bf16.msra.mxu0 %v4918_v40  ;;  %v3358_v40 = vld [vmem:[#allocation22 + $0x150] sm:$0xff] }
0x14e7   :  { %4923 = vmatprep.subr.bf16.mxu0 %v4922_v59 }
0x14ea   :  { %4925 = vmatpush3.bf16.msra.mxu0 %v4922_v59 }
0x14eb   :  { %4927 = vmatprep.subr.bf16.mxu0 %v4926_v62 }
0x14ee   :  { %4929 = vmatpush3.bf16.msra.mxu0 %v4926_v62 }
0x14ef   :  { %4931 = vmatprep.subr.bf16.mxu0 %v4930_v63 }
0x14f2   :  { %4933 = vmatpush3.bf16.msra.mxu0 %v4930_v63 }
0x14f3   :  { %4935 = vmatprep.subr.bf16.mxu0 %v4934_v16 }
0x14f6   :  { %4937 = vmatpush3.bf16.msra.mxu0 %v4934_v16 }
0x14f7   :  { %4939 = vmatprep.subr.bf16.mxu0 %v4938_v38 }
0x14fa   :  { %4941 = vmatpush3.bf16.msra.mxu0 %v4938_v38  ;;  %v3361_v38 = vld [vmem:[#allocation22 + $0x168] sm:$0xff] }
0x15b0   :  { %v4490_v39 = vpop.f32.mrb[28].mxu0 }
0x15b1   :  { %v3047_v7 = vpop.f32.mrb[29].mxu0 }
0x15b2   :  { %v5142_v10 = vpack.i.bf16 %v4490_v39, %v3047_v7  ;;  %v3363_v39 = vld [vmem:[#allocation22 + $0x178] sm:$0xff] }
0x15b3   :  { %v4954_v7 = vpack.c.bf16 %v3363_v39, %v3361_v38  ;;  %v3574_v38 = vld [vmem:[#allocation25 + $0x198] sm:$0xff] }
0x15b4   :  { %5143 = vrot.lane.b32.xlu1 %v5142_v10, %s5854_s3  ;;  %v4497_v54 = vpop.f32.mrb[44].mxu1  ;;  %v3360_v10 = vld [vmem:[#allocation22 + $0x160] sm:$0xff] }
0x15b5   :  { %v3136_v56 = vpop.f32.mrb[45].mxu1 }
0x15b6   :  { %v5147_v13 = vpack.i.bf16 %v4497_v54, %v3136_v56  ;;  %v3362_v54 = vld [vmem:[#allocation22 + $0x170] sm:$0xff] }
0x15b7   :  { %v4956_v56 = vpack.c.bf16 %v3362_v54, %v3360_v10  ;;  %v3558_v10 = vld [vmem:[#allocation25 + $0x118] sm:$0xff] }
0x15b8   :  { %5148 = vrot.lane.b32.xlu1 %v5147_v13, %s5854_s3  ;;  %v3365_v13 = vld [vmem:[#allocation22 + $0x188] sm:$0xff] }
0x1626   :  { %v5144_v12 = vpop.permute.xlu1 %5143 }
0x1627   :  { %v5146_v52 = vunpack.i.h.bf16 %v5144_v12  ;;  %v5145_v14 = vunpack.i.l.bf16 %v5144_v12  ;;  %v3367_v12 = vld [vmem:[#allocation22 + $0x198] sm:$0xff] }
0x1629   :  { %v3161_v50 = vsel %vm693_vm0, %v6755_v6, %v5145_v14  ;;  %v3162_v51 = vsel %vm693_vm0, %v6753_v25, %v5146_v52  ;;  %v4958_v52 = vpack.c.bf16 %v3367_v12, %v3365_v13  ;;  %v3364_v14 = vld [vmem:[#allocation22 + $0x180] sm:$0xff]  ;;  %v3576_v13 = vld [vmem:[#allocation25 + $0x1a8] sm:$0xff] }
0x162a   :  { %4530 = vmatprep.mubr.f32.mxu0 %v3161_v50  ;;  %v5149_v9 = vpop.permute.xlu1 %5148  ;;  %v3366_v50 = vld [vmem:[#allocation22 + $0x190] sm:$0xff] }
0x162b   :  { %4531 = vmatmul.mubr.f32.vlgmr.msra.gmra.mrb[30].mxu0 %v3162_v51  ;;  %v5151_v36 = vunpack.i.h.bf16 %v5149_v9  ;;  %v5150_v0 = vunpack.i.l.bf16 %v5149_v9  ;;  %v4960_v51 = vpack.c.bf16 %v3366_v50, %v3364_v14  ;;  %v3371_v9 = vld [vmem:[#allocation22 + $0x1b8] sm:$0xff]  ;;  %v3560_v14 = vld [vmem:[#allocation25 + $0x128] sm:$0xff] }
0x162d   :  { %v3163_v15 = vsel %vm693_vm0, %v6759_v26, %v5150_v0  ;;  %v3164_v24 = vsel %vm693_vm0, %v6757_v35, %v5151_v36  ;;  %v3349_v35 = vld [vmem:[#allocation22 + $0x108] sm:$0xff]  ;;  %v3368_v0 = vld [vmem:[#allocation22 + $0x1a0] sm:$0xff] }
0x162e   :  { %4533 = vmatprep.mubr.f32.mxu0 %v3163_v15  ;;  %v4942_v34 = vpack.c.bf16 %v3351_v5, %v3349_v35  ;;  %v3370_v15 = vld [vmem:[#allocation22 + $0x1b0] sm:$0xff] }
0x162f   :  { %4534 = vmatmul.mubr.f32.gmra.mrb[32].mxu0 %v3164_v24  ;;  %v4964_v24 = vpack.c.bf16 %v3370_v15, %v3368_v0  ;;  %v3562_v0 = vld [vmem:[#allocation25 + $0x138] sm:$0xff] }
0x1630   :  { %4943 = vmatprep.subr.bf16.mxu1 %v4942_v34 }
0x1631   :  { %4945 = vmatpush1.bf16.msra.mxu1 %v4944_v22 }
0x16fe   :  { %v4532_v46 = vpop.f32.mrb[30].mxu0 }
0x16ff   :  { %v3262_v23 = vadd.f32 %v4532_v46, %v3998_v41  ;;  %v3256_v6 = vpop.f32.mrb[31].mxu0  ;;  %v3375_v46 = vld [vmem:[#allocation22 + $0x1d8] sm:$0xff] }
0x1700   :  { %v3257_v30 = vadd.f32 %v3998_v41, %v3256_v6 }
0x1701   :  { %v3276_v25 = vadd.f32 %v3262_v23, %v6640_v17  ;;  %v4946_v17 = vpack.c.bf16 %v3355_v31, %v3353_v37  ;;  %v3372_v23 = vld [vmem:[#allocation22 + $0x1c0] sm:$0xff] }
0x1702   :  { %v3275_v3 = vadd.f32 %v3257_v30, %v6634_v45  ;;  %v4535_v49 = vpop.f32.mrb[32].mxu0  ;;  %v3354_v45 = vld [vmem:[#allocation22 + $0x130] sm:$0xff] }
0x1703   :  { %3285 = vadd.xlane.f32.xlu1 %v3276_v25  ;;  %v3272_v57 = vadd.f32 %v4535_v49, %v3998_v41  ;;  %v3266_v58 = vpop.f32.mrb[33].mxu0  ;;  %v4948_v32 = vpack.c.bf16 %v3354_v45, %v3352_v2  ;;  %4947 = vmatprep.subr.bf16.mxu1 %v4946_v17  ;;  %v3374_v30 = vld [vmem:[#allocation22 + $0x1d0] sm:$0xff]  ;;  %v6815_v45 = vld [vmem:[#allocation19 + $0x1] ss:$0 sm:$0xff] }
0x1704   :  { %3283 = vadd.xlane.f32.xlu0 %v3275_v3  ;;  %v3267_v26 = vadd.f32 %v3998_v41, %v3266_v58  ;;  %v3373_v41 = vld [vmem:[#allocation22 + $0x1c8] sm:$0xff]  ;;  %v4968_v49 = vpack.c.bf16 %v3374_v30, %v3372_v23  ;;  %v3376_v58 = vld [vmem:[#allocation22 + $0x1e0] sm:$0xff] }
0x1705   :  { %4949 = vmatpush1.bf16.msra.mxu1 %v4948_v32  ;;  %v6812_v55 = vadd.f32 %v3272_v57, %v6652_v29  ;;  %v3369_v29 = vld [vmem:[#allocation22 + $0x1a8] sm:$0xff]  ;;  %v4966_v6 = vpack.c.bf16 %v3375_v46, %v3373_v41 }
0x1706   :  { %v3277_v4 = vadd.f32 %v3267_v26, %v6646_v43  ;;  %v3356_v43 = vld [vmem:[#allocation22 + $0x140] sm:$0xff]  ;;  %4951 = vmatprep.subr.bf16.mxu1 %v4950_v44  ;;  %v4962_v36 = vpack.c.bf16 %v3371_v9, %v3369_v29  ;;  %v3378_v26 = vld [vmem:[#allocation22 + $0x1f0] sm:$0xff] }
0x1707   :  { %v4952_v8 = vpack.c.bf16 %v3358_v40, %v3356_v43  ;;  %v3578_v29 = vld [vmem:[#allocation25 + $0x1b8] sm:$0xff]  ;;  %v3580_v41 = vld [vmem:[#allocation25 + $0x1c8] sm:$0xff]  ;;  %v3563_v23 = vld [vmem:[#allocation25 + $0x140] sm:$0xff] }
0x1708   :  { %3287 = vadd.xlane.f32.xlu0 %v3277_v4 }
0x1709   :  { %4953 = vmatpush1.bf16.msra.mxu1 %v4952_v8 }
0x170a   :  { %4955 = vmatprep.subr.bf16.mxu1 %v4954_v7  ;;  %v3557_v7 = vld [vmem:[#allocation25 + $0x110] sm:$0xff] }
0x170b   :  { %v4980_v54 = vpack.c.bf16 %v3558_v10, %v3557_v7 }
0x170d   :  { %4957 = vmatpush1.bf16.msra.mxu1 %v4956_v56  ;;  %v3575_v56 = vld [vmem:[#allocation25 + $0x1a0] sm:$0xff] }
0x170e   :  { %4959 = vmatprep.subr.bf16.mxu1 %v4958_v52  ;;  %v4982_v12 = vpack.c.bf16 %v3576_v13, %v3575_v56  ;;  %v3559_v52 = vld [vmem:[#allocation25 + $0x120] sm:$0xff] }
0x170f   :  { %v4984_v50 = vpack.c.bf16 %v3560_v14, %v3559_v52 }
0x1711   :  { %4961 = vmatpush1.bf16.msra.mxu1 %v4960_v51  ;;  %v3577_v51 = vld [vmem:[#allocation25 + $0x1b0] sm:$0xff] }
0x1712   :  { %4963 = vmatprep.subr.bf16.mxu1 %v4962_v36  ;;  %v4986_v9 = vpack.c.bf16 %v3578_v29, %v3577_v51  ;;  %v3561_v36 = vld [vmem:[#allocation25 + $0x130] sm:$0xff] }
0x1713   :  { %v4988_v15 = vpack.c.bf16 %v3562_v0, %v3561_v36 }
0x1715   :  { %4965 = vmatpush1.bf16.msra.mxu1 %v4964_v24  ;;  %v3579_v24 = vld [vmem:[#allocation25 + $0x1c0] sm:$0xff] }
0x1716   :  { %4967 = vmatprep.subr.bf16.mxu1 %v4966_v6  ;;  %v4990_v46 = vpack.c.bf16 %v3580_v41, %v3579_v24  ;;  %v3564_v6 = vld [vmem:[#allocation25 + $0x148] sm:$0xff] }
0x1717   :  { %v4992_v30 = vpack.c.bf16 %v3564_v6, %v3563_v23 }
0x1719   :  { %4969 = vmatpush1.bf16.msra.mxu1 %v4968_v49 }
0x1790   :  { %v3286_v18 = vpop.xlane.xlu1 %3285 }
0x1791   :  { %v3284_v59 = vpop.xlane.xlu0 %3283  ;;  %v3292_v61 = vmul.f32 0.0078125, %v3286_v18 }
0x1792   :  { %v3291_v60 = vmul.f32 0.0078125, %v3284_v59 }
0x1793   :  { %v6801_v53 = vsub.f32 %v3276_v25, %v3292_v61  ;;  %v3377_v25 = vld [vmem:[#allocation22 + $0x1e8] sm:$0xff] }
0x1794   :  { %v6799_v62 = vsub.f32 %v3275_v3, %v3291_v60  ;;  %v3379_v3 = vld [vmem:[#allocation22 + $0x1f8] sm:$0xff] }
0x1795   :  { %v3288_v11 = vpop.xlane.xlu0 %3287  ;;  %v3300_v16 = vmul.f32 %v6801_v53, %v6801_v53  ;;  %v4970_v57 = vpack.c.bf16 %v3379_v3, %v3377_v25  ;;  %v3581_v25 = vld [vmem:[#allocation25 + $0x1d0] sm:$0xff]  ;;  %v3582_v3 = vld [vmem:[#allocation25 + $0x1d8] sm:$0xff] }
0x1796   :  { %v3299_v63 = vmul.f32 %v6799_v62, %v6799_v62  ;;  %v3293_v47 = vmul.f32 0.0078125, %v3288_v11  ;;  %v3572_v11 = vld [vmem:[#allocation25 + $0x188] sm:$0xff]  ;;  %v4994_v49 = vpack.c.bf16 %v3582_v3, %v3581_v25 }
0x1797   :  { %4971 = vmatprep.subr.bf16.mxu1 %v4970_v57  ;;  %v3565_v57 = vld [vmem:[#allocation25 + $0x150] sm:$0xff] }
0x1798   :  { %3303 = vadd.xlane.f32.xlu0 %v3299_v63  ;;  %v6805_v28 = vsub.f32 %v3277_v4, %v3293_v47  ;;  %v4972_v4 = vpack.c.bf16 %v3378_v26, %v3376_v58  ;;  %v3555_v47 = vld [vmem:[#allocation25 + $0x100] sm:$0xff]  ;;  %v3566_v58 = vld [vmem:[#allocation25 + $0x158] sm:$0xff] }
0x1799   :  { %v4996_v26 = vpack.c.bf16 %v3566_v58, %v3565_v57 }
0x179a   :  { %v3301_v1 = vmul.f32 %v6805_v28, %v6805_v28  ;;  %4973 = vmatpush1.bf16.msra.mxu1 %v4972_v4  ;;  %v3583_v4 = vld [vmem:[#allocation25 + $0x1e0] sm:$0xff] }
0x179c   :  { %3305 = vadd.xlane.f32.xlu0 %v3300_v16  ;;  %3307 = vadd.xlane.f32.xlu1 %v3301_v1  ;;  %v3573_v1 = vld [vmem:[#allocation25 + $0x190] sm:$0xff] }
0x179d   :  { %v4978_v39 = vpack.c.bf16 %v3574_v38, %v3573_v1 }
0x17a0   :  { %3289 = vadd.xlane.f32.xlu0 %v6812_v55 }
0x1825   :  { %v3304_v35 = vpop.xlane.xlu0 %3303 }
0x1826   :  { %v3311_v5 = vmul.f32 0.0078125, %v3304_v35  ;;  %v3584_v35 = vld [vmem:[#allocation25 + $0x1e8] sm:$0xff] }
0x1828   :  { %v3315_v27 = vadd.f32 1e-12, %v3311_v5  ;;  %v4998_v5 = vpack.c.bf16 %v3584_v35, %v3583_v4 }
0x1829   :  { %v3306_v34 = vpop.xlane.xlu0 %3305  ;;  %v3308_v37 = vpop.xlane.xlu1 %3307 }
0x182a   :  { %5258 = vrsqrt.f32 %v3315_v27  ;;  %v3312_v48 = vmul.f32 0.0078125, %v3306_v34  ;;  %v3313_v31 = vmul.f32 0.0078125, %v3308_v37  ;;  %v3567_v27 = vld [vmem:[#allocation25 + $0x160] sm:$0xff]  ;;  %v3568_v34 = vld [vmem:[#allocation25 + $0x168] sm:$0xff]  ;;  %v3585_v37 = vld [vmem:[#allocation25 + $0x1f0] sm:$0xff] }
0x182c   :  { %v3316_v22 = vadd.f32 1e-12, %v3312_v48  ;;  %v3317_v17 = vadd.f32 1e-12, %v3313_v31  ;;  %v5000_v48 = vpack.c.bf16 %v3568_v34, %v3567_v27  ;;  %v3586_v31 = vld [vmem:[#allocation25 + $0x1f8] sm:$0xff] }
0x182e   :  { %5260 = vrsqrt.f32 %v3316_v22  ;;  %v5002_v22 = vpack.c.bf16 %v3586_v31, %v3585_v37 }
0x182f   :  { %5262 = vrsqrt.f32 %v3317_v17  ;;  %v3569_v17 = vld [vmem:[#allocation25 + $0x170] sm:$0xff] }
0x1834   :  { %v5259_v2 = vpop.eup %5258 }
0x1835   :  { %v3323_v21 = vmul.f32 %v5259_v2, %v6799_v62  ;;  %v3570_v2 = vld [vmem:[#allocation25 + $0x178] sm:$0xff] }
0x1837   :  { %v3333_v32 = vmul.f32 %v6815_v45, %v3323_v21  ;;  %v5004_v21 = vpack.c.bf16 %v3570_v2, %v3569_v17 }
0x1838   :  { %v5261_v44 = vpop.eup %5260 }
0x1839   :  { %v5263_v43 = vpop.eup %5262  ;;  %v6822_v40 = vadd.f32 %v6818_v42, %v3333_v32  ;;  %v3324_v8 = vmul.f32 %v5261_v44, %v6801_v53  ;;  %v3571_v53 = vld [vmem:[#allocation25 + $0x180] sm:$0xff]  ;;  %v3381_v32 = vld [vmem:[#allocation23 + $0x2] sm:$0x3] }
0x183a   :  { %v3325_v18 = vmul.f32 %v5263_v43, %v6805_v28  ;;  %v4974_v63 = vpack.c.bf16 %v3572_v11, %v3571_v53  ;;  %v3556_v28 = vld [vmem:[#allocation25 + $0x108] sm:$0xff]  ;;  %v6838_v44 = vrot.slane %v3381_v32, %v6353_v33  ;;  %v6841_v43 = vrot.slane %v3381_v32, %v6362_v19 }
0x183b   :  { %3458 = vmatmul.mubr.f32.vlgmr.msra.gmra.mrb[46].mxu1 %v6822_v40  ;;  %v3334_v59 = vmul.f32 %v6815_v45, %v3324_v8  ;;  %v4976_v16 = vpack.c.bf16 %v3556_v28, %v3555_v47 }
0x183c   :  { %3463 = vmatprep.mubr.f32.mxu1 %v5853_v20  ;;  %v3335_v60 = vmul.f32 %v6815_v45, %v3325_v18  ;;  %4975 = vmatprep.subr.bf16.mxu0 %v4974_v63 }
0x183d   :  { %v3344_v61 = vadd.f32 %v6818_v42, %v3334_v59  ;;  %4977 = vmatpush3.bf16.msra.mxu0 %v4976_v16 }
0x183e   :  { %v6833_v62 = vadd.f32 %v6818_v42, %v3335_v60  ;;  %4979 = vmatprep.subr.bf16.mxu0 %v4978_v39 }
0x183f   :  { %3464 = vmatmul.mubr.f32.gmra.mrb[48].mxu1 %v3344_v61 }
0x1840   :  { %3469 = vmatprep.mubr.f32.mxu1 %v5853_v20 }
0x1841   :  { %4981 = vmatpush3.bf16.msra.mxu0 %v4980_v54 }
0x1842   :  { %4983 = vmatprep.subr.bf16.mxu0 %v4982_v12 }
0x1843   :  { %3470 = vmatmul.mubr.f32.gmra.mrb[50].mxu1 %v6833_v62 }
0x1844   :  { %3475 = vmatprep.mubr.f32.mxu1 %v5853_v20 }
0x1845   :  { %4985 = vmatpush3.bf16.msra.mxu0 %v4984_v50 }
0x1846   :  { %4987 = vmatprep.subr.bf16.mxu0 %v4986_v9 }
0x1849   :  { %4989 = vmatpush3.bf16.msra.mxu0 %v4988_v15 }
0x184a   :  { %4991 = vmatprep.subr.bf16.mxu0 %v4990_v46 }
0x184d   :  { %4993 = vmatpush3.bf16.msra.mxu0 %v4992_v30 }
0x184e   :  { %4995 = vmatprep.subr.bf16.mxu0 %v4994_v49 }
0x1851   :  { %4997 = vmatpush3.bf16.msra.mxu0 %v4996_v26 }
0x1852   :  { %4999 = vmatprep.subr.bf16.mxu0 %v4998_v5 }
0x1855   :  { %5001 = vmatpush3.bf16.msra.mxu0 %v5000_v48 }
0x1856   :  { %5003 = vmatprep.subr.bf16.mxu0 %v5002_v22 }
0x1859   :  { %5005 = vmatpush3.bf16.msra.mxu0 %v5004_v21 }
0x190e   :  { %v3459_v8 = vpop.f32.mrb[46].mxu1 }
0x190f   :  { %v3460_v18 = vadd.f32 %v3459_v8, %v6838_v44  ;;  %v3461_v59 = vpop.f32.mrb[47].mxu1 }
0x1910   :  { %v3462_v61 = vadd.f32 %v3461_v59, %v6841_v43 }
0x1911   :  { %v3482_v60 = vmul.f32 %v3460_v18, %v3460_v18 }
0x1912   :  { %v3483_v53 = vmul.f32 %v3462_v61, %v3462_v61  ;;  %v3465_v11 = vpop.f32.mrb[48].mxu1 }
0x1913   :  { %v3490_v63 = vmul.f32 %v3482_v60, %v3460_v18  ;;  %v3466_v47 = vadd.f32 %v3465_v11, %v6838_v44  ;;  %v3467_v28 = vpop.f32.mrb[49].mxu1 }
0x1914   :  { %v3491_v16 = vmul.f32 %v3483_v53, %v3462_v61  ;;  %v3468_v33 = vadd.f32 %v3467_v28, %v6841_v43 }
0x1915   :  { %v3498_v1 = vmul.f32 0.044715, %v3490_v63  ;;  %v3484_v38 = vmul.f32 %v3466_v47, %v3466_v47 }
0x1916   :  { %v3499_v19 = vmul.f32 0.044715, %v3491_v16  ;;  %v3485_v39 = vmul.f32 %v3468_v33, %v3468_v33  ;;  %v3471_v7 = vpop.f32.mrb[50].mxu1 }
0x1917   :  { %v3506_v10 = vadd.f32 %v3498_v1, %v3460_v18  ;;  %v3492_v54 = vmul.f32 %v3484_v38, %v3466_v47  ;;  %v3472_v56 = vadd.f32 %v3471_v7, %v6838_v44  ;;  %v3473_v13 = vpop.f32.mrb[51].mxu1 }
0x1918   :  { %v3507_v12 = vadd.f32 %v3499_v19, %v3462_v61  ;;  %v3493_v52 = vmul.f32 %v3485_v39, %v3468_v33  ;;  %v3474_v14 = vadd.f32 %v3473_v13, %v6841_v43 }
0x1919   :  { %v3514_v50 = vmul.f32 0.7978846, %v3506_v10  ;;  %v3500_v51 = vmul.f32 0.044715, %v3492_v54  ;;  %v3486_v29 = vmul.f32 %v3472_v56, %v3472_v56 }
0x191a   :  { %v3515_v9 = vmul.f32 0.7978846, %v3507_v12  ;;  %v3501_v36 = vmul.f32 0.044715, %v3493_v52  ;;  %v3487_v0 = vmul.f32 %v3474_v14, %v3474_v14 }
0x191b   :  { %5264 = vtanh.f32 %v3514_v50  ;;  %v3508_v15 = vadd.f32 %v3500_v51, %v3466_v47  ;;  %v3494_v24 = vmul.f32 %v3486_v29, %v3472_v56 }
0x191c   :  { %v3509_v41 = vadd.f32 %v3501_v36, %v3468_v33  ;;  %v3495_v46 = vmul.f32 %v3487_v0, %v3474_v14  ;;  %5266 = vtanh.f32 %v3515_v9 }
0x191d   :  { %v3516_v23 = vmul.f32 0.7978846, %v3508_v15  ;;  %v3502_v6 = vmul.f32 0.044715, %v3494_v24 }
0x191e   :  { %v3517_v30 = vmul.f32 0.7978846, %v3509_v41  ;;  %v3503_v25 = vmul.f32 0.044715, %v3495_v46 }
0x191f   :  { %v3510_v3 = vadd.f32 %v3502_v6, %v3472_v56  ;;  %5268 = vtanh.f32 %v3516_v23  ;;  %v3722_v6 = vld [vmem:[#allocation31] sm:$0xff] }
0x1920   :  { %v3511_v49 = vadd.f32 %v3503_v25, %v3474_v14  ;;  %5270 = vtanh.f32 %v3517_v30  ;;  %v3723_v30 = vld [vmem:[#allocation31 + $0x8] sm:$0xff] }
0x1921   :  { %v3518_v57 = vmul.f32 0.7978846, %v3510_v3  ;;  %v5007_v25 = vpack.c.bf16 %v3723_v30, %v3722_v6  ;;  %v5855_v3 = vmov 0.0|0.0  }
0x1922   :  { %v3519_v58 = vmul.f32 0.7978846, %v3511_v49  ;;  %5006 = vmatprep.subr.bf16.mxu1 %v5855_v3  ;;  %5030 = vmatprep.subr.bf16.mxu0 %v5855_v3  ;;  %v3724_v49 = vld [vmem:[#allocation31 + $0x10] sm:$0xff] }
0x1923   :  { %5272 = vtanh.f32 %v3518_v57  ;;  %5008 = vmatpush3.bf16.msra.mxu1 %v5007_v25  ;;  %v3725_v57 = vld [vmem:[#allocation31 + $0x18] sm:$0xff] }
0x1924   :  { %5274 = vtanh.f32 %v3519_v58  ;;  %5009 = vmatprep.subr.bf16.mxu1 %v5855_v3  ;;  %v5010_v58 = vpack.c.bf16 %v3725_v57, %v3724_v49 }
0x1925   :  { %v5265_v26 = vpop.eup %5264 }
0x1926   :  { %v5267_v4 = vpop.eup %5266  ;;  %v3530_v35 = vadd.f32 1.0, %v5265_v26 }
0x1927   :  { %v3531_v5 = vadd.f32 1.0, %v5267_v4  ;;  %5011 = vmatpush3.bf16.msra.mxu1 %v5010_v58  ;;  %v3726_v4 = vld [vmem:[#allocation31 + $0x20] sm:$0xff] }
0x1928   :  { %v3538_v27 = vmul.f32 0.5, %v3530_v35  ;;  %5012 = vmatprep.subr.bf16.mxu1 %v5855_v3  ;;  %v3727_v35 = vld [vmem:[#allocation31 + $0x28] sm:$0xff] }
0x1929   :  { %v5269_v34 = vpop.eup %5268  ;;  %v3539_v48 = vmul.f32 0.5, %v3531_v5 }
0x192a   :  { %v5271_v37 = vpop.eup %5270  ;;  %v3532_v31 = vadd.f32 1.0, %v5269_v34  ;;  %v3546_v2 = vmul.f32 %v3538_v27, %v3460_v18  ;;  %v4001_v18 = vld [vmem:[#allocation26 + $0x1] ss:$0 sm:$0xff]  ;;  %v5013_v27 = vpack.c.bf16 %v3727_v35, %v3726_v4 }
0x192b   :  { %v3547_v22 = vmul.f32 %v3539_v48, %v3462_v61  ;;  %v3533_v17 = vadd.f32 1.0, %v5271_v37  ;;  %v3728_v48 = vld [vmem:[#allocation31 + $0x30] sm:$0xff]  ;;  %v3729_v37 = vld [vmem:[#allocation31 + $0x38] sm:$0xff] }
0x192c   :  { %v3540_v21 = vmul.f32 0.5, %v3532_v31  ;;  %5014 = vmatpush3.bf16.msra.mxu1 %v5013_v27 }
0x192d   :  { %v5273_v32 = vpop.eup %5272  ;;  %3659 = vmatprep.mubr.f32.mxu0 %v3547_v22  ;;  %v3541_v8 = vmul.f32 0.5, %v3533_v17  ;;  %5015 = vmatprep.subr.bf16.mxu1 %v5855_v3  ;;  %v5016_v22 = vpack.c.bf16 %v3729_v37, %v3728_v48  ;;  %v3730_v17 = vld [vmem:[#allocation31 + $0x40] sm:$0xff] }
0x192e   :  { %v5275_v59 = vpop.eup %5274  ;;  %3660 = vmatmul.mubr.f32.vlgmr.msra.gmra.mrb[34].mxu0 %v3546_v2  ;;  %v3534_v60 = vadd.f32 1.0, %v5273_v32  ;;  %v3548_v63 = vmul.f32 %v3540_v21, %v3466_v47  ;;  %v3731_v2 = vld [vmem:[#allocation31 + $0x48] sm:$0xff]  ;;  %v3732_v32 = vld [vmem:[#allocation31 + $0x50] sm:$0xff] }
0x192f   :  { %v3549_v53 = vmul.f32 %v3541_v8, %v3468_v33  ;;  %v3535_v11 = vadd.f32 1.0, %v5275_v59  ;;  %v3290_v33 = vpop.xlane.xlu0 %3289  ;;  %v5019_v21 = vpack.c.bf16 %v3731_v2, %v3730_v17  ;;  %v3733_v8 = vld [vmem:[#allocation31 + $0x58] sm:$0xff]  ;;  %v3734_v59 = vld [vmem:[#allocation31 + $0x60] sm:$0xff] }
0x1930   :  { %v3542_v28 = vmul.f32 0.5, %v3534_v60  ;;  %v3294_v52 = vmul.f32 0.0078125, %v3290_v33  ;;  %5017 = vmatpush3.bf16.msra.mxu1 %v5016_v22  ;;  %v3735_v60 = vld [vmem:[#allocation31 + $0x68] sm:$0xff]  ;;  %v3832_v22 = vld [vmem:[#allocation34 + $0x50] sm:$0xff]  ;;  %v3833_v17 = vld [vmem:[#allocation34 + $0x58] sm:$0xff] }
0x1931   :  { %3664 = vmatprep.mubr.f32.mxu0 %v3549_v53  ;;  %v3543_v16 = vmul.f32 0.5, %v3535_v11  ;;  %5018 = vmatprep.subr.bf16.mxu1 %v5855_v3  ;;  %v3736_v53 = vld [vmem:[#allocation31 + $0x70] sm:$0xff]  ;;  %v3737_v11 = vld [vmem:[#allocation31 + $0x78] sm:$0xff]  ;;  %v5046_v2 = vpack.c.bf16 %v3833_v17, %v3832_v22 }
0x1932   :  { %3665 = vmatmul.mubr.f32.gmra.mrb[36].mxu0 %v3548_v63  ;;  %v3550_v38 = vmul.f32 %v3542_v28, %v3472_v56  ;;  %v3298_v56 = vsub.f32 %v6812_v55, %v3294_v52  ;;  %v5028_v63 = vpack.c.bf16 %v3737_v11, %v3736_v53  ;;  %v3829_v52 = vld [vmem:[#allocation34 + $0x38] sm:$0xff] }
0x1933   :  { %v3551_v1 = vmul.f32 %v3543_v16, %v3474_v14 }
0x1934   :  { %v3302_v29 = vmul.f32 %v3298_v56, %v3298_v56  ;;  %5020 = vmatpush3.bf16.msra.mxu1 %v5019_v21  ;;  %v3835_v21 = vld [vmem:[#allocation34 + $0x68] sm:$0xff] }
0x1935   :  { %3668 = vmatprep.mubr.f32.mxu0 %v3551_v1  ;;  %5021 = vmatprep.subr.bf16.mxu1 %v5855_v3  ;;  %v3822_v1 = vld [vmem:[#allocation34] sm:$0xff] }
0x1936   :  { %3669 = vmatmul.mubr.f32.gmra.mrb[38].mxu0 %v3550_v38  ;;  %v3823_v38 = vld [vmem:[#allocation34 + $0x8] sm:$0xff] }
0x1a01   :  { %v4226_v61 = vpop.f32.mrb[34].mxu0 }
0x1a02   :  { %v4227_v19 = vpop.f32.mrb[35].mxu0 }
0x1a03   :  { %v4228_v39 = vadd.f32 %v4227_v19, %v4226_v61  ;;  %v3824_v61 = vld [vmem:[#allocation34 + $0x10] sm:$0xff]  ;;  %v3825_v19 = vld [vmem:[#allocation34 + $0x18] sm:$0xff] }
0x1a05   :  { %v3662_v7 = vadd.f32 %v4228_v39, %v4001_v18  ;;  %v4229_v10 = vpop.f32.mrb[36].mxu0  ;;  %v5034_v39 = vpack.c.bf16 %v3825_v19, %v3824_v61 }
0x1a06   :  { %v4230_v54 = vpop.f32.mrb[37].mxu0  ;;  %v3826_v10 = vld [vmem:[#allocation34 + $0x20] sm:$0xff] }
0x1a07   :  { %v3678_v13 = vadd.f32 %v3662_v7, %v6822_v40  ;;  %v3827_v54 = vld [vmem:[#allocation34 + $0x28] sm:$0xff] }
0x1a08   :  { %v5037_v33 = vpack.c.bf16 %v3827_v54, %v3826_v10  ;;  %v4005_v10 = vld [vmem:[#allocation35] ss:$0 sm:$0xff] }
0x1a09   :  { %3684 = vadd.xlane.f32.xlu0 %v3678_v13  ;;  %v4232_v47 = vpop.f32.mrb[38].mxu0 }
0x1a0a   :  { %v4233_v12 = vpop.f32.mrb[39].mxu0 }
0x1a0b   :  { %v4234_v50 = vadd.f32 %v4233_v12, %v4232_v47  ;;  %v3828_v12 = vld [vmem:[#allocation34 + $0x30] sm:$0xff] }
0x1a0d   :  { %v3671_v51 = vadd.f32 %v4234_v50, %v4001_v18  ;;  %v5031_v18 = vpack.c.bf16 %v3823_v38, %v3822_v1  ;;  %v4004_v1 = vld [vmem:[#allocation32] ss:$0 sm:$0xff] }
0x1a0f   :  { %v3679_v14 = vadd.f32 %v3671_v51, %v6833_v62  ;;  %5032 = vmatpush3.bf16.msra.mxu0 %v5031_v18  ;;  %v5040_v51 = vpack.c.bf16 %v3829_v52, %v3828_v12 }
0x1a10   :  { %5033 = vmatprep.subr.bf16.mxu0 %v5855_v3 }
0x1a11   :  { %3686 = vadd.xlane.f32.xlu1 %v3679_v14 }
0x1a13   :  { %5035 = vmatpush3.bf16.msra.mxu0 %v5034_v39 }
0x1a14   :  { %5036 = vmatprep.subr.bf16.mxu0 %v5855_v3 }
0x1a15   :  { %3309 = vadd.xlane.f32.xlu1 %v3302_v29 }
0x1a17   :  { %5038 = vmatpush3.bf16.msra.mxu0 %v5037_v33 }
0x1a18   :  { %5039 = vmatprep.subr.bf16.mxu0 %v5855_v3 }
0x1a1b   :  { %5041 = vmatpush3.bf16.msra.mxu0 %v5040_v51 }
0x1a1c   :  { %5042 = vmatprep.subr.bf16.mxu0 %v5855_v3 }
0x1a96   :  { %v3685_v9 = vpop.xlane.xlu0 %3684 }
0x1a97   :  { %v3688_v36 = vmul.f32 0.0078125, %v3685_v9 }
0x1a99   :  { %v6852_v0 = vsub.f32 %v3678_v13, %v3688_v36 }
0x1a9b   :  { %v3692_v40 = vmul.f32 %v6852_v0, %v6852_v0 }
0x1a9d   :  { %3694 = vadd.xlane.f32.xlu1 %v3692_v40 }
0x1a9e   :  { %v3687_v15 = vpop.xlane.xlu1 %3686 }
0x1a9f   :  { %v3689_v24 = vmul.f32 0.0078125, %v3687_v15  ;;  %v4002_v15 = vld [vmem:[#allocation28 + $0x1] ss:$0 sm:$0xff] }
0x1aa1   :  { %v6856_v41 = vsub.f32 %v3679_v14, %v3689_v24  ;;  %v3831_v14 = vld [vmem:[#allocation34 + $0x48] sm:$0xff] }
0x1aa2   :  { %v3310_v46 = vpop.xlane.xlu1 %3309 }
0x1aa3   :  { %v3314_v23 = vmul.f32 0.0078125, %v3310_v46  ;;  %v3693_v55 = vmul.f32 %v6856_v41, %v6856_v41 }
0x1aa5   :  { %v3318_v62 = vadd.f32 1e-12, %v3314_v23  ;;  %3696 = vadd.xlane.f32.xlu0 %v3693_v55  ;;  %v4003_v55 = vld [vmem:[#allocation29 + $0x1] ss:$0 sm:$0xff] }
0x1aa7   :  { %5276 = vrsqrt.f32 %v3318_v62 }
0x1ab1   :  { %v5277_v26 = vpop.eup %5276 }
0x1ab2   :  { %v3326_v5 = vmul.f32 %v5277_v26, %v3298_v56  ;;  %v3830_v56 = vld [vmem:[#allocation34 + $0x40] sm:$0xff] }
0x1ab3   :  { %v5043_v29 = vpack.c.bf16 %v3831_v14, %v3830_v56 }
0x1ab4   :  { %v3336_v34 = vmul.f32 %v6815_v45, %v3326_v5  ;;  %v5022_v45 = vpack.c.bf16 %v3733_v8, %v3732_v32  ;;  %v3836_v8 = vld [vmem:[#allocation34 + $0x70] sm:$0xff] }
0x1ab5   :  { %5044 = vmatpush3.bf16.msra.mxu0 %v5043_v29 }
0x1ab6   :  { %v3346_v31 = vadd.f32 %v6818_v42, %v3336_v34  ;;  %5023 = vmatpush3.bf16.msra.mxu1 %v5022_v45  ;;  %v5025_v42 = vpack.c.bf16 %v3735_v60, %v3734_v59  ;;  %5045 = vmatprep.subr.bf16.mxu0 %v5855_v3  ;;  %v3837_v45 = vld [vmem:[#allocation34 + $0x78] sm:$0xff] }
0x1ab7   :  { %5024 = vmatprep.subr.bf16.mxu1 %v5855_v3  ;;  %v5052_v11 = vpack.c.bf16 %v3837_v45, %v3836_v8 }
0x1ab8   :  { %3476 = vmatmul.mubr.f32.gmra.mrb[52].mxu1 %v3346_v31 }
0x1ab9   :  { %4568 = vmatprep.mubr.msk.f32.mxu1 %vm5856_vm3, %v5853_v20  ;;  %5047 = vmatpush3.bf16.msra.mxu0 %v5046_v2 }
0x1aba   :  { %5026 = vmatpush3.bf16.msra.mxu1 %v5025_v42  ;;  %5048 = vmatprep.subr.bf16.mxu0 %v5855_v3 }
0x1abb   :  { %5027 = vmatprep.subr.bf16.mxu1 %v5855_v3 }
0x1abe   :  { %5029 = vmatpush3.bf16.msra.mxu1 %v5028_v63 }
0x1b2a   :  { %v3695_v28 = vpop.xlane.xlu1 %3694 }
0x1b2b   :  { %v3698_v16 = vmul.f32 0.0078125, %v3695_v28 }
0x1b2d   :  { %v3700_v7 = vadd.f32 1e-12, %v3698_v16 }
0x1b2f   :  { %5278 = vrsqrt.f32 %v3700_v7 }
0x1b32   :  { %v3697_v13 = vpop.xlane.xlu0 %3696 }
0x1b33   :  { %v3699_v47 = vmul.f32 0.0078125, %v3697_v13 }
0x1b35   :  { %v3701_v50 = vadd.f32 1e-12, %v3699_v47 }
0x1b37   :  { %5280 = vrsqrt.f32 %v3701_v50 }
0x1b39   :  { %v5279_v9 = vpop.eup %5278 }
0x1b3a   :  { %v3704_v36 = vmul.f32 %v5279_v9, %v6852_v0 }
0x1b3c   :  { %v3712_v46 = vmul.f32 %v4002_v15, %v3704_v36 }
0x1b3e   :  { %v3720_v6 = vadd.f32 %v4003_v55, %v3712_v46 }
0x1b41   :  { %v5281_v40 = vpop.eup %5280 }
0x1b42   :  { %v3705_v24 = vmul.f32 %v5281_v40, %v6856_v41 }
0x1b44   :  { %v3713_v23 = vmul.f32 %v4002_v15, %v3705_v24 }
0x1b46   :  { %v3721_v62 = vadd.f32 %v4003_v55, %v3713_v23 }
0x1b48   :  { %v3747_v30 = vrot.slane %v3721_v62, 7 }
0x1b4a   :  { %v3749_v25 = vsel %vm3748_vm4, %v3747_v30, %v3720_v6 }
0x1b4b   :  { %4569 = vmatmul.mubr.f32.vlgmr.msra.gmra.mrb[54].mxu1 %v3749_v25 }
0x1b8b   :  { %v3477_v49 = vpop.f32.mrb[52].mxu1 }
0x1b8c   :  { %v3478_v57 = vadd.f32 %v3477_v49, %v6838_v44  ;;  %v3479_v58 = vpop.f32.mrb[53].mxu1  ;;  %v3834_v44 = vld [vmem:[#allocation34 + $0x60] sm:$0xff] }
0x1b8d   :  { %v3480_v26 = vadd.f32 %v3479_v58, %v6841_v43  ;;  %v5049_v43 = vpack.c.bf16 %v3835_v21, %v3834_v44 }
0x1b8e   :  { %v3488_v0 = vmul.f32 %v3478_v57, %v3478_v57 }
0x1b8f   :  { %v3489_v4 = vmul.f32 %v3480_v26, %v3480_v26  ;;  %5050 = vmatpush3.bf16.msra.mxu0 %v5049_v43 }
0x1b90   :  { %v3496_v35 = vmul.f32 %v3488_v0, %v3478_v57  ;;  %5051 = vmatprep.subr.bf16.mxu0 %v5855_v3 }
0x1b91   :  { %v3497_v5 = vmul.f32 %v3489_v4, %v3480_v26 }
0x1b92   :  { %v3504_v41 = vmul.f32 0.044715, %v3496_v35 }
0x1b93   :  { %v3505_v27 = vmul.f32 0.044715, %v3497_v5  ;;  %5053 = vmatpush3.bf16.msra.mxu0 %v5052_v11 }
0x1b94   :  { %v3512_v34 = vadd.f32 %v3504_v41, %v3478_v57 }
0x1b95   :  { %v3513_v48 = vadd.f32 %v3505_v27, %v3480_v26 }
0x1b96   :  { %v3520_v37 = vmul.f32 0.7978846, %v3512_v34 }
0x1b97   :  { %v3521_v31 = vmul.f32 0.7978846, %v3513_v48 }
0x1b98   :  { %5282 = vtanh.f32 %v3520_v37 }
0x1b99   :  { %5284 = vtanh.f32 %v3521_v31 }
0x1ba2   :  { %v5283_v32 = vpop.eup %5282 }
0x1ba3   :  { %v5285_v59 = vpop.eup %5284  ;;  %v3536_v60 = vadd.f32 1.0, %v5283_v32 }
0x1ba4   :  { %v3537_v42 = vadd.f32 1.0, %v5285_v59 }
0x1ba5   :  { %v3544_v53 = vmul.f32 0.5, %v3536_v60 }
0x1ba6   :  { %v3545_v63 = vmul.f32 0.5, %v3537_v42 }
0x1ba7   :  { %v3552_v16 = vmul.f32 %v3544_v53, %v3478_v57 }
0x1ba8   :  { %v3553_v28 = vmul.f32 %v3545_v63, %v3480_v26 }
0x1baa   :  { %3673 = vmatprep.mubr.f32.mxu0 %v3553_v28 }
0x1bab   :  { %3674 = vmatmul.mubr.f32.gmra.mrb[40].mxu0 %v3552_v16 }
0x1bac   :  { %4603 = vmatprep.mubr.msk.f32.mxu0 %vm5856_vm3, %v5853_v20 }
0x1c1e   :  { %v3817_v38 = vpop.f32.mrb[54].mxu1 }
0x1c1f   :  { %v3818_v61 = vadd.f32 %v4004_v1, %v3817_v38  ;;  %v4570_v18 = vpop.f32.mrb[55].mxu1 }
0x1c21   :  { %5286 = vtanh.f32 %v3818_v61 }
0x1c2b   :  { %v5287_v19 = vpop.eup %5286 }
0x1c2c   :  { %4604 = vmatmul.mubr.f32.vlgmr.msra.gmra.mrb[42].mxu0 %v5287_v19 }
0x1c7e   :  { %v4235_v39 = vpop.f32.mrb[40].mxu0 }
0x1c7f   :  { %v4236_v7 = vpop.f32.mrb[41].mxu0 }
0x1cff   :  { %v3911_v3 = vpop.f32.mrb[42].mxu0 }
0x1d00   :  { %v3912_v54 = vadd.f32 %v4005_v10, %v3911_v3  ;;  %v4605_v13 = vpop.f32.mrb[43].mxu0 }
0x1d02   :  { %3915 = vst [vmem:[#allocation37] sm:$0x3] %v3912_v54 }
0x1d03   :  { %5783 = shalt.err (!%p5780_p12)
}
0x1d04   :  { %s6952_s12 = sld [smem:[#allocation60_spill]] }
0x1d0a   :  { %s5784_s25 = scalar_lea.hbm %s6952_s12, 32 }
0x1d0b   :  { %p5785_p13 = scmp.ne.s32.totalorder %s6952_s12, %s5784_s25  ;;  %p5788_p0 = scmp.lt.u32.totalorder %s5784_s25, %s6952_s12 }
0x1d0d   :  { %p5790_p1 = pnand %p5788_p0, %p5785_p13 }
0x1d0f   :  { %5793 = shalt.err (!%p5790_p1)
}
0x1d10   :  { %3925 = dma.vmem_to_hbm [thread:$0]  %s3923_s16, 32, %s6952_s12, [#allocation4]  }
0x1d11   :  { %5818 = dma.done.wait [#allocation4], 32  }
0x1d12   :  { %5819 = vsyncadd [#allocation4], 4294967264 }
0x1d13   :  { %3929 = vsyncpa [#allocation3], 1 }
0x1d14   :  { %3930 = vsyncpa [#allocation6], 1 }
0x1d15   :  { %3931 = vsyncpa [#allocation9], 1 }
0x1d16   :  { %3932 = vsyncpa [#allocation12], 1 }
0x1d17   :  { %3933 = vsyncpa [#allocation15], 1 }
0x1d18   :  { %3934 = vsyncpa [#allocation18], 1 }
0x1d19   :  { %3935 = vsyncpa [#allocation21], 1 }
0x1d1a   :  { %3936 = vsyncpa [#allocation24], 1 }
0x1d1b   :  { %3937 = vsyncpa [#allocation27], 1 }
0x1d1c   :  { %3938 = vsyncpa [#allocation30], 1 }
0x1d1d   :  { %3939 = vsyncpa [#allocation33], 1 }
0x1d1e   :  { %3940 = vsyncpa [#allocation36], 1 }
0x1d1f   :  { %3941 = vsyncpa [#allocation4], 1 }

</bundles_post_ra>
